<compile_context>
chip_gen: v7x
topology: tpu7x:2x2x1
jax: 0.10.0
libtpu: 0.0.40
codegen_flags: <defaults>
</compile_context>

<pallas_src>
import functools
import math

import jax
import jax.numpy as jnp
import numpy as np
from jax import lax
from jax.experimental import pallas as pl
from jax.experimental.pallas import tpu as pltpu

_EPS = 1e-5  # nn.BatchNorm2d default eps


def _bn_relu_bf16(y, inv_m):
    # training-mode BatchNorm2d (gamma=1, beta=0, biased batch variance) fused with ReLU.
    # y: (N, Cb, HW) f32; per-channel stats over (batch, spatial); rsqrt on the EUP slot.
    # Single-pass E[y^2]-mean^2 (clamped) kept for perf; slight precision delta vs. PyTorch.
    s = jnp.sum(jnp.sum(y, axis=2, keepdims=True), axis=0, keepdims=True)
    ss = jnp.sum(jnp.sum(y * y, axis=2, keepdims=True), axis=0, keepdims=True)
    mean = s * inv_m
    var = jnp.maximum(ss * inv_m - mean * mean, 0.0)
    scale = lax.rsqrt(var + _EPS)
    return jnp.maximum((y - mean) * scale, 0.0).astype(jnp.bfloat16)


def _shift_hw(v, off):
    # out[..., p] = v[..., p + off] if 0 <= p + off < HW else 0   (static off)
    if off == 0:
        return v
    hw = v.shape[-1]
    pad = jnp.zeros(v.shape[:-1] + (abs(off),), v.dtype)
    if off > 0:
        return jnp.concatenate([v[..., off:], pad], axis=-1)
    return jnp.concatenate([pad, v[..., :hw + off]], axis=-1)


def _im2col_3x3(y, img_w, col_mod):
    # y: (N, Cb, HW) bf16 -> (N, 9*Cb, HW) bf16, exact 3x3 / stride 1 / zero-pad 1 im2col.
    # Vertical padding comes from the zero fill in _shift_hw; horizontal padding is handled
    # by zeroing, once per direction, the single input column an out-of-row read aliases.
    y_left = jnp.where(col_mod != img_w - 1, y, 0)   # dx = 0 taps read the left neighbour
    y_right = jnp.where(col_mod != 0, y, 0)          # dx = 2 taps read the right neighbour
    srcs = (y_left, y, y_right)
    pieces = []
    for t in range(9):
        dy, dx = divmod(t, 3)
        off = (dy - 1) * img_w + (dx - 1)
        pieces.append(_shift_hw(srcs[dx], off))
    return jnp.concatenate(pieces, axis=1)


def _bottleneck_gru_kernel(xh_ref,
                           w1ab_ref, w2ab_ref, w3ab_ref, b3ab_ref,
                           w1r_ref, w2r_ref, w3r_ref, b3r_ref,
                           out_ref, newh_ref, *, img_w):
    N, C, HW = out_ref.shape
    f32, bf16 = jnp.float32, jnp.bfloat16
    inv_m = 1.0 / float(N * HW)

    def bmm(w_ref, x_bf16):
        # (Co, K) @ (N, K, HW) -> (N, Co, HW); bf16 MXU operands, f32 accumulation;
        # the spatial dim HW stays in lanes (fully dense).  N is tiny and static.
        w = w_ref[...]
        return jnp.stack([jnp.dot(w, x_bf16[b], preferred_element_type=f32)
                          for b in range(N)], axis=0)

    col_mod = lax.broadcasted_iota(jnp.int32, (1, 1, HW), 2) % img_w

    xh = xh_ref[...]                        # (N, 2C, HW) f32: [x ; hidden] along channels
    x = xh[:, 0:C, :]
    h = xh[:, C:2 * C, :]

    # ---- fused group: xz / xr / xh (on x) and hz / hr (on hidden) ---------------------
    # conv1 (1x1): one block-sparse matmul; conv1/conv2 biases omitted (exact under BN).
    y1 = _bn_relu_bf16(bmm(w1ab_ref, xh.astype(bf16)), inv_m)          # (N, 5P, HW)
    # conv2 (3x3): single im2col matmul, K = 9*5P.
    patches = _im2col_3x3(y1, img_w, col_mod)                          # (N, 45P, HW)
    y2 = _bn_relu_bf16(bmm(w2ab_ref, patches), inv_m)                  # (N, 5P, HW)
    # conv3 (1x1): one matmul producing [z_lin | r_lin | xh_lin]; gate sums folded in.
    lin = bmm(w3ab_ref, y2) + b3ab_ref[...]                            # (N, 3C, HW)

    z = jax.nn.sigmoid(lin[:, 0:C, :])
    r = jax.nn.sigmoid(lin[:, C:2 * C, :])
    xh3 = lin[:, 2 * C:3 * C, :]

    # ---- rh branch on (r * hidden) -----------------------------------------------------
    y1r = _bn_relu_bf16(bmm(w1r_ref, (r * h).astype(bf16)), inv_m)     # (N, P, HW)
    patches_r = _im2col_3x3(y1r, img_w, col_mod)                       # (N, 9P, HW)
    y2r = _bn_relu_bf16(bmm(w2r_ref, patches_r), inv_m)                # (N, P, HW)
    rh3 = bmm(w3r_ref, y2r) + b3r_ref[...]                             # (N, C, HW)

    # ---- GRU update + residual ---------------------------------------------------------
    h_tilde = jnp.tanh(xh3 + rh3)
    new_h = (1.0 - z) * h + z * h_tilde
    out_ref[...] = (x + new_h).astype(out_ref.dtype)                   # residual (x_ch == ch)
    newh_ref[...] = new_h.astype(newh_ref.dtype)


def pack_params(params, channels, planes):
    """Pack the 6 Bottleneck branches into the fused, transposed matrices the kernel uses."""
    w1, w2, w3, b3 = (np.asarray(p, np.float32) for p in params)
    C, P = channels, planes
    GP = 5 * P
    order = (0, 2, 4, 1, 3)      # fused channel-block order: xz | xr | xh | hz | hr

    # conv1: block-sparse (5P, 2C); x feeds the first 3 output blocks, hidden the last 2.
    w1ab = np.zeros((GP, 2 * C), np.float32)
    w1ab[0 * P:1 * P, 0:C] = w1[0].T          # xz
    w1ab[1 * P:2 * P, 0:C] = w1[2].T          # xr
    w1ab[2 * P:3 * P, 0:C] = w1[4].T          # xh
    w1ab[3 * P:4 * P, C:2 * C] = w1[1].T      # hz
    w1ab[4 * P:5 * P, C:2 * C] = w1[3].T      # hr

    # conv2 (3x3) as a single im2col matmul: (5P, 9*5P), block-diagonal within each tap.
    w2ab = np.zeros((GP, 9 * GP), np.float32)
    for t in range(9):
        dy, dx = divmod(t, 3)
        for g, b in enumerate(order):
            w2ab[g * P:(g + 1) * P, t * GP + g * P: t * GP + (g + 1) * P] = w2[b, dy, dx].T
    w2r = np.zeros((P, 9 * P), np.float32)
    for t in range(9):
        dy, dx = divmod(t, 3)
        w2r[:, t * P:(t + 1) * P] = w2[5, dy, dx].T

    # conv3: (3C, 5P) producing [z | r | xh] rows with the xz+hz / xr+hr gate sums fused.
    w3ab = np.zeros((3 * C, GP), np.float32)
    w3ab[0:C, 0 * P:1 * P] = w3[0].T                  # xz -> z
    w3ab[0:C, 3 * P:4 * P] = w3[1].T                  # hz -> z
    w3ab[C:2 * C, 1 * P:2 * P] = w3[2].T              # xr -> r
    w3ab[C:2 * C, 4 * P:5 * P] = w3[3].T              # hr -> r
    w3ab[2 * C:3 * C, 2 * P:3 * P] = w3[4].T          # xh -> h~
    b3ab = np.concatenate([b3[0] + b3[1], b3[2] + b3[3], b3[4]], axis=-1).reshape(3 * C, 1)
    w1r = w1[5].T                                     # (P, C)
    w3r = w3[5].T                                     # (C, P)
    b3r = b3[5].reshape(C, 1)

    bf = jnp.bfloat16
    return (jnp.asarray(w1ab, bf), jnp.asarray(w2ab, bf),
            jnp.asarray(w3ab, bf), jnp.asarray(b3ab, jnp.float32),
            jnp.asarray(w1r, bf), jnp.asarray(w2r, bf),
            jnp.asarray(w3r, bf), jnp.asarray(b3r, jnp.float32))


def bottleneck_gru_rcn_cell(x_nchw, hidden_nchw, packed):
    """Returns (module_output, new_hidden) in NCHW, matching the PyTorch forward."""
    w1ab, w2ab, w3ab, b3ab, w1r, w2r, w3r, b3r = packed
    N, C, H, W = x_nchw.shape
    HW = H * W
    # Lane-dense layout (batch, channels, H*W): NCHW -> this is a contiguous (free) reshape,
    # so both NCHW<->NHWC transposes of the previous version are gone.
    xh = jnp.concatenate([x_nchw.reshape(N, C, HW),
                          hidden_nchw.reshape(N, C, HW)], axis=1).astype(jnp.float32)

    out_flat, newh_flat = pl.pallas_call(
        functools.partial(_bottleneck_gru_kernel, img_w=W),
        out_shape=(jax.ShapeDtypeStruct((N, C, HW), jnp.float32),
                   jax.ShapeDtypeStruct((N, C, HW), jnp.float32)),
        in_specs=[pl.BlockSpec(memory_space=pltpu.MemorySpace.VMEM)] * 9,
        out_specs=(pl.BlockSpec(memory_space=pltpu.MemorySpace.VMEM),
                   pl.BlockSpec(memory_space=pltpu.MemorySpace.VMEM)),
        compiler_params=pltpu.CompilerParams(vmem_limit_bytes=32 * 1024 * 1024),
    )(xh, w1ab, w2ab, w3ab, b3ab, w1r, w2r, w3r, b3r)

    return out_flat.reshape(N, C, H, W), newh_flat.reshape(N, C, H, W)


def init_params(key, channels, planes):
    """Deterministic params for the 6 Bottleneck branches (order: xz, hz, xr, hr, xh, rh).

    Conv weights ~ N(0, sqrt(2/(kh*kw*out_ch))) as in GRURCNCellBase.__init__; conv3 bias
    uses PyTorch's default uniform(-1/sqrt(fan_in), 1/sqrt(fan_in)). conv1/conv2 biases are
    omitted: a per-channel constant before training-mode BatchNorm is cancelled exactly by
    the mean subtraction. BN gamma=1 / beta=0 are baked into the kernel.
    """
    ks = jax.random.split(key, 4)
    C, P = channels, planes
    std1 = math.sqrt(2.0 / (1 * 1 * P))
    std2 = math.sqrt(2.0 / (3 * 3 * P))
    std3 = math.sqrt(2.0 / (1 * 1 * C))
    bnd3 = 1.0 / math.sqrt(P * 1 * 1)

    w1 = std1 * jax.random.normal(ks[0], (6, C, P), jnp.float32)        # conv1 weight (in, out)
    w2 = std2 * jax.random.normal(ks[1], (6, 3, 3, P, P), jnp.float32)  # conv2 taps   (in, out)
    w3 = std3 * jax.random.normal(ks[2], (6, P, C), jnp.float32)        # conv3 weight (in, out)
    b3 = jax.random.uniform(ks[3], (6, 1, C), jnp.float32, -bnd3, bnd3)
    return (w1, w2, w3, b3)


if __name__ == "__main__":
    key = jax.random.PRNGKey(0)
    N, C, H, W = 2, 32, 16, 16            # channels=32, x_channels=None -> no downsample path
    planes = C // 4

    k_x, k_p = jax.random.split(key)
    x = jax.random.normal(k_x, (N, C, H, W), jnp.float32)
    hidden = jnp.zeros((N, C, H, W), jnp.float32)   # first call: self.hidden = zeros_like(xz(x))
    params = init_params(k_p, C, planes)
    packed = pack_params(params, C, planes)

    out, new_hidden = bottleneck_gru_rcn_cell(x, hidden, packed)
    out = jax.block_until_ready(out)
    jax.block_until_ready(new_hidden)

    assert out.shape == (N, C, H, W) and out.dtype == jnp.float32
    assert bool(jnp.all(jnp.isfinite(out)))
    assert bool(jnp.all(jnp.isfinite(new_hidden)))
    print("KERNEL_OK")
</pallas_src>

<mosaic_0001>
module attributes {stable_mosaic.version = 11 : i64} {
  func.func @_bottleneck_gru_kernel(%arg0: memref<2x64x256xf32, #tpu.memory_space<vmem>>, %arg1: memref<40x64xbf16, #tpu.memory_space<vmem>>, %arg2: memref<40x360xbf16, #tpu.memory_space<vmem>>, %arg3: memref<96x40xbf16, #tpu.memory_space<vmem>>, %arg4: memref<96x1xf32, #tpu.memory_space<vmem>>, %arg5: memref<8x32xbf16, #tpu.memory_space<vmem>>, %arg6: memref<8x72xbf16, #tpu.memory_space<vmem>>, %arg7: memref<32x8xbf16, #tpu.memory_space<vmem>>, %arg8: memref<32x1xf32, #tpu.memory_space<vmem>>, %arg9: memref<2x32x256xf32, #tpu.memory_space<vmem>>, %arg10: memref<2x32x256xf32, #tpu.memory_space<vmem>>) attributes {dimension_semantics = [], scalar_prefetch = 0 : i64, scratch_operands = 0 : i64, tpu.core_type = #tpu.core_type<tc>} {
    %0 = tpu.iota {dimensions = array<i32: 2>} : vector<1x1x256xi32>
    %c16_i32 = arith.constant 16 : i32
    %c0_i32 = arith.constant 0 : i32
    %1 = arith.cmpi eq, %c16_i32, %c0_i32 : i32
    %c1_i32 = arith.constant 1 : i32
    %2 = arith.select %1, %c1_i32, %c16_i32 : i32
    %3 = vector.broadcast %2 : i32 to vector<1x1x256xi32>
    %4 = arith.remsi %0, %3 : vector<1x1x256xi32>
    %c0_i32_0 = arith.constant 0 : i32
    %5 = vector.broadcast %c0_i32_0 : i32 to vector<1x1x256xi32>
    %6 = arith.cmpi ne, %4, %5 : vector<1x1x256xi32>
    %c0_i32_1 = arith.constant 0 : i32
    %7 = vector.broadcast %c0_i32_1 : i32 to vector<1x1x256xi32>
    %8 = arith.cmpi slt, %4, %7 : vector<1x1x256xi32>
    %c0_i32_2 = arith.constant 0 : i32
    %9 = arith.cmpi slt, %2, %c0_i32_2 : i32
    %10 = vector.broadcast %9 : i1 to vector<1x1x256xi1>
    %11 = vector.broadcast %10 : vector<1x1x256xi1> to vector<1x1x256xi1>
    %12 = arith.xori %8, %11 : vector<1x1x256xi1>
    %13 = arith.andi %12, %6 : vector<1x1x256xi1>
    %14 = vector.broadcast %2 : i32 to vector<1x1x256xi32>
    %15 = arith.addi %4, %14 : vector<1x1x256xi32>
    %16 = arith.select %13, %15, %4 : vector<1x1x256xi1>, vector<1x1x256xi32>
    %c0 = arith.constant 0 : index
    %c0_3 = arith.constant 0 : index
    %c0_4 = arith.constant 0 : index
    %17 = vector.load %arg0[%c0, %c0_3, %c0_4] : memref<2x64x256xf32, #tpu.memory_space<vmem>>, vector<2x64x256xf32>
    %18 = vector.extract_strided_slice %17 {offsets = [0, 0, 0], sizes = [2, 32, 256], strides = [1, 1, 1]} : vector<2x64x256xf32> to vector<2x32x256xf32>
    %19 = vector.extract_strided_slice %17 {offsets = [0, 32, 0], sizes = [2, 32, 256], strides = [1, 1, 1]} : vector<2x64x256xf32> to vector<2x32x256xf32>
    %20 = arith.truncf %17 : vector<2x64x256xf32> to vector<2x64x256xbf16>
    %c0_5 = arith.constant 0 : index
    %c0_6 = arith.constant 0 : index
    %21 = vector.load %arg1[%c0_5, %c0_6] : memref<40x64xbf16, #tpu.memory_space<vmem>>, vector<40x64xbf16>
    %22 = vector.extract_strided_slice %20 {offsets = [0, 0, 0], sizes = [1, 64, 256], strides = [1, 1, 1]} : vector<2x64x256xbf16> to vector<1x64x256xbf16>
    %23 = vector.shape_cast %22 : vector<1x64x256xbf16> to vector<64x256xbf16>
    %cst = arith.constant dense<0.000000e+00> : vector<40x256xf32>
    %24 = tpu.matmul %21, %23, %cst {dimension_numbers = #tpu.dot_dimension_numbers<[1], [0], [0], [1], [0, 0, 1, 1], [], []>} : vector<40x64xbf16>, vector<64x256xbf16>, vector<40x256xf32> -> vector<40x256xf32>
    %25 = vector.extract_strided_slice %20 {offsets = [1, 0, 0], sizes = [1, 64, 256], strides = [1, 1, 1]} : vector<2x64x256xbf16> to vector<1x64x256xbf16>
    %26 = vector.shape_cast %25 : vector<1x64x256xbf16> to vector<64x256xbf16>
    %cst_7 = arith.constant dense<0.000000e+00> : vector<40x256xf32>
    %27 = tpu.matmul %21, %26, %cst_7 {dimension_numbers = #tpu.dot_dimension_numbers<[1], [0], [0], [1], [0, 0, 1, 1], [], []>} : vector<40x64xbf16>, vector<64x256xbf16>, vector<40x256xf32> -> vector<40x256xf32>
    %28 = vector.shape_cast %24 : vector<40x256xf32> to vector<1x40x256xf32>
    %29 = vector.shape_cast %27 : vector<40x256xf32> to vector<1x40x256xf32>
    %30 = tpu.concatenate %28, %29 in 0 : vector<1x40x256xf32>, vector<1x40x256xf32> -> vector<2x40x256xf32>
    %cst_8 = arith.constant dense<0.000000e+00> : vector<2x40xf32>
    %31 = vector.multi_reduction <add>, %30, %cst_8 [2] : vector<2x40x256xf32> to vector<2x40xf32>
    %32 = vector.shape_cast %31 : vector<2x40xf32> to vector<2x40x1xf32>
    %cst_9 = arith.constant dense<0.000000e+00> : vector<40x1xf32>
    %33 = vector.multi_reduction <add>, %32, %cst_9 [0] : vector<2x40x1xf32> to vector<40x1xf32>
    %34 = vector.shape_cast %33 : vector<40x1xf32> to vector<1x40x1xf32>
    %35 = arith.mulf %30, %30 : vector<2x40x256xf32>
    %cst_10 = arith.constant dense<0.000000e+00> : vector<2x40xf32>
    %36 = vector.multi_reduction <add>, %35, %cst_10 [2] : vector<2x40x256xf32> to vector<2x40xf32>
    %37 = vector.shape_cast %36 : vector<2x40xf32> to vector<2x40x1xf32>
    %cst_11 = arith.constant dense<0.000000e+00> : vector<40x1xf32>
    %38 = vector.multi_reduction <add>, %37, %cst_11 [0] : vector<2x40x1xf32> to vector<40x1xf32>
    %39 = vector.shape_cast %38 : vector<40x1xf32> to vector<1x40x1xf32>
    %cst_12 = arith.constant 0.001953125 : f32
    %40 = vector.broadcast %cst_12 : f32 to vector<1x40x1xf32>
    %41 = arith.mulf %34, %40 : vector<1x40x1xf32>
    %cst_13 = arith.constant 0.001953125 : f32
    %42 = vector.broadcast %cst_13 : f32 to vector<1x40x1xf32>
    %43 = arith.mulf %39, %42 : vector<1x40x1xf32>
    %44 = arith.mulf %41, %41 : vector<1x40x1xf32>
    %45 = arith.subf %43, %44 : vector<1x40x1xf32>
    %cst_14 = arith.constant 0.000000e+00 : f32
    %46 = vector.broadcast %cst_14 : f32 to vector<1x40x1xf32>
    %47 = arith.maximumf %45, %46 : vector<1x40x1xf32>
    %cst_15 = arith.constant 9.99999974E-6 : f32
    %48 = vector.broadcast %cst_15 : f32 to vector<1x40x1xf32>
    %49 = arith.addf %47, %48 : vector<1x40x1xf32>
    %50 = math.rsqrt %49 : vector<1x40x1xf32>
    %51 = vector.broadcast %41 : vector<1x40x1xf32> to vector<2x40x256xf32>
    %52 = arith.subf %30, %51 : vector<2x40x256xf32>
    %53 = vector.broadcast %50 : vector<1x40x1xf32> to vector<2x40x256xf32>
    %54 = arith.mulf %52, %53 : vector<2x40x256xf32>
    %cst_16 = arith.constant 0.000000e+00 : f32
    %55 = vector.broadcast %cst_16 : f32 to vector<2x40x256xf32>
    %56 = arith.maximumf %54, %55 : vector<2x40x256xf32>
    %57 = arith.truncf %56 : vector<2x40x256xf32> to vector<2x40x256xbf16>
    %c15_i32 = arith.constant 15 : i32
    %58 = vector.broadcast %c15_i32 : i32 to vector<1x1x256xi32>
    %59 = arith.cmpi ne, %16, %58 : vector<1x1x256xi32>
    %c0_i32_17 = arith.constant 0 : i32
    %60 = arith.sitofp %c0_i32_17 : i32 to bf16
    %61 = vector.shape_cast %59 : vector<1x1x256xi1> to vector<1x1x256xi1>
    %62 = vector.broadcast %61 : vector<1x1x256xi1> to vector<2x40x256xi1>
    %63 = vector.broadcast %60 : bf16 to vector<2x40x256xbf16>
    %64 = arith.select %62, %57, %63 : vector<2x40x256xi1>, vector<2x40x256xbf16>
    %c0_i32_18 = arith.constant 0 : i32
    %65 = vector.broadcast %c0_i32_18 : i32 to vector<1x1x256xi32>
    %66 = arith.cmpi ne, %16, %65 : vector<1x1x256xi32>
    %c0_i32_19 = arith.constant 0 : i32
    %67 = arith.sitofp %c0_i32_19 : i32 to bf16
    %68 = vector.shape_cast %66 : vector<1x1x256xi1> to vector<1x1x256xi1>
    %69 = vector.broadcast %68 : vector<1x1x256xi1> to vector<2x40x256xi1>
    %70 = vector.broadcast %67 : bf16 to vector<2x40x256xbf16>
    %71 = arith.select %69, %57, %70 : vector<2x40x256xi1>, vector<2x40x256xbf16>
    %cst_20 = arith.constant 0.000000e+00 : bf16
    %72 = vector.broadcast %cst_20 : bf16 to vector<2x40x17xbf16>
    %73 = vector.extract_strided_slice %64 {offsets = [0, 0, 0], sizes = [2, 40, 239], strides = [1, 1, 1]} : vector<2x40x256xbf16> to vector<2x40x239xbf16>
    %74 = tpu.concatenate %72, %73 in 2 : vector<2x40x17xbf16>, vector<2x40x239xbf16> -> vector<2x40x256xbf16>
    %cst_21 = arith.constant 0.000000e+00 : bf16
    %75 = vector.broadcast %cst_21 : bf16 to vector<2x40x16xbf16>
    %76 = vector.extract_strided_slice %57 {offsets = [0, 0, 0], sizes = [2, 40, 240], strides = [1, 1, 1]} : vector<2x40x256xbf16> to vector<2x40x240xbf16>
    %77 = tpu.concatenate %75, %76 in 2 : vector<2x40x16xbf16>, vector<2x40x240xbf16> -> vector<2x40x256xbf16>
    %cst_22 = arith.constant 0.000000e+00 : bf16
    %78 = vector.broadcast %cst_22 : bf16 to vector<2x40x15xbf16>
    %79 = vector.extract_strided_slice %71 {offsets = [0, 0, 0], sizes = [2, 40, 241], strides = [1, 1, 1]} : vector<2x40x256xbf16> to vector<2x40x241xbf16>
    %80 = tpu.concatenate %78, %79 in 2 : vector<2x40x15xbf16>, vector<2x40x241xbf16> -> vector<2x40x256xbf16>
    %cst_23 = arith.constant 0.000000e+00 : bf16
    %81 = vector.broadcast %cst_23 : bf16 to vector<2x40x1xbf16>
    %82 = vector.extract_strided_slice %64 {offsets = [0, 0, 0], sizes = [2, 40, 255], strides = [1, 1, 1]} : vector<2x40x256xbf16> to vector<2x40x255xbf16>
    %83 = tpu.concatenate %81, %82 in 2 : vector<2x40x1xbf16>, vector<2x40x255xbf16> -> vector<2x40x256xbf16>
    %cst_24 = arith.constant 0.000000e+00 : bf16
    %84 = vector.broadcast %cst_24 : bf16 to vector<2x40x1xbf16>
    %85 = vector.extract_strided_slice %71 {offsets = [0, 0, 1], sizes = [2, 40, 255], strides = [1, 1, 1]} : vector<2x40x256xbf16> to vector<2x40x255xbf16>
    %86 = tpu.concatenate %85, %84 in 2 : vector<2x40x255xbf16>, vector<2x40x1xbf16> -> vector<2x40x256xbf16>
    %cst_25 = arith.constant 0.000000e+00 : bf16
    %87 = vector.broadcast %cst_25 : bf16 to vector<2x40x15xbf16>
    %88 = vector.extract_strided_slice %64 {offsets = [0, 0, 15], sizes = [2, 40, 241], strides = [1, 1, 1]} : vector<2x40x256xbf16> to vector<2x40x241xbf16>
    %89 = tpu.concatenate %88, %87 in 2 : vector<2x40x241xbf16>, vector<2x40x15xbf16> -> vector<2x40x256xbf16>
    %cst_26 = arith.constant 0.000000e+00 : bf16
    %90 = vector.broadcast %cst_26 : bf16 to vector<2x40x16xbf16>
    %91 = vector.extract_strided_slice %57 {offsets = [0, 0, 16], sizes = [2, 40, 240], strides = [1, 1, 1]} : vector<2x40x256xbf16> to vector<2x40x240xbf16>
    %92 = tpu.concatenate %91, %90 in 2 : vector<2x40x240xbf16>, vector<2x40x16xbf16> -> vector<2x40x256xbf16>
    %cst_27 = arith.constant 0.000000e+00 : bf16
    %93 = vector.broadcast %cst_27 : bf16 to vector<2x40x17xbf16>
    %94 = vector.extract_strided_slice %71 {offsets = [0, 0, 17], sizes = [2, 40, 239], strides = [1, 1, 1]} : vector<2x40x256xbf16> to vector<2x40x239xbf16>
    %95 = tpu.concatenate %94, %93 in 2 : vector<2x40x239xbf16>, vector<2x40x17xbf16> -> vector<2x40x256xbf16>
    %96 = tpu.concatenate %74, %77, %80, %83, %57, %86, %89, %92, %95 in 1 : vector<2x40x256xbf16>, vector<2x40x256xbf16>, vector<2x40x256xbf16>, vector<2x40x256xbf16>, vector<2x40x256xbf16>, vector<2x40x256xbf16>, vector<2x40x256xbf16>, vector<2x40x256xbf16>, vector<2x40x256xbf16> -> vector<2x360x256xbf16>
    %c0_28 = arith.constant 0 : index
    %c0_29 = arith.constant 0 : index
    %97 = vector.load %arg2[%c0_28, %c0_29] : memref<40x360xbf16, #tpu.memory_space<vmem>>, vector<40x360xbf16>
    %98 = vector.extract_strided_slice %96 {offsets = [0, 0, 0], sizes = [1, 360, 256], strides = [1, 1, 1]} : vector<2x360x256xbf16> to vector<1x360x256xbf16>
    %99 = vector.shape_cast %98 : vector<1x360x256xbf16> to vector<360x256xbf16>
    %cst_30 = arith.constant dense<0.000000e+00> : vector<40x256xf32>
    %100 = tpu.matmul %97, %99, %cst_30 {dimension_numbers = #tpu.dot_dimension_numbers<[1], [0], [0], [1], [0, 0, 1, 1], [], []>} : vector<40x360xbf16>, vector<360x256xbf16>, vector<40x256xf32> -> vector<40x256xf32>
    %101 = vector.extract_strided_slice %96 {offsets = [1, 0, 0], sizes = [1, 360, 256], strides = [1, 1, 1]} : vector<2x360x256xbf16> to vector<1x360x256xbf16>
    %102 = vector.shape_cast %101 : vector<1x360x256xbf16> to vector<360x256xbf16>
    %cst_31 = arith.constant dense<0.000000e+00> : vector<40x256xf32>
    %103 = tpu.matmul %97, %102, %cst_31 {dimension_numbers = #tpu.dot_dimension_numbers<[1], [0], [0], [1], [0, 0, 1, 1], [], []>} : vector<40x360xbf16>, vector<360x256xbf16>, vector<40x256xf32> -> vector<40x256xf32>
    %104 = vector.shape_cast %100 : vector<40x256xf32> to vector<1x40x256xf32>
    %105 = vector.shape_cast %103 : vector<40x256xf32> to vector<1x40x256xf32>
    %106 = tpu.concatenate %104, %105 in 0 : vector<1x40x256xf32>, vector<1x40x256xf32> -> vector<2x40x256xf32>
    %cst_32 = arith.constant dense<0.000000e+00> : vector<2x40xf32>
    %107 = vector.multi_reduction <add>, %106, %cst_32 [2] : vector<2x40x256xf32> to vector<2x40xf32>
    %108 = vector.shape_cast %107 : vector<2x40xf32> to vector<2x40x1xf32>
    %cst_33 = arith.constant dense<0.000000e+00> : vector<40x1xf32>
    %109 = vector.multi_reduction <add>, %108, %cst_33 [0] : vector<2x40x1xf32> to vector<40x1xf32>
    %110 = vector.shape_cast %109 : vector<40x1xf32> to vector<1x40x1xf32>
    %111 = arith.mulf %106, %106 : vector<2x40x256xf32>
    %cst_34 = arith.constant dense<0.000000e+00> : vector<2x40xf32>
    %112 = vector.multi_reduction <add>, %111, %cst_34 [2] : vector<2x40x256xf32> to vector<2x40xf32>
    %113 = vector.shape_cast %112 : vector<2x40xf32> to vector<2x40x1xf32>
    %cst_35 = arith.constant dense<0.000000e+00> : vector<40x1xf32>
    %114 = vector.multi_reduction <add>, %113, %cst_35 [0] : vector<2x40x1xf32> to vector<40x1xf32>
    %115 = vector.shape_cast %114 : vector<40x1xf32> to vector<1x40x1xf32>
    %cst_36 = arith.constant 0.001953125 : f32
    %116 = vector.broadcast %cst_36 : f32 to vector<1x40x1xf32>
    %117 = arith.mulf %110, %116 : vector<1x40x1xf32>
    %cst_37 = arith.constant 0.001953125 : f32
    %118 = vector.broadcast %cst_37 : f32 to vector<1x40x1xf32>
    %119 = arith.mulf %115, %118 : vector<1x40x1xf32>
    %120 = arith.mulf %117, %117 : vector<1x40x1xf32>
    %121 = arith.subf %119, %120 : vector<1x40x1xf32>
    %cst_38 = arith.constant 0.000000e+00 : f32
    %122 = vector.broadcast %cst_38 : f32 to vector<1x40x1xf32>
    %123 = arith.maximumf %121, %122 : vector<1x40x1xf32>
    %cst_39 = arith.constant 9.99999974E-6 : f32
    %124 = vector.broadcast %cst_39 : f32 to vector<1x40x1xf32>
    %125 = arith.addf %123, %124 : vector<1x40x1xf32>
    %126 = math.rsqrt %125 : vector<1x40x1xf32>
    %127 = vector.broadcast %117 : vector<1x40x1xf32> to vector<2x40x256xf32>
    %128 = arith.subf %106, %127 : vector<2x40x256xf32>
    %129 = vector.broadcast %126 : vector<1x40x1xf32> to vector<2x40x256xf32>
    %130 = arith.mulf %128, %129 : vector<2x40x256xf32>
    %cst_40 = arith.constant 0.000000e+00 : f32
    %131 = vector.broadcast %cst_40 : f32 to vector<2x40x256xf32>
    %132 = arith.maximumf %130, %131 : vector<2x40x256xf32>
    %133 = arith.truncf %132 : vector<2x40x256xf32> to vector<2x40x256xbf16>
    %c0_41 = arith.constant 0 : index
    %c0_42 = arith.constant 0 : index
    %134 = vector.load %arg3[%c0_41, %c0_42] : memref<96x40xbf16, #tpu.memory_space<vmem>>, vector<96x40xbf16>
    %135 = vector.extract_strided_slice %133 {offsets = [0, 0, 0], sizes = [1, 40, 256], strides = [1, 1, 1]} : vector<2x40x256xbf16> to vector<1x40x256xbf16>
    %136 = vector.shape_cast %135 : vector<1x40x256xbf16> to vector<40x256xbf16>
    %cst_43 = arith.constant dense<0.000000e+00> : vector<96x256xf32>
    %137 = tpu.matmul %134, %136, %cst_43 {dimension_numbers = #tpu.dot_dimension_numbers<[1], [0], [0], [1], [0, 0, 1, 1], [], []>} : vector<96x40xbf16>, vector<40x256xbf16>, vector<96x256xf32> -> vector<96x256xf32>
    %138 = vector.extract_strided_slice %133 {offsets = [1, 0, 0], sizes = [1, 40, 256], strides = [1, 1, 1]} : vector<2x40x256xbf16> to vector<1x40x256xbf16>
    %139 = vector.shape_cast %138 : vector<1x40x256xbf16> to vector<40x256xbf16>
    %cst_44 = arith.constant dense<0.000000e+00> : vector<96x256xf32>
    %140 = tpu.matmul %134, %139, %cst_44 {dimension_numbers = #tpu.dot_dimension_numbers<[1], [0], [0], [1], [0, 0, 1, 1], [], []>} : vector<96x40xbf16>, vector<40x256xbf16>, vector<96x256xf32> -> vector<96x256xf32>
    %141 = vector.shape_cast %137 : vector<96x256xf32> to vector<1x96x256xf32>
    %142 = vector.shape_cast %140 : vector<96x256xf32> to vector<1x96x256xf32>
    %143 = tpu.concatenate %141, %142 in 0 : vector<1x96x256xf32>, vector<1x96x256xf32> -> vector<2x96x256xf32>
    %c0_45 = arith.constant 0 : index
    %c0_46 = arith.constant 0 : index
    %144 = vector.load %arg4[%c0_45, %c0_46] : memref<96x1xf32, #tpu.memory_space<vmem>>, vector<96x1xf32>
    %145 = vector.shape_cast %144 : vector<96x1xf32> to vector<1x96x1xf32>
    %146 = vector.broadcast %145 : vector<1x96x1xf32> to vector<2x96x256xf32>
    %147 = arith.addf %143, %146 : vector<2x96x256xf32>
    %148 = vector.extract_strided_slice %147 {offsets = [0, 0, 0], sizes = [2, 32, 256], strides = [1, 1, 1]} : vector<2x96x256xf32> to vector<2x32x256xf32>
    %149 = arith.negf %148 : vector<2x32x256xf32>
    %150 = math.exp %149 : vector<2x32x256xf32>
    %cst_47 = arith.constant 1.000000e+00 : f32
    %151 = vector.broadcast %cst_47 : f32 to vector<2x32x256xf32>
    %152 = arith.addf %151, %150 : vector<2x32x256xf32>
    %153 = arith.divf %151, %152 : vector<2x32x256xf32>
    %154 = vector.extract_strided_slice %147 {offsets = [0, 32, 0], sizes = [2, 32, 256], strides = [1, 1, 1]} : vector<2x96x256xf32> to vector<2x32x256xf32>
    %155 = arith.negf %154 : vector<2x32x256xf32>
    %156 = math.exp %155 : vector<2x32x256xf32>
    %cst_48 = arith.constant 1.000000e+00 : f32
    %157 = vector.broadcast %cst_48 : f32 to vector<2x32x256xf32>
    %158 = arith.addf %157, %156 : vector<2x32x256xf32>
    %159 = arith.divf %157, %158 : vector<2x32x256xf32>
    %160 = vector.extract_strided_slice %147 {offsets = [0, 64, 0], sizes = [2, 32, 256], strides = [1, 1, 1]} : vector<2x96x256xf32> to vector<2x32x256xf32>
    %161 = arith.mulf %159, %19 : vector<2x32x256xf32>
    %162 = arith.truncf %161 : vector<2x32x256xf32> to vector<2x32x256xbf16>
    %c0_49 = arith.constant 0 : index
    %c0_50 = arith.constant 0 : index
    %163 = vector.load %arg5[%c0_49, %c0_50] : memref<8x32xbf16, #tpu.memory_space<vmem>>, vector<8x32xbf16>
    %164 = vector.extract_strided_slice %162 {offsets = [0, 0, 0], sizes = [1, 32, 256], strides = [1, 1, 1]} : vector<2x32x256xbf16> to vector<1x32x256xbf16>
    %165 = vector.shape_cast %164 : vector<1x32x256xbf16> to vector<32x256xbf16>
    %cst_51 = arith.constant dense<0.000000e+00> : vector<8x256xf32>
    %166 = tpu.matmul %163, %165, %cst_51 {dimension_numbers = #tpu.dot_dimension_numbers<[1], [0], [0], [1], [0, 0, 1, 1], [], []>} : vector<8x32xbf16>, vector<32x256xbf16>, vector<8x256xf32> -> vector<8x256xf32>
    %167 = vector.extract_strided_slice %162 {offsets = [1, 0, 0], sizes = [1, 32, 256], strides = [1, 1, 1]} : vector<2x32x256xbf16> to vector<1x32x256xbf16>
    %168 = vector.shape_cast %167 : vector<1x32x256xbf16> to vector<32x256xbf16>
    %cst_52 = arith.constant dense<0.000000e+00> : vector<8x256xf32>
    %169 = tpu.matmul %163, %168, %cst_52 {dimension_numbers = #tpu.dot_dimension_numbers<[1], [0], [0], [1], [0, 0, 1, 1], [], []>} : vector<8x32xbf16>, vector<32x256xbf16>, vector<8x256xf32> -> vector<8x256xf32>
    %170 = vector.shape_cast %166 : vector<8x256xf32> to vector<1x8x256xf32>
    %171 = vector.shape_cast %169 : vector<8x256xf32> to vector<1x8x256xf32>
    %172 = tpu.concatenate %170, %171 in 0 : vector<1x8x256xf32>, vector<1x8x256xf32> -> vector<2x8x256xf32>
    %cst_53 = arith.constant dense<0.000000e+00> : vector<2x8xf32>
    %173 = vector.multi_reduction <add>, %172, %cst_53 [2] : vector<2x8x256xf32> to vector<2x8xf32>
    %174 = vector.shape_cast %173 : vector<2x8xf32> to vector<2x8x1xf32>
    %cst_54 = arith.constant dense<0.000000e+00> : vector<8x1xf32>
    %175 = vector.multi_reduction <add>, %174, %cst_54 [0] : vector<2x8x1xf32> to vector<8x1xf32>
    %176 = vector.shape_cast %175 : vector<8x1xf32> to vector<1x8x1xf32>
    %177 = arith.mulf %172, %172 : vector<2x8x256xf32>
    %cst_55 = arith.constant dense<0.000000e+00> : vector<2x8xf32>
    %178 = vector.multi_reduction <add>, %177, %cst_55 [2] : vector<2x8x256xf32> to vector<2x8xf32>
    %179 = vector.shape_cast %178 : vector<2x8xf32> to vector<2x8x1xf32>
    %cst_56 = arith.constant dense<0.000000e+00> : vector<8x1xf32>
    %180 = vector.multi_reduction <add>, %179, %cst_56 [0] : vector<2x8x1xf32> to vector<8x1xf32>
    %181 = vector.shape_cast %180 : vector<8x1xf32> to vector<1x8x1xf32>
    %cst_57 = arith.constant 0.001953125 : f32
    %182 = vector.broadcast %cst_57 : f32 to vector<1x8x1xf32>
    %183 = arith.mulf %176, %182 : vector<1x8x1xf32>
    %cst_58 = arith.constant 0.001953125 : f32
    %184 = vector.broadcast %cst_58 : f32 to vector<1x8x1xf32>
    %185 = arith.mulf %181, %184 : vector<1x8x1xf32>
    %186 = arith.mulf %183, %183 : vector<1x8x1xf32>
    %187 = arith.subf %185, %186 : vector<1x8x1xf32>
    %cst_59 = arith.constant 0.000000e+00 : f32
    %188 = vector.broadcast %cst_59 : f32 to vector<1x8x1xf32>
    %189 = arith.maximumf %187, %188 : vector<1x8x1xf32>
    %cst_60 = arith.constant 9.99999974E-6 : f32
    %190 = vector.broadcast %cst_60 : f32 to vector<1x8x1xf32>
    %191 = arith.addf %189, %190 : vector<1x8x1xf32>
    %192 = math.rsqrt %191 : vector<1x8x1xf32>
    %193 = vector.broadcast %183 : vector<1x8x1xf32> to vector<2x8x256xf32>
    %194 = arith.subf %172, %193 : vector<2x8x256xf32>
    %195 = vector.broadcast %192 : vector<1x8x1xf32> to vector<2x8x256xf32>
    %196 = arith.mulf %194, %195 : vector<2x8x256xf32>
    %cst_61 = arith.constant 0.000000e+00 : f32
    %197 = vector.broadcast %cst_61 : f32 to vector<2x8x256xf32>
    %198 = arith.maximumf %196, %197 : vector<2x8x256xf32>
    %199 = arith.truncf %198 : vector<2x8x256xf32> to vector<2x8x256xbf16>
    %c15_i32_62 = arith.constant 15 : i32
    %200 = vector.broadcast %c15_i32_62 : i32 to vector<1x1x256xi32>
    %201 = arith.cmpi ne, %16, %200 : vector<1x1x256xi32>
    %c0_i32_63 = arith.constant 0 : i32
    %202 = arith.sitofp %c0_i32_63 : i32 to bf16
    %203 = vector.shape_cast %201 : vector<1x1x256xi1> to vector<1x1x256xi1>
    %204 = vector.broadcast %203 : vector<1x1x256xi1> to vector<2x8x256xi1>
    %205 = vector.broadcast %202 : bf16 to vector<2x8x256xbf16>
    %206 = arith.select %204, %199, %205 : vector<2x8x256xi1>, vector<2x8x256xbf16>
    %c0_i32_64 = arith.constant 0 : i32
    %207 = vector.broadcast %c0_i32_64 : i32 to vector<1x1x256xi32>
    %208 = arith.cmpi ne, %16, %207 : vector<1x1x256xi32>
    %c0_i32_65 = arith.constant 0 : i32
    %209 = arith.sitofp %c0_i32_65 : i32 to bf16
    %210 = vector.shape_cast %208 : vector<1x1x256xi1> to vector<1x1x256xi1>
    %211 = vector.broadcast %210 : vector<1x1x256xi1> to vector<2x8x256xi1>
    %212 = vector.broadcast %209 : bf16 to vector<2x8x256xbf16>
    %213 = arith.select %211, %199, %212 : vector<2x8x256xi1>, vector<2x8x256xbf16>
    %cst_66 = arith.constant 0.000000e+00 : bf16
    %214 = vector.broadcast %cst_66 : bf16 to vector<2x8x17xbf16>
    %215 = vector.extract_strided_slice %206 {offsets = [0, 0, 0], sizes = [2, 8, 239], strides = [1, 1, 1]} : vector<2x8x256xbf16> to vector<2x8x239xbf16>
    %216 = tpu.concatenate %214, %215 in 2 : vector<2x8x17xbf16>, vector<2x8x239xbf16> -> vector<2x8x256xbf16>
    %cst_67 = arith.constant 0.000000e+00 : bf16
    %217 = vector.broadcast %cst_67 : bf16 to vector<2x8x16xbf16>
    %218 = vector.extract_strided_slice %199 {offsets = [0, 0, 0], sizes = [2, 8, 240], strides = [1, 1, 1]} : vector<2x8x256xbf16> to vector<2x8x240xbf16>
    %219 = tpu.concatenate %217, %218 in 2 : vector<2x8x16xbf16>, vector<2x8x240xbf16> -> vector<2x8x256xbf16>
    %cst_68 = arith.constant 0.000000e+00 : bf16
    %220 = vector.broadcast %cst_68 : bf16 to vector<2x8x15xbf16>
    %221 = vector.extract_strided_slice %213 {offsets = [0, 0, 0], sizes = [2, 8, 241], strides = [1, 1, 1]} : vector<2x8x256xbf16> to vector<2x8x241xbf16>
    %222 = tpu.concatenate %220, %221 in 2 : vector<2x8x15xbf16>, vector<2x8x241xbf16> -> vector<2x8x256xbf16>
    %cst_69 = arith.constant 0.000000e+00 : bf16
    %223 = vector.broadcast %cst_69 : bf16 to vector<2x8x1xbf16>
    %224 = vector.extract_strided_slice %206 {offsets = [0, 0, 0], sizes = [2, 8, 255], strides = [1, 1, 1]} : vector<2x8x256xbf16> to vector<2x8x255xbf16>
    %225 = tpu.concatenate %223, %224 in 2 : vector<2x8x1xbf16>, vector<2x8x255xbf16> -> vector<2x8x256xbf16>
    %cst_70 = arith.constant 0.000000e+00 : bf16
    %226 = vector.broadcast %cst_70 : bf16 to vector<2x8x1xbf16>
    %227 = vector.extract_strided_slice %213 {offsets = [0, 0, 1], sizes = [2, 8, 255], strides = [1, 1, 1]} : vector<2x8x256xbf16> to vector<2x8x255xbf16>
    %228 = tpu.concatenate %227, %226 in 2 : vector<2x8x255xbf16>, vector<2x8x1xbf16> -> vector<2x8x256xbf16>
    %cst_71 = arith.constant 0.000000e+00 : bf16
    %229 = vector.broadcast %cst_71 : bf16 to vector<2x8x15xbf16>
    %230 = vector.extract_strided_slice %206 {offsets = [0, 0, 15], sizes = [2, 8, 241], strides = [1, 1, 1]} : vector<2x8x256xbf16> to vector<2x8x241xbf16>
    %231 = tpu.concatenate %230, %229 in 2 : vector<2x8x241xbf16>, vector<2x8x15xbf16> -> vector<2x8x256xbf16>
    %cst_72 = arith.constant 0.000000e+00 : bf16
    %232 = vector.broadcast %cst_72 : bf16 to vector<2x8x16xbf16>
    %233 = vector.extract_strided_slice %199 {offsets = [0, 0, 16], sizes = [2, 8, 240], strides = [1, 1, 1]} : vector<2x8x256xbf16> to vector<2x8x240xbf16>
    %234 = tpu.concatenate %233, %232 in 2 : vector<2x8x240xbf16>, vector<2x8x16xbf16> -> vector<2x8x256xbf16>
    %cst_73 = arith.constant 0.000000e+00 : bf16
    %235 = vector.broadcast %cst_73 : bf16 to vector<2x8x17xbf16>
    %236 = vector.extract_strided_slice %213 {offsets = [0, 0, 17], sizes = [2, 8, 239], strides = [1, 1, 1]} : vector<2x8x256xbf16> to vector<2x8x239xbf16>
    %237 = tpu.concatenate %236, %235 in 2 : vector<2x8x239xbf16>, vector<2x8x17xbf16> -> vector<2x8x256xbf16>
    %238 = tpu.concatenate %216, %219, %222, %225, %199, %228, %231, %234, %237 in 1 : vector<2x8x256xbf16>, vector<2x8x256xbf16>, vector<2x8x256xbf16>, vector<2x8x256xbf16>, vector<2x8x256xbf16>, vector<2x8x256xbf16>, vector<2x8x256xbf16>, vector<2x8x256xbf16>, vector<2x8x256xbf16> -> vector<2x72x256xbf16>
    %c0_74 = arith.constant 0 : index
    %c0_75 = arith.constant 0 : index
    %239 = vector.load %arg6[%c0_74, %c0_75] : memref<8x72xbf16, #tpu.memory_space<vmem>>, vector<8x72xbf16>
    %240 = vector.extract_strided_slice %238 {offsets = [0, 0, 0], sizes = [1, 72, 256], strides = [1, 1, 1]} : vector<2x72x256xbf16> to vector<1x72x256xbf16>
    %241 = vector.shape_cast %240 : vector<1x72x256xbf16> to vector<72x256xbf16>
    %cst_76 = arith.constant dense<0.000000e+00> : vector<8x256xf32>
    %242 = tpu.matmul %239, %241, %cst_76 {dimension_numbers = #tpu.dot_dimension_numbers<[1], [0], [0], [1], [0, 0, 1, 1], [], []>} : vector<8x72xbf16>, vector<72x256xbf16>, vector<8x256xf32> -> vector<8x256xf32>
    %243 = vector.extract_strided_slice %238 {offsets = [1, 0, 0], sizes = [1, 72, 256], strides = [1, 1, 1]} : vector<2x72x256xbf16> to vector<1x72x256xbf16>
    %244 = vector.shape_cast %243 : vector<1x72x256xbf16> to vector<72x256xbf16>
    %cst_77 = arith.constant dense<0.000000e+00> : vector<8x256xf32>
    %245 = tpu.matmul %239, %244, %cst_77 {dimension_numbers = #tpu.dot_dimension_numbers<[1], [0], [0], [1], [0, 0, 1, 1], [], []>} : vector<8x72xbf16>, vector<72x256xbf16>, vector<8x256xf32> -> vector<8x256xf32>
    %246 = vector.shape_cast %242 : vector<8x256xf32> to vector<1x8x256xf32>
    %247 = vector.shape_cast %245 : vector<8x256xf32> to vector<1x8x256xf32>
    %248 = tpu.concatenate %246, %247 in 0 : vector<1x8x256xf32>, vector<1x8x256xf32> -> vector<2x8x256xf32>
    %cst_78 = arith.constant dense<0.000000e+00> : vector<2x8xf32>
    %249 = vector.multi_reduction <add>, %248, %cst_78 [2] : vector<2x8x256xf32> to vector<2x8xf32>
    %250 = vector.shape_cast %249 : vector<2x8xf32> to vector<2x8x1xf32>
    %cst_79 = arith.constant dense<0.000000e+00> : vector<8x1xf32>
    %251 = vector.multi_reduction <add>, %250, %cst_79 [0] : vector<2x8x1xf32> to vector<8x1xf32>
    %252 = vector.shape_cast %251 : vector<8x1xf32> to vector<1x8x1xf32>
    %253 = arith.mulf %248, %248 : vector<2x8x256xf32>
    %cst_80 = arith.constant dense<0.000000e+00> : vector<2x8xf32>
    %254 = vector.multi_reduction <add>, %253, %cst_80 [2] : vector<2x8x256xf32> to vector<2x8xf32>
    %255 = vector.shape_cast %254 : vector<2x8xf32> to vector<2x8x1xf32>
    %cst_81 = arith.constant dense<0.000000e+00> : vector<8x1xf32>
    %256 = vector.multi_reduction <add>, %255, %cst_81 [0] : vector<2x8x1xf32> to vector<8x1xf32>
    %257 = vector.shape_cast %256 : vector<8x1xf32> to vector<1x8x1xf32>
    %cst_82 = arith.constant 0.001953125 : f32
    %258 = vector.broadcast %cst_82 : f32 to vector<1x8x1xf32>
    %259 = arith.mulf %252, %258 : vector<1x8x1xf32>
    %cst_83 = arith.constant 0.001953125 : f32
    %260 = vector.broadcast %cst_83 : f32 to vector<1x8x1xf32>
    %261 = arith.mulf %257, %260 : vector<1x8x1xf32>
    %262 = arith.mulf %259, %259 : vector<1x8x1xf32>
    %263 = arith.subf %261, %262 : vector<1x8x1xf32>
    %cst_84 = arith.constant 0.000000e+00 : f32
    %264 = vector.broadcast %cst_84 : f32 to vector<1x8x1xf32>
    %265 = arith.maximumf %263, %264 : vector<1x8x1xf32>
    %cst_85 = arith.constant 9.99999974E-6 : f32
    %266 = vector.broadcast %cst_85 : f32 to vector<1x8x1xf32>
    %267 = arith.addf %265, %266 : vector<1x8x1xf32>
    %268 = math.rsqrt %267 : vector<1x8x1xf32>
    %269 = vector.broadcast %259 : vector<1x8x1xf32> to vector<2x8x256xf32>
    %270 = arith.subf %248, %269 : vector<2x8x256xf32>
    %271 = vector.broadcast %268 : vector<1x8x1xf32> to vector<2x8x256xf32>
    %272 = arith.mulf %270, %271 : vector<2x8x256xf32>
    %cst_86 = arith.constant 0.000000e+00 : f32
    %273 = vector.broadcast %cst_86 : f32 to vector<2x8x256xf32>
    %274 = arith.maximumf %272, %273 : vector<2x8x256xf32>
    %275 = arith.truncf %274 : vector<2x8x256xf32> to vector<2x8x256xbf16>
    %c0_87 = arith.constant 0 : index
    %c0_88 = arith.constant 0 : index
    %276 = vector.load %arg7[%c0_87, %c0_88] : memref<32x8xbf16, #tpu.memory_space<vmem>>, vector<32x8xbf16>
    %277 = vector.extract_strided_slice %275 {offsets = [0, 0, 0], sizes = [1, 8, 256], strides = [1, 1, 1]} : vector<2x8x256xbf16> to vector<1x8x256xbf16>
    %278 = vector.shape_cast %277 : vector<1x8x256xbf16> to vector<8x256xbf16>
    %cst_89 = arith.constant dense<0.000000e+00> : vector<32x256xf32>
    %279 = tpu.matmul %276, %278, %cst_89 {dimension_numbers = #tpu.dot_dimension_numbers<[1], [0], [0], [1], [0, 0, 1, 1], [], []>} : vector<32x8xbf16>, vector<8x256xbf16>, vector<32x256xf32> -> vector<32x256xf32>
    %280 = vector.extract_strided_slice %275 {offsets = [1, 0, 0], sizes = [1, 8, 256], strides = [1, 1, 1]} : vector<2x8x256xbf16> to vector<1x8x256xbf16>
    %281 = vector.shape_cast %280 : vector<1x8x256xbf16> to vector<8x256xbf16>
    %cst_90 = arith.constant dense<0.000000e+00> : vector<32x256xf32>
    %282 = tpu.matmul %276, %281, %cst_90 {dimension_numbers = #tpu.dot_dimension_numbers<[1], [0], [0], [1], [0, 0, 1, 1], [], []>} : vector<32x8xbf16>, vector<8x256xbf16>, vector<32x256xf32> -> vector<32x256xf32>
    %283 = vector.shape_cast %279 : vector<32x256xf32> to vector<1x32x256xf32>
    %284 = vector.shape_cast %282 : vector<32x256xf32> to vector<1x32x256xf32>
    %285 = tpu.concatenate %283, %284 in 0 : vector<1x32x256xf32>, vector<1x32x256xf32> -> vector<2x32x256xf32>
    %c0_91 = arith.constant 0 : index
    %c0_92 = arith.constant 0 : index
    %286 = vector.load %arg8[%c0_91, %c0_92] : memref<32x1xf32, #tpu.memory_space<vmem>>, vector<32x1xf32>
    %287 = vector.shape_cast %286 : vector<32x1xf32> to vector<1x32x1xf32>
    %288 = vector.broadcast %287 : vector<1x32x1xf32> to vector<2x32x256xf32>
    %289 = arith.addf %285, %288 : vector<2x32x256xf32>
    %290 = arith.addf %160, %289 : vector<2x32x256xf32>
    %291 = math.tanh %290 : vector<2x32x256xf32>
    %cst_93 = arith.constant 1.000000e+00 : f32
    %292 = vector.broadcast %cst_93 : f32 to vector<2x32x256xf32>
    %293 = arith.subf %292, %153 : vector<2x32x256xf32>
    %294 = arith.mulf %293, %19 : vector<2x32x256xf32>
    %295 = arith.mulf %153, %291 : vector<2x32x256xf32>
    %296 = arith.addf %294, %295 : vector<2x32x256xf32>
    %297 = arith.addf %18, %296 : vector<2x32x256xf32>
    %c0_94 = arith.constant 0 : index
    %c0_95 = arith.constant 0 : index
    %c0_96 = arith.constant 0 : index
    %298 = vector.load %arg9[%c0_94, %c0_95, %c0_96] : memref<2x32x256xf32, #tpu.memory_space<vmem>>, vector<2x32x256xf32>
    tpu.vector_store %arg9[%c0_94, %c0_95, %c0_96], %297 {strides = array<i32>} : memref<2x32x256xf32, #tpu.memory_space<vmem>>, vector<2x32x256xf32>,
    %c0_97 = arith.constant 0 : index
    %c0_98 = arith.constant 0 : index
    %c0_99 = arith.constant 0 : index
    %299 = vector.load %arg10[%c0_97, %c0_98, %c0_99] : memref<2x32x256xf32, #tpu.memory_space<vmem>>, vector<2x32x256xf32>
    tpu.vector_store %arg10[%c0_97, %c0_98, %c0_99], %296 {strides = array<i32>} : memref<2x32x256xf32, #tpu.memory_space<vmem>>, vector<2x32x256xf32>,
    return
  }
}

</mosaic_0001>

<bundles_post_ra>
// kernel: tpu_custom_call.1
= control target key start
LH: loop header
LB: loop body
LE: loop exit
PB: predicated region body
PF: predicated region fallthrough
CT: control target
= control target key end

     0   :  { %16 = vsyncpa [#allocation3], 0  ;;  %s5206_s0 = inlined_call_operand.hbm [shape: f32[2,64,256], index: 0, kind: input, shape index: {}]   ;;  %s5207_s1 = inlined_call_operand.vmem [shape: bf16[40,64], index: 1, kind: input, shape index: {}]   ;;  %s5208_s2 = inlined_call_operand.vmem [shape: bf16[40,360], index: 2, kind: input, shape index: {}]   ;;  %s5209_s3 = inlined_call_operand.vmem [shape: bf16[96,40], index: 3, kind: input, shape index: {}]   ;;  %s5210_s4 = inlined_call_operand.vmem [shape: f32[96,1], index: 4, kind: input, shape index: {}]   ;;  %s5211_s5 = inlined_call_operand.vmem [shape: bf16[8,32], index: 5, kind: input, shape index: {}]   ;;  %s5212_s6 = inlined_call_operand.vmem [shape: bf16[8,72], index: 6, kind: input, shape index: {}]   ;;  %s5213_s7 = inlined_call_operand.vmem [shape: bf16[32,8], index: 7, kind: input, shape index: {}]   ;;  %s5214_s8 = inlined_call_operand.vmem [shape: f32[32,1], index: 8, kind: input, shape index: {}]   ;;  %s5215_s9 = inlined_call_operand.hbm [shape: f32[2,32,256], index: 9, kind: output, shape index: {0}]   ;;  %s5216_s10 = inlined_call_operand.hbm [shape: f32[2,32,256], index: 10, kind: output, shape index: {1}]  }
   0x1   :  { %17 = vsyncpa [#allocation4], 0 }
   0x2   :  { %18 = vsyncpa [#allocation7], 0  ;;  %s3619_s13 = smov [#allocation2]   ;;  %s3547_s17 = scalar_lea.hbm %s5206_s0, 4096 }
   0x3   :  { %s24_s14 = sshll.u32 %s3619_s13, 4  ;;  %p3548_p0 = scmp.ne.s32.totalorder %s5206_s0, %s3547_s17  ;;  %s25_s14 = int_to_ptr.vmem [resolvable:$true] %s24_s14 }
   0x4   :  { %p3551_p1 = scmp.lt.u32.totalorder %s3547_s17, %s5206_s0 }
   0x6   :  { %p3553_p2 = pnand %p3551_p1, %p3548_p0 }
   0x8   :  { %3556 = shalt.err (!%p3553_p2)
}
   0x9   :  { %s3557_s22 = scalar_lea.vmem %s25_s14, 4096  ;;  %p3562_p4 = scmp.lt.s32.totalorder %s25_s14, %s25_s14 }
   0xa   :  { %p3558_p3 = scmp.ne.s32.totalorder %s25_s14, %s3557_s22  ;;  %p3563_p5 = scmp.lt.s32.totalorder %s3557_s22, %s3557_s22 }
   0xc   :  { %p3564_p6 = por %p3563_p5, %p3562_p4 }
   0xe   :  { %p3565_p7 = pnand %p3564_p6, %p3558_p3 }
  0x10   :  { %3568 = shalt.err (!%p3565_p7)
}
  0x11   :  { %s3620_s23 = smov 256   ;;  %s3621_s24 = smov 16  }
  0x12   :  { %30 = dma.hbm_to_vmem [thread:$0]  %s5206_s0, 4096, %s25_s14, [#allocation3], %s3620_s23, %s3620_s23, %s3621_s24  }
  0x13   :  { %3613 = dma.done.wait [#allocation3], 4096  }
  0x14   :  { %3614 = vsyncadd [#allocation3], 4294963200  ;;  %v5217_v0 = vmov 0   ;;  %v81_v1 = vld [vmem:[#allocation2 + $0x8] sm:$0xff]  ;;  %v83_v2 = vld [vmem:[#allocation2 + $0x18] sm:$0xff]  ;;  %vm146_vm0 = vcmask 523264  }
  0x15   :  { %188 = vmatprep.mubr.bf16.mxu0 %v5217_v0  ;;  %249 = vmatprep.mubr.bf16.mxu1 %v5217_v0  ;;  %v97_v3 = vld [vmem:[#allocation2 + $0x88] sm:$0xff]  ;;  %v113_v4 = vpack.c.bf16 %v83_v2, %v81_v1  ;;  %v99_v5 = vld [vmem:[#allocation2 + $0x98] sm:$0xff]  ;;  %v80_v6 = vld [vmem:[#allocation2] sm:$0xff]  ;;  %s3624_s12 = smov 15   ;;  %s3625_s13 = smov 1   ;;  %vm571_vm11 = vcmask 138240  }
  0x16   :  { %3296 = vset.pattern.permute.xlu1 %v5217_v0  ;;  %3295 = vset.pattern.permute.xlu0 %v5217_v0  ;;  %v82_v7 = vld [vmem:[#allocation2 + $0x10] sm:$0xff]  ;;  %v121_v8 = vpack.c.bf16 %v99_v5, %v97_v3  ;;  %v96_v10 = vld [vmem:[#allocation2 + $0x80] sm:$0xff]  ;;  %v85_v12 = vld [vmem:[#allocation2 + $0x28] sm:$0xff]  ;;  %s3626_s14 = smov 127   ;;  %s3627_s15 = smov 113   ;;  %vm636_vm13 = vcmask 130048  }
  0x17   :  { %v112_v9 = vpack.c.bf16 %v82_v7, %v80_v6  ;;  %v98_v11 = vld [vmem:[#allocation2 + $0x90] sm:$0xff]  ;;  %156 = vmatprep.subr.bf16.mxu0 %v113_v4  ;;  %v87_v14 = vld [vmem:[#allocation2 + $0x38] sm:$0xff]  ;;  %v101_v15 = vld [vmem:[#allocation2 + $0xa8] sm:$0xff]  ;;  %s3628_s16 = smov 112   ;;  %s3629_s19 = smov 111   ;;  %vm962_vm14 = vcmask 1043456  }
  0x18   :  { %v120_v13 = vpack.c.bf16 %v98_v11, %v96_v10  ;;  %v103_v16 = vld [vmem:[#allocation2 + $0xb8] sm:$0xff]  ;;  %217 = vmatprep.subr.bf16.mxu1 %v121_v8  ;;  %v115_v17 = vpack.c.bf16 %v87_v14, %v85_v12  ;;  %v84_v19 = vld [vmem:[#allocation2 + $0x20] sm:$0xff]  ;;  %v86_v20 = vld [vmem:[#allocation2 + $0x30] sm:$0xff]  ;;  %vm692_vm15 = vcmask 121856  }
  0x19   :  { %157 = vmatpush1.bf16.msra.mxu0 %v112_v9  ;;  %v123_v18 = vpack.c.bf16 %v103_v16, %v101_v15  ;;  %v100_v21 = vld [vmem:[#allocation2 + $0xa0] sm:$0xff]  ;;  %v114_v22 = vpack.c.bf16 %v86_v20, %v84_v19  ;;  %v102_v23 = vld [vmem:[#allocation2 + $0xb0] sm:$0xff]  ;;  %v89_v24 = vld [vmem:[#allocation2 + $0x48] sm:$0xff] }
  0x1a   :  { %218 = vmatpush1.bf16.msra.mxu1 %v120_v13  ;;  %v91_v25 = vld [vmem:[#allocation2 + $0x58] sm:$0xff]  ;;  %158 = vmatprep.subr.bf16.mxu0 %v115_v17  ;;  %v122_v26 = vpack.c.bf16 %v102_v23, %v100_v21  ;;  %v105_v28 = vld [vmem:[#allocation2 + $0xc8] sm:$0xff]  ;;  %v88_v30 = vld [vmem:[#allocation2 + $0x40] sm:$0xff] }
  0x1b   :  { %219 = vmatprep.subr.bf16.mxu1 %v123_v18  ;;  %v117_v27 = vpack.c.bf16 %v91_v25, %v89_v24  ;;  %v107_v29 = vld [vmem:[#allocation2 + $0xd8] sm:$0xff]  ;;  %v90_v32 = vld [vmem:[#allocation2 + $0x50] sm:$0xff]  ;;  %v104_v33 = vld [vmem:[#allocation2 + $0xc0] sm:$0xff] }
  0x1c   :  { %v125_v31 = vpack.c.bf16 %v107_v29, %v105_v28  ;;  %v106_v34 = vld [vmem:[#allocation2 + $0xd0] sm:$0xff]  ;;  %v116_v35 = vpack.c.bf16 %v90_v32, %v88_v30  ;;  %v93_v36 = vld [vmem:[#allocation2 + $0x68] sm:$0xff]  ;;  %v95_v37 = vld [vmem:[#allocation2 + $0x78] sm:$0xff] }
  0x1d   :  { %159 = vmatpush1.bf16.msra.mxu0 %v114_v22  ;;  %v109_v38 = vld [vmem:[#allocation2 + $0xe8] sm:$0xff]  ;;  %v124_v39 = vpack.c.bf16 %v106_v34, %v104_v33  ;;  %v119_v40 = vpack.c.bf16 %v95_v37, %v93_v36  ;;  %v111_v41 = vld [vmem:[#allocation2 + $0xf8] sm:$0xff]  ;;  %v92_v42 = vld [vmem:[#allocation2 + $0x60] sm:$0xff] }
  0x1e   :  { %220 = vmatpush1.bf16.msra.mxu1 %v122_v26  ;;  %160 = vmatprep.subr.bf16.mxu0 %v117_v27  ;;  %v94_v43 = vld [vmem:[#allocation2 + $0x70] sm:$0xff]  ;;  %v127_v44 = vpack.c.bf16 %v111_v41, %v109_v38  ;;  %v108_v45 = vld [vmem:[#allocation2 + $0xe0] sm:$0xff]  ;;  %v3298_v50 = vld [vmem:[%s5207_s1 + $0x8] sm:$0xff]  }
  0x1f   :  { %221 = vmatprep.subr.bf16.mxu1 %v125_v31  ;;  %v110_v46 = vld [vmem:[#allocation2 + $0xf0] sm:$0xff]  ;;  %v118_v47 = vpack.c.bf16 %v94_v43, %v92_v42  ;;  %v3297_v49 = vld [vmem:[%s5207_s1] sm:$0xff]   ;;  %vm4145_vm12 = vmneg %vm571_vm11 }
  0x20   :  { %v126_v48 = vpack.c.bf16 %v110_v46, %v108_v45  ;;  %v3299_v51 = vld [vmem:[%s5207_s1 + $0x10] ss:$0 sps:$4 sm:$0xff]   ;;  %s3623_s1 = smov 17  }
  0x21   :  { %161 = vmatpush1.bf16.msra.mxu0 %v116_v35 }
  0x22   :  { %222 = vmatpush1.bf16.msra.mxu1 %v124_v39  ;;  %162 = vmatprep.subr.bf16.mxu0 %v119_v40 }
  0x23   :  { %223 = vmatprep.subr.bf16.mxu1 %v127_v44 }
  0x25   :  { %163 = vmatpush1.bf16.msra.mxu0 %v118_v47 }
  0x26   :  { %224 = vmatpush1.bf16.msra.mxu1 %v126_v48 }
  0x28   :  { %3097 = vmatmul.mubr.msk.bf16.vlgmr.msra.gmra.mrb[0].mxu0 %vm146_vm0, %v3297_v49 }
  0x29   :  { %3100 = vmatmul.mubr.msk.bf16.vlgmr.msra.gmra.mrb[0].mxu1 %vm146_vm0, %v3297_v49  ;;  %198 = vmatprep.mubr.bf16.mxu0 %v5217_v0 }
  0x2a   :  { %259 = vmatprep.mubr.bf16.mxu1 %v5217_v0 }
  0x30   :  { %3098 = vmatmul.mubr.msk.bf16.gmra.mrb[4].mxu0 %vm146_vm0, %v3298_v50 }
  0x31   :  { %3101 = vmatmul.mubr.msk.bf16.gmra.mrb[4].mxu1 %vm146_vm0, %v3298_v50  ;;  %208 = vmatprep.mubr.bf16.mxu0 %v5217_v0 }
  0x32   :  { %269 = vmatprep.mubr.bf16.mxu1 %v5217_v0 }
  0x38   :  { %3099 = vmatmul.mubr.msk.bf16.gmra.mrb[8].mxu0 %vm146_vm0, %v3299_v51 }
  0x39   :  { %3102 = vmatmul.mubr.msk.bf16.gmra.mrb[8].mxu1 %vm146_vm0, %v3299_v51  ;;  %vm4348_vm0 = vmneg %vm692_vm15 }
  0xfb   :  { %v3719_v52 = vpop.f32.mrb[0].mxu0 }
  0xfc   :  { %v3721_v53 = vpop.f32.mrb[0].mxu1  ;;  %v3723_v54 = vpop.f32.mrb[1].mxu0  ;;  %v313_v55 = vmul.f32 %v3719_v52, %v3719_v52 }
  0xfd   :  { %v3727_v56 = vpop.f32.mrb[1].mxu1  ;;  %v3729_v57 = vpop.f32.mrb[2].mxu0  ;;  %v278_v58 = vadd.f32 %v3723_v54, %v3719_v52  ;;  %v314_v59 = vmul.f32 %v3723_v54, %v3723_v54  ;;  %v323_v60 = vmul.f32 %v3721_v53, %v3721_v53 }
  0xfe   :  { %v3737_v61 = vpop.f32.mrb[2].mxu1  ;;  %v3739_v62 = vpop.f32.mrb[3].mxu0  ;;  %v293_v63 = vadd.f32 %v3727_v56, %v3721_v53  ;;  %v315_v1 = vmul.f32 %v3729_v57, %v3729_v57  ;;  %v324_v2 = vmul.f32 %v3727_v56, %v3727_v56 }
  0xff   :  { %v3747_v3 = vpop.f32.mrb[3].mxu1  ;;  %279 = vadd.xlane.f32.xlu0 %v278_v58  ;;  %v281_v4 = vadd.f32 %v3739_v62, %v3729_v57  ;;  %v316_v5 = vmul.f32 %v3739_v62, %v3739_v62  ;;  %v333_v6 = vadd.f32 %v314_v59, %v313_v55  ;;  %v325_v7 = vmul.f32 %v3737_v61, %v3737_v61 }
 0x100   :  { %294 = vadd.xlane.f32.xlu1 %v293_v63  ;;  %v296_v8 = vadd.f32 %v3747_v3, %v3737_v61  ;;  %v326_v9 = vmul.f32 %v3747_v3, %v3747_v3  ;;  %v348_v10 = vadd.f32 %v324_v2, %v323_v60 }
 0x101   :  { %v336_v11 = vadd.f32 %v316_v5, %v315_v1 }
 0x102   :  { %v351_v12 = vadd.f32 %v326_v9, %v325_v7 }
 0x103   :  { %282 = vadd.xlane.f32.xlu0 %v281_v4  ;;  %v3759_v13 = vpop.f32.mrb[4].mxu0 }
 0x104   :  { %297 = vadd.xlane.f32.xlu1 %v296_v8  ;;  %v3761_v14 = vpop.f32.mrb[5].mxu0  ;;  %v3763_v15 = vpop.f32.mrb[4].mxu1  ;;  %v317_v16 = vmul.f32 %v3759_v13, %v3759_v13 }
 0x105   :  { %v3767_v17 = vpop.f32.mrb[6].mxu0  ;;  %v3769_v18 = vpop.f32.mrb[5].mxu1  ;;  %v284_v19 = vadd.f32 %v3761_v14, %v3759_v13  ;;  %v318_v20 = vmul.f32 %v3761_v14, %v3761_v14  ;;  %v327_v21 = vmul.f32 %v3763_v15, %v3763_v15 }
 0x106   :  { %v3777_v22 = vpop.f32.mrb[7].mxu0  ;;  %v3779_v23 = vpop.f32.mrb[6].mxu1  ;;  %v299_v24 = vadd.f32 %v3769_v18, %v3763_v15  ;;  %v319_v25 = vmul.f32 %v3767_v17, %v3767_v17  ;;  %v328_v26 = vmul.f32 %v3769_v18, %v3769_v18 }
 0x107   :  { %334 = vadd.xlane.f32.xlu0 %v333_v6  ;;  %v287_v27 = vadd.f32 %v3777_v22, %v3767_v17  ;;  %v3789_v28 = vpop.f32.mrb[7].mxu1  ;;  %v339_v29 = vadd.f32 %v318_v20, %v317_v16  ;;  %v320_v30 = vmul.f32 %v3777_v22, %v3777_v22  ;;  %v329_v31 = vmul.f32 %v3779_v23, %v3779_v23 }
 0x108   :  { %337 = vadd.xlane.f32.xlu1 %v336_v11  ;;  %v302_v32 = vadd.f32 %v3789_v28, %v3779_v23  ;;  %v354_v33 = vadd.f32 %v328_v26, %v327_v21  ;;  %v330_v34 = vmul.f32 %v3789_v28, %v3789_v28 }
 0x109   :  { %v342_v35 = vadd.f32 %v320_v30, %v319_v25 }
 0x10a   :  { %v357_v36 = vadd.f32 %v330_v34, %v329_v31 }
 0x10b   :  { %349 = vadd.xlane.f32.xlu0 %v348_v10  ;;  %v3799_v37 = vpop.f32.mrb[8].mxu0 }
 0x10c   :  { %352 = vadd.xlane.f32.xlu1 %v351_v12  ;;  %v3801_v38 = vpop.f32.mrb[8].mxu1  ;;  %v3803_v39 = vpop.f32.mrb[9].mxu0  ;;  %v321_v40 = vmul.f32 %v3799_v37, %v3799_v37 }
 0x10d   :  { %v3807_v41 = vpop.f32.mrb[9].mxu1  ;;  %v290_v42 = vadd.f32 %v3803_v39, %v3799_v37  ;;  %v331_v43 = vmul.f32 %v3801_v38, %v3801_v38  ;;  %v322_v44 = vmul.f32 %v3803_v39, %v3803_v39  ;;  %v214_v45 = vpop.f32.mrb[10].mxu0 }
 0x10e   :  { %v305_v46 = vadd.f32 %v3807_v41, %v3801_v38  ;;  %v332_v47 = vmul.f32 %v3807_v41, %v3807_v41  ;;  %v275_v48 = vpop.f32.mrb[10].mxu1  ;;  %v215_v49 = vpop.f32.mrb[11].mxu0 }
 0x10f   :  { %285 = vadd.xlane.f32.xlu0 %v284_v19  ;;  %v345_v50 = vadd.f32 %v322_v44, %v321_v40  ;;  %v276_v51 = vpop.f32.mrb[11].mxu1  ;;  %v53_v19 = vlaneseq }
 0x110   :  { %288 = vadd.xlane.f32.xlu1 %v287_v27  ;;  %v360_v55 = vadd.f32 %v332_v47, %v331_v43 }
 0x111   :  { %v54_v30 = vand.u32 127, %v53_v19 }
 0x113   :  { %300 = vadd.xlane.f32.xlu0 %v299_v24  ;;  %v55_v40 = vadd.s32 128, %v54_v30 }
 0x114   :  { %303 = vadd.xlane.f32.xlu1 %v302_v32 }
 0x115   :  { %v67_v47 = vand.u32 15, %v55_v40 }
 0x117   :  { %340 = vadd.xlane.f32.xlu0 %v339_v29  ;;  %vm3839_vm2 = vcmp.ne.s32.totalorder %v67_v47, 15  ;;  %vm3857_vm4 = vcmp.ne.s32.totalorder %v67_v47, 0 }
 0x118   :  { %343 = vadd.xlane.f32.xlu1 %v342_v35 }
 0x11b   :  { %355 = vadd.xlane.f32.xlu0 %v354_v33 }
 0x11c   :  { %358 = vadd.xlane.f32.xlu1 %v357_v36 }
 0x11f   :  { %291 = vadd.xlane.f32.xlu0 %v290_v42 }
 0x120   :  { %306 = vadd.xlane.f32.xlu1 %v305_v46  ;;  %v60_v46 = vand.u32 15, %v54_v30 }
 0x122   :  { %vm3835_vm1 = vcmp.ne.s32.totalorder %v60_v46, 15  ;;  %vm3849_vm3 = vcmp.ne.s32.totalorder %v60_v46, 0 }
 0x123   :  { %346 = vadd.xlane.f32.xlu0 %v345_v50  ;;  %vm481_vm5 = vmpackc.low %vm3839_vm2, %vm3835_vm1  ;;  %vm744_vm1 = vcmask 7168   ;;  %vm788_vm2 = vcmask 1039360  }
 0x124   :  { %361 = vadd.xlane.f32.xlu1 %v360_v55  ;;  %vm511_vm6 = vmpackc.low %vm3857_vm4, %vm3849_vm3  ;;  %vm884_vm3 = vcmask 916480   ;;  %vm832_vm4 = vcmask 924672  }
 0x18c   :  { %v280_v58 = vpop.xlane.xlu0 %279 }
 0x18d   :  { %v295_v59 = vpop.xlane.xlu1 %294 }
 0x18e   :  { %v308_v1 = vadd.f32 %v295_v59, %v280_v58 }
 0x190   :  { %v283_v60 = vpop.xlane.xlu0 %282  ;;  %v3819_v6 = vmul.f32 0.001953125, %v308_v1 }
 0x191   :  { %v298_v63 = vpop.xlane.xlu1 %297 }
 0x192   :  { %v309_v2 = vadd.f32 %v298_v63, %v283_v60  ;;  %v378_v12 = vmul.f32 %v3819_v6, %v3819_v6 }
 0x194   :  { %v335_v4 = vpop.xlane.xlu0 %334  ;;  %v3821_v7 = vmul.f32 0.001953125, %v309_v2  ;;  %v3843_v2 = vshrl.u32 %v53_v19, 7 }
 0x195   :  { %v338_v5 = vpop.xlane.xlu1 %337 }
 0x196   :  { %v379_v21 = vmul.f32 %v3821_v7, %v3821_v7  ;;  %v485_v40 = vsub.s32 0, %v3843_v2 }
 0x198   :  { %v350_v8 = vpop.xlane.xlu0 %349 }
 0x199   :  { %v353_v9 = vpop.xlane.xlu1 %352  ;;  %v363_v10 = vadd.f32 %v350_v8, %v335_v4  ;;  %v403_v4 = vsub.f32 %v3719_v52, %v3819_v6 }
 0x19a   :  { %v364_v11 = vadd.f32 %v353_v9, %v338_v5  ;;  %v404_v5 = vsub.f32 %v3723_v54, %v3819_v6  ;;  %v414_v54 = vsub.f32 %v3727_v56, %v3819_v6 }
 0x19b   :  { %v373_v16 = vmul.f32 0.001953125, %v363_v10 }
 0x19c   :  { %v374_v20 = vmul.f32 0.001953125, %v364_v11  ;;  %v286_v24 = vpop.xlane.xlu0 %285  ;;  %v405_v11 = vsub.f32 %v3729_v57, %v3821_v7 }
 0x19d   :  { %v383_v25 = vsub.f32 %v373_v16, %v378_v12  ;;  %v289_v26 = vpop.xlane.xlu1 %288  ;;  %v406_v12 = vsub.f32 %v3739_v62, %v3821_v7 }
 0x19e   :  { %v384_v27 = vsub.f32 %v374_v20, %v379_v21 }
 0x19f   :  { %v388_v29 = vmax.f32 %v383_v25, 0.0  ;;  %v416_v25 = vsub.f32 %v3747_v3, %v3821_v7 }
 0x1a0   :  { %v389_v31 = vmax.f32 %v384_v27, 0.0  ;;  %v301_v32 = vpop.xlane.xlu0 %300 }
 0x1a1   :  { %v393_v33 = vadd.f32 1e-05, %v388_v29  ;;  %v304_v34 = vpop.xlane.xlu1 %303  ;;  %v310_v36 = vadd.f32 %v301_v32, %v286_v24 }
 0x1a2   :  { %v394_v35 = vadd.f32 1e-05, %v389_v31  ;;  %v311_v42 = vadd.f32 %v304_v34, %v289_v26 }
 0x1a3   :  { %3319 = vrsqrt.f32 %v393_v33  ;;  %v3827_v45 = vmul.f32 0.001953125, %v310_v36  ;;  %v489_v36 = vsub.s32 4, %v3843_v2 }
 0x1a4   :  { %3321 = vrsqrt.f32 %v394_v35  ;;  %v341_v43 = vpop.xlane.xlu0 %340  ;;  %v3829_v48 = vmul.f32 0.001953125, %v311_v42  ;;  %v482_v35 = vsel %vm481_vm5, 65537, %v5217_v0  ;;  %v413_v42 = vsub.f32 %v3721_v53, %v3819_v6 }
 0x1a5   :  { %v344_v44 = vpop.xlane.xlu1 %343  ;;  %v380_v50 = vmul.f32 %v3827_v45, %v3827_v45  ;;  %v3889_v53 = vrot.slane %v482_v35, %v489_v36  ;;  %v407_v63 = vsub.f32 %v3759_v13, %v3827_v45  ;;  %v408_v1 = vsub.f32 %v3761_v14, %v3827_v45 }
 0x1a6   :  { %v381_v58 = vmul.f32 %v3829_v48, %v3829_v48  ;;  %v417_v2 = vsub.f32 %v3763_v15, %v3827_v45  ;;  %v410_v13 = vsub.f32 %v3777_v22, %v3829_v48  ;;  %v419_v14 = vsub.f32 %v3779_v23, %v3829_v48 }
 0x1a7   :  { %5237 = vst [vmem:[#allocation11_spill] sm:$0xff] %v3889_v53  ;;  %vm492_vm7 = vcmp.ne.s16.totalorder %v3889_v53, 0  ;;  %v420_v15 = vsub.f32 %v3789_v28, %v3829_v48  ;;  %vm928_vm5 = vcmask 908288  }
 0x1a8   :  { %v356_v49 = vpop.xlane.xlu0 %355 }
 0x1a9   :  { %v365_v51 = vadd.f32 %v356_v49, %v341_v43  ;;  %v359_v55 = vpop.xlane.xlu1 %358  ;;  %v415_v43 = vsub.f32 %v3737_v61, %v3821_v7  ;;  %v3891_v61 = vrot.slane %v482_v35, %v485_v40 }
 0x1aa   :  { %v366_v59 = vadd.f32 %v359_v55, %v344_v44  ;;  %v512_v44 = vsel %vm511_vm6, 65537, %v5217_v0  ;;  %vm1202_vm6 = vcmask 850944  }
 0x1ab   :  { %v375_v60 = vmul.f32 0.001953125, %v365_v51  ;;  %5238 = vst [vmem:[#allocation12_spill] sm:$0xff] %v3891_v61  ;;  %vm491_vm8 = vcmp.ne.s16.totalorder %v3891_v61, 0 }
 0x1ac   :  { %v376_v8 = vmul.f32 0.001953125, %v366_v59  ;;  %v3895_v59 = vrot.slane %v512_v44, %v485_v40  ;;  %v292_v35 = vpop.xlane.xlu0 %291 }
 0x1ad   :  { %v3320_v10 = vpop.eup %3319  ;;  %v385_v16 = vsub.f32 %v375_v60, %v380_v50 }
 0x1ae   :  { %v3322_v52 = vpop.eup %3321  ;;  %v386_v20 = vsub.f32 %v376_v8, %v381_v58  ;;  %v424_v21 = vmul.f32 %v3320_v10, %v404_v5  ;;  %v423_v24 = vmul.f32 %v3320_v10, %v403_v4  ;;  %v434_v31 = vmul.f32 %v3320_v10, %v414_v54  ;;  %5239 = vst [vmem:[#allocation13_spill] sm:$0xff] %v3895_v59 }
 0x1af   :  { %v390_v26 = vmax.f32 %v385_v16, 0.0  ;;  %v426_v57 = vmul.f32 %v3322_v52, %v406_v12  ;;  %v425_v27 = vmul.f32 %v3322_v52, %v405_v11  ;;  %v436_v33 = vmul.f32 %v3322_v52, %v416_v25 }
 0x1b0   :  { %v391_v62 = vmax.f32 %v386_v20, 0.0  ;;  %v444_v29 = vmax.f32 %v424_v21, 0.0  ;;  %v443_v30 = vmax.f32 %v423_v24, 0.0  ;;  %v454_v49 = vmax.f32 %v434_v31, 0.0  ;;  %v347_v40 = vpop.xlane.xlu0 %346 }
 0x1b1   :  { %v395_v56 = vadd.f32 1e-05, %v390_v26  ;;  %v446_v32 = vmax.f32 %v426_v57, 0.0  ;;  %v445_v3 = vmax.f32 %v425_v27, 0.0  ;;  %v456_v50 = vmax.f32 %v436_v33, 0.0 }
 0x1b2   :  { %v396_v34 = vadd.f32 1e-05, %v391_v62  ;;  %v433_v51 = vmul.f32 %v3320_v10, %v413_v42  ;;  %v435_v55 = vmul.f32 %v3322_v52, %v415_v43  ;;  %vm521_vm9 = vcmp.ne.s16.totalorder %v3895_v59, 0 }
 0x1b3   :  { %3323 = vrsqrt.f32 %v395_v56  ;;  %v3881_v46 = vpack.c.bf16 %v446_v32, %v444_v29  ;;  %v3883_v47 = vpack.c.bf16 %v445_v3, %v443_v30  ;;  %v3893_v6 = vpack.c.bf16 %v456_v50, %v454_v49 }
 0x1b4   :  { %3325 = vrsqrt.f32 %v396_v34  ;;  %v453_v7 = vmax.f32 %v433_v51, 0.0  ;;  %v455_v58 = vmax.f32 %v435_v55, 0.0  ;;  %v418_v4 = vsub.f32 %v3769_v18, %v3827_v45  ;;  %v307_v34 = vpop.xlane.xlu1 %306 }
 0x1b5   :  { %614 = vrot.lane.b32.xlu1 %v3881_v46, %s3621_s24  ;;  %612 = vrot.lane.b32.xlu0 %v3883_v47, %s3621_s24  ;;  %v409_v5 = vsub.f32 %v3767_v17, %v3829_v48  ;;  %v494_v9 = vsel %vm492_vm7, %v3881_v46, 0  ;;  %v493_v18 = vsel %vm491_vm8, %v3883_v47, 0  ;;  %v3937_v57 = vsel %vm521_vm9, %v3883_v47, 0 }
 0x1b6   :  { %v3897_v60 = vpack.c.bf16 %v455_v58, %v453_v7  ;;  %v3939_v27 = vrot.slane %v512_v44, %v489_v36  ;;  %v500_v56 = vsel %vm492_vm7, %v3893_v6, 0  ;;  %v312_v42 = vadd.f32 %v307_v34, %v292_v35 }
 0x1b8   :  { %v499_v17 = vsel %vm491_vm8, %v3897_v60, 0  ;;  %5240 = vst [vmem:[#allocation14_spill] sm:$0xff] %v3939_v27  ;;  %v3958_v32 = vsel %vm521_vm9, %v3897_v60, 0  ;;  %vm522_vm10 = vcmp.ne.s16.totalorder %v3939_v27, 0  ;;  %v362_v36 = vpop.xlane.xlu1 %361  ;;  %v372_v44 = vmul.f32 0.001953125, %v312_v42 }
 0x1b9   :  { %626 = vrot.lane.b32.xlu1 %v3893_v6, %s3621_s24  ;;  %624 = vrot.lane.b32.xlu0 %v3897_v60, %s3621_s24  ;;  %v3966_v3 = vsel %vm522_vm10, %v3881_v46, 0  ;;  %v3974_v33 = vsel %vm522_vm10, %v3893_v6, 0  ;;  %v367_v43 = vadd.f32 %v362_v36, %v347_v40 }
 0x1ba   :  { %v382_v49 = vmul.f32 %v372_v44, %v372_v44 }
 0x1bb   :  { %v377_v50 = vmul.f32 0.001953125, %v367_v43 }
 0x1bd   :  { %v3324_v8 = vpop.eup %3323  ;;  %549 = vrot.lane.b32.xlu1 %v494_v9, %s3623_s1  ;;  %547 = vrot.lane.b32.xlu0 %v493_v18, %s3623_s1  ;;  %v387_v55 = vsub.f32 %v377_v50, %v382_v49 }
 0x1be   :  { %v3326_v22 = vpop.eup %3325  ;;  %v427_v23 = vmul.f32 %v3324_v8, %v407_v63  ;;  %v437_v45 = vmul.f32 %v3324_v8, %v417_v2  ;;  %v428_v10 = vmul.f32 %v3324_v8, %v408_v1  ;;  %v438_v28 = vmul.f32 %v3324_v8, %v418_v4 }
 0x1bf   :  { %v429_v48 = vmul.f32 %v3326_v22, %v409_v5  ;;  %v439_v11 = vmul.f32 %v3326_v22, %v419_v14  ;;  %v430_v12 = vmul.f32 %v3326_v22, %v410_v13  ;;  %v440_v16 = vmul.f32 %v3326_v22, %v420_v15 }
 0x1c0   :  { %v447_v19 = vmax.f32 %v427_v23, 0.0  ;;  %v457_v52 = vmax.f32 %v437_v45, 0.0  ;;  %v448_v54 = vmax.f32 %v428_v10, 0.0  ;;  %v458_v20 = vmax.f32 %v438_v28, 0.0 }
 0x1c1   :  { %v449_v21 = vmax.f32 %v429_v48, 0.0  ;;  %v459_v24 = vmax.f32 %v439_v11, 0.0  ;;  %v450_v25 = vmax.f32 %v430_v12, 0.0  ;;  %v460_v26 = vmax.f32 %v440_v16, 0.0  ;;  %559 = vrot.lane.b32.xlu1 %v499_v17, %s3623_s1  ;;  %668 = vrot.lane.b32.xlu0 %v3937_v57, %s3624_s12 }
 0x1c2   :  { %v392_v58 = vmax.f32 %v387_v55, 0.0  ;;  %v411_v15 = vsub.f32 %v3799_v37, %v372_v44  ;;  %v412_v23 = vsub.f32 %v3803_v39, %v372_v44  ;;  %v422_v28 = vsub.f32 %v3807_v41, %v372_v44 }
 0x1c3   :  { %v3943_v62 = vpack.c.bf16 %v449_v21, %v447_v19  ;;  %v3945_v29 = vpack.c.bf16 %v459_v24, %v457_v52  ;;  %v3947_v30 = vpack.c.bf16 %v450_v25, %v448_v54  ;;  %v3949_v31 = vpack.c.bf16 %v460_v26, %v458_v20 }
 0x1c4   :  { %v397_v2 = vadd.f32 1e-05, %v392_v58 }
 0x1c5   :  { %561 = vrot.lane.b32.xlu1 %v500_v56, %s3623_s1  ;;  %680 = vrot.lane.b32.xlu0 %v3958_v32, %s3624_s12  ;;  %v495_v51 = vsel %vm491_vm8, %v3943_v62, 0  ;;  %v501_v7 = vsel %vm491_vm8, %v3945_v29, 0  ;;  %v496_v63 = vsel %vm492_vm7, %v3947_v30, 0  ;;  %v4016_v1 = vsel %vm521_vm9, %v3943_v62, 0 }
 0x1c6   :  { %v502_v4 = vsel %vm492_vm7, %v3949_v31, 0  ;;  %v4027_v5 = vsel %vm521_vm9, %v3945_v29, 0  ;;  %3327 = vrsqrt.f32 %v397_v2  ;;  %v4034_v13 = vsel %vm522_vm10, %v3947_v30, 0 }
 0x1c7   :  { %v4042_v14 = vsel %vm522_vm10, %v3949_v31, 0 }
 0x1c9   :  { %670 = vrot.lane.b32.xlu1 %v3966_v3, %s3624_s12  ;;  %720 = vrot.lane.b32.xlu0 %v493_v18, %s3625_s13 }
 0x1cd   :  { %682 = vrot.lane.b32.xlu1 %v3974_v33, %s3624_s12  ;;  %732 = vrot.lane.b32.xlu0 %v499_v17, %s3625_s13 }
 0x1d0   :  { %v3328_v8 = vpop.eup %3327 }
 0x1d1   :  { %722 = vrot.lane.b32.xlu1 %v494_v9, %s3625_s13  ;;  %766 = vrot.lane.b32.xlu0 %v3966_v3, %s3626_s14  ;;  %v432_v37 = vmul.f32 %v3328_v8, %v412_v23  ;;  %v442_v48 = vmul.f32 %v3328_v8, %v422_v28 }
 0x1d3   :  { %v462_v12 = vmax.f32 %v442_v48, 0.0 }
 0x1d5   :  { %734 = vrot.lane.b32.xlu1 %v500_v56, %s3625_s13  ;;  %764 = vrot.lane.b32.xlu0 %v3937_v57, %s3626_s14  ;;  %v4082_v16 = vpack.c.bf16 %v462_v12, %v462_v12 }
 0x1d7   :  { %v4104_v54 = vsel %vm492_vm7, %v4082_v16, 0  ;;  %v4161_v49 = vsel %vm522_vm10, %v4082_v16, 0 }
 0x1d9   :  { %778 = vrot.lane.b32.xlu1 %v3974_v33, %s3626_s14  ;;  %808 = vrot.lane.b32.xlu0 %v493_v18, %s3627_s15  ;;  %v421_v18 = vsub.f32 %v3801_v38, %v372_v44  ;;  %v452_v38 = vmax.f32 %v432_v37, 0.0 }
 0x1db   :  { %v441_v22 = vmul.f32 %v3328_v8, %v421_v18  ;;  %v4071_v11 = vpack.c.bf16 %v452_v38, %v452_v38 }
 0x1dd   :  { %776 = vrot.lane.b32.xlu1 %v3958_v32, %s3626_s14  ;;  %820 = vrot.lane.b32.xlu0 %v499_v17, %s3627_s15  ;;  %v461_v10 = vmax.f32 %v441_v22, 0.0  ;;  %v4096_v52 = vsel %vm492_vm7, %v4071_v11, 0  ;;  %v4142_v36 = vsel %vm522_vm10, %v4071_v11, 0  ;;  %v3302_v22 = vld [vmem:[%s5208_s2 + $0x4] ss:$12 sps:$4 sm:$0xff]  }
 0x1de   :  { %1249 = vmatprep.mubr.bf16.mxu0 %v3302_v22  ;;  %1376 = vmatprep.mubr.bf16.mxu1 %v3302_v22 }
 0x1df   :  { %v4066_v39 = vpack.c.bf16 %v461_v10, %v461_v10 }
 0x1e1   :  { %810 = vrot.lane.b32.xlu1 %v494_v9, %s3627_s15  ;;  %616 = vrot.lane.b32.xlu0 %v3943_v62, %s3621_s24  ;;  %v431_v9 = vmul.f32 %v3328_v8, %v411_v15  ;;  %v4089_v19 = vsel %vm491_vm8, %v4066_v39, 0 }
 0x1e3   :  { %v451_v17 = vmax.f32 %v431_v9, 0.0 }
 0x1e5   :  { %822 = vrot.lane.b32.xlu1 %v500_v56, %s3627_s15  ;;  %628 = vrot.lane.b32.xlu0 %v3945_v29, %s3621_s24  ;;  %v4059_v45 = vpack.c.bf16 %v451_v17, %v451_v17  ;;  %v4135_v56 = vsel %vm521_vm9, %v4066_v39, 0 }
 0x1e7   :  { %v4078_v41 = vsel %vm491_vm8, %v4059_v45, 0  ;;  %v4122_v24 = vsel %vm521_vm9, %v4059_v45, 0 }
 0x1e9   :  { %618 = vrot.lane.b32.xlu1 %v3947_v30, %s3621_s24  ;;  %551 = vrot.lane.b32.xlu0 %v495_v51, %s3623_s1 }
 0x1ed   :  { %630 = vrot.lane.b32.xlu1 %v3949_v31, %s3621_s24  ;;  %563 = vrot.lane.b32.xlu0 %v501_v7, %s3623_s1 }
 0x1f1   :  { %553 = vrot.lane.b32.xlu1 %v496_v63, %s3623_s1  ;;  %672 = vrot.lane.b32.xlu0 %v4016_v1, %s3624_s12 }
 0x1f5   :  { %565 = vrot.lane.b32.xlu1 %v502_v4, %s3623_s1  ;;  %684 = vrot.lane.b32.xlu0 %v4027_v5, %s3624_s12 }
 0x1f9   :  { %674 = vrot.lane.b32.xlu1 %v4034_v13, %s3624_s12  ;;  %724 = vrot.lane.b32.xlu0 %v495_v51, %s3625_s13 }
 0x1fd   :  { %686 = vrot.lane.b32.xlu1 %v4042_v14, %s3624_s12  ;;  %736 = vrot.lane.b32.xlu0 %v501_v7, %s3625_s13 }
 0x201   :  { %726 = vrot.lane.b32.xlu1 %v496_v63, %s3625_s13  ;;  %770 = vrot.lane.b32.xlu0 %v4034_v13, %s3626_s14 }
 0x205   :  { %738 = vrot.lane.b32.xlu1 %v502_v4, %s3625_s13  ;;  %768 = vrot.lane.b32.xlu0 %v4016_v1, %s3626_s14 }
 0x209   :  { %782 = vrot.lane.b32.xlu1 %v4042_v14, %s3626_s14  ;;  %812 = vrot.lane.b32.xlu0 %v495_v51, %s3627_s15 }
 0x20d   :  { %780 = vrot.lane.b32.xlu1 %v4027_v5, %s3626_s14  ;;  %620 = vrot.lane.b32.xlu0 %v4059_v45, %s3621_s24 }
 0x211   :  { %814 = vrot.lane.b32.xlu1 %v496_v63, %s3627_s15  ;;  %632 = vrot.lane.b32.xlu0 %v4066_v39, %s3621_s24 }
 0x215   :  { %622 = vrot.lane.b32.xlu1 %v4071_v11, %s3621_s24  ;;  %555 = vrot.lane.b32.xlu0 %v4078_v41, %s3623_s1 }
 0x219   :  { %634 = vrot.lane.b32.xlu1 %v4082_v16, %s3621_s24  ;;  %567 = vrot.lane.b32.xlu0 %v4089_v19, %s3623_s1 }
 0x21d   :  { %557 = vrot.lane.b32.xlu1 %v4096_v52, %s3623_s1  ;;  %824 = vrot.lane.b32.xlu0 %v501_v7, %s3627_s15 }
 0x221   :  { %569 = vrot.lane.b32.xlu1 %v4104_v54, %s3623_s1  ;;  %862 = vrot.lane.b32.xlu0 %v3881_v46, %s3628_s16 }
 0x225   :  { %826 = vrot.lane.b32.xlu1 %v502_v4, %s3627_s15  ;;  %860 = vrot.lane.b32.xlu0 %v3883_v47, %s3628_s16 }
 0x227   :  { %v4113_v20 = vpop.permute.xlu1 %614  ;;  %v4115_v21 = vpop.permute.xlu0 %612 }
 0x229   :  { %874 = vrot.lane.b32.xlu1 %v3893_v6, %s3628_s16  ;;  %676 = vrot.lane.b32.xlu0 %v4122_v24, %s3624_s12 }
 0x22b   :  { %v4126_v25 = vpop.permute.xlu1 %626  ;;  %v4128_v26 = vpop.permute.xlu0 %624 }
 0x22c   :  { %v640_v0 = vsel %vm636_vm13, %v4128_v26, %v4126_v25  ;;  %v651_v25 = vsel %vm636_vm13, 0, %v4128_v26 }
 0x22d   :  { %872 = vrot.lane.b32.xlu1 %v3897_v60, %s3628_s16  ;;  %688 = vrot.lane.b32.xlu0 %v4135_v56, %s3624_s12 }
 0x22f   :  { %v550_v34 = vpop.permute.xlu1 %549  ;;  %v548_v35 = vpop.permute.xlu0 %547 }
 0x230   :  { %v572_v42 = vsel %vm571_vm11, %v548_v35, %v550_v34 }
 0x231   :  { %678 = vrot.lane.b32.xlu1 %v4142_v36, %s3624_s12  ;;  %728 = vrot.lane.b32.xlu0 %v4078_v41, %s3625_s13 }
 0x232   :  { %1217 = vmatprep.subr.bf16.mxu0 %v572_v42 }
 0x233   :  { %3113 = vmatpush1.bf16.msk.msra.mxu0 %vm4145_vm12, %v548_v35  ;;  %v560_v43 = vpop.permute.xlu1 %559  ;;  %v4156_v44 = vpop.permute.xlu0 %668 }
 0x235   :  { %690 = vrot.lane.b32.xlu1 %v4161_v49, %s3624_s12  ;;  %740 = vrot.lane.b32.xlu0 %v4089_v19, %s3625_s13 }
 0x237   :  { %v562_v50 = vpop.permute.xlu1 %561  ;;  %v4167_v51 = vpop.permute.xlu0 %680 }
 0x238   :  { %v575_v55 = vsel %vm571_vm11, %v560_v43, %v562_v50 }
 0x239   :  { %1344 = vmatprep.subr.bf16.mxu1 %v575_v55  ;;  %730 = vrot.lane.b32.xlu1 %v4096_v52, %s3625_s13 }
 0x23a   :  { %866 = vrot.lane.b32.xlu0 %v3947_v30, %s3628_s16  ;;  %3129 = vmatpush1.bf16.msk.msra.mxu1 %vm4145_vm12, %v560_v43 }
 0x23b   :  { %v4176_v7 = vpop.permute.xlu1 %670  ;;  %v4178_v58 = vpop.permute.xlu0 %720 }
 0x23d   :  { %742 = vrot.lane.b32.xlu1 %v4104_v54, %s3625_s13 }
 0x23e   :  { %864 = vrot.lane.b32.xlu0 %v3943_v62, %s3628_s16 }
 0x23f   :  { %v4184_v63 = vpop.permute.xlu1 %682  ;;  %v4186_v2 = vpop.permute.xlu0 %732 }
 0x241   :  { %878 = vrot.lane.b32.xlu1 %v3949_v31, %s3628_s16 }
 0x242   :  { %870 = vrot.lane.b32.xlu0 %v4071_v11, %s3628_s16 }
 0x243   :  { %v4192_v4 = vpop.permute.xlu1 %722  ;;  %v4194_v8 = vpop.permute.xlu0 %766 }
 0x245   :  { %876 = vrot.lane.b32.xlu1 %v3945_v29, %s3628_s16 }
 0x246   :  { %774 = vrot.lane.b32.xlu0 %v4142_v36, %s3626_s14 }
 0x247   :  { %v4200_v15 = vpop.permute.xlu1 %734  ;;  %v4202_v9 = vpop.permute.xlu0 %764 }
 0x249   :  { %882 = vrot.lane.b32.xlu1 %v4082_v16, %s3628_s16 }
 0x24a   :  { %772 = vrot.lane.b32.xlu0 %v4122_v24, %s3626_s14 }
 0x24b   :  { %v4208_v18 = vpop.permute.xlu1 %778  ;;  %v4210_v17 = vpop.permute.xlu0 %808 }
 0x24c   :  { %5243 = vst [vmem:[#allocation15_spill] sm:$0xff] %v4210_v17 }
 0x24d   :  { %786 = vrot.lane.b32.xlu1 %v4161_v49, %s3626_s14 }
 0x24e   :  { %868 = vrot.lane.b32.xlu0 %v4059_v45, %s3628_s16 }
 0x24f   :  { %v4219_v23 = vpop.permute.xlu1 %776  ;;  %v4221_v37 = vpop.permute.xlu0 %820 }
 0x250   :  { %5244 = vst [vmem:[#allocation16_spill] sm:$0xff] %v4221_v37 }
 0x251   :  { %784 = vrot.lane.b32.xlu1 %v4135_v56, %s3626_s14 }
 0x252   :  { %904 = vrot.lane.b32.xlu0 %v3937_v57, %s3629_s19 }
 0x253   :  { %v4227_v10 = vpop.permute.xlu1 %810  ;;  %v617_v28 = vpop.permute.xlu0 %616 }
 0x254   :  { %v647_v61 = vsel %vm636_vm13, 0, %v617_v28 }
 0x255   :  { %880 = vrot.lane.b32.xlu1 %v4066_v39, %s3628_s16 }
 0x256   :  { %818 = vrot.lane.b32.xlu0 %v4096_v52, %s3627_s15 }
 0x257   :  { %v4233_v38 = vpop.permute.xlu1 %822  ;;  %v4235_v48 = vpop.permute.xlu0 %628 }
 0x258   :  { %5245 = vst [vmem:[#allocation17_spill] sm:$0xff] %v4233_v38 }
 0x259   :  { %906 = vrot.lane.b32.xlu1 %v3966_v3, %s3629_s19 }
 0x25a   :  { %816 = vrot.lane.b32.xlu0 %v4078_v41, %s3627_s15 }
 0x25b   :  { %v619_v57 = vpop.permute.xlu1 %618  ;;  %v552_v12 = vpop.permute.xlu0 %551 }
 0x25d   :  { %830 = vrot.lane.b32.xlu1 %v4104_v54, %s3627_s15 }
 0x25e   :  { %916 = vrot.lane.b32.xlu0 %v3958_v32, %s3629_s19 }
 0x25f   :  { %v631_v34 = vpop.permute.xlu1 %630  ;;  %v564_v52 = vpop.permute.xlu0 %563 }
 0x261   :  { %828 = vrot.lane.b32.xlu1 %v4089_v19, %s3627_s15 }
 0x262   :  { %908 = vrot.lane.b32.xlu0 %v4016_v1, %s3629_s19 }
 0x263   :  { %v554_v3 = vpop.permute.xlu1 %553  ;;  %v4249_v35 = vpop.permute.xlu0 %672 }
 0x264   :  { %v573_v41 = vsel %vm571_vm11, %v552_v12, %v554_v3  ;;  %v638_v3 = vsel %vm636_vm13, %v617_v28, %v619_v57 }
 0x265   :  { %918 = vrot.lane.b32.xlu1 %v3974_v33, %s3629_s19  ;;  %1219 = vmatprep.subr.bf16.mxu0 %v573_v41  ;;  %v637_v41 = vsel %vm636_vm13, %v4115_v21, %v4113_v20  ;;  %v967_v59 = vrot.slane %v638_v3, 4  ;;  %v641_v20 = vsel %vm636_vm13, %v4235_v48, %v631_v34  ;;  %v974_v3 = vrot.slane %v640_v0, 4 }
 0x266   :  { %920 = vrot.lane.b32.xlu0 %v4027_v5, %s3629_s19  ;;  %3115 = vmatpush1.bf16.msk.msra.mxu0 %vm4145_vm12, %v552_v12  ;;  %v964_v27 = vrot.slane %v637_v41, 4  ;;  %v965_v41 = vrot.slane %v647_v61, 4  ;;  %v973_v0 = vrot.slane %v651_v25, 4 }
 0x267   :  { %v566_v32 = vpop.permute.xlu1 %565  ;;  %v4258_v19 = vpop.permute.xlu0 %684 }
 0x268   :  { %v576_v1 = vsel %vm571_vm11, %v564_v52, %v566_v32  ;;  %v968_v34 = vsel %vm962_vm14, %v964_v27, %v967_v59 }
 0x269   :  { %910 = vrot.lane.b32.xlu1 %v4034_v13, %s3629_s19  ;;  %1346 = vmatprep.subr.bf16.mxu1 %v576_v1  ;;  %v645_v1 = vsel %vm636_vm13, 0, %v4115_v21 }
 0x26a   :  { %912 = vrot.lane.b32.xlu0 %v4122_v24, %s3629_s19  ;;  %3131 = vmatpush1.bf16.msk.msra.mxu1 %vm4145_vm12, %v564_v52  ;;  %v963_v37 = vrot.slane %v645_v1, 4  ;;  %vm1705_vm12 = vcmask 326656  }
 0x26b   :  { %v4267_v33 = vpop.permute.xlu1 %674  ;;  %v4269_v5 = vpop.permute.xlu0 %724 }
 0x26d   :  { %922 = vrot.lane.b32.xlu1 %v4042_v14, %s3629_s19 }
 0x26e   :  { %924 = vrot.lane.b32.xlu0 %v4135_v56, %s3629_s19 }
 0x26f   :  { %v4275_v54 = vpop.permute.xlu1 %686  ;;  %v4277_v13 = vpop.permute.xlu0 %736 }
 0x271   :  { %914 = vrot.lane.b32.xlu1 %v4142_v36, %s3629_s19 }
 0x273   :  { %v4281_v24 = vpop.permute.xlu1 %726  ;;  %v4283_v40 = vpop.permute.xlu0 %770 }
 0x275   :  { %926 = vrot.lane.b32.xlu1 %v4161_v49, %s3629_s19 }
 0x277   :  { %v4287_v42 = vpop.permute.xlu1 %738  ;;  %v4289_v14 = vpop.permute.xlu0 %768 }
 0x27b   :  { %v4291_v43 = vpop.permute.xlu1 %782  ;;  %v4293_v56 = vpop.permute.xlu0 %812 }
 0x27c   :  { %5246 = vst [vmem:[#allocation18_spill] sm:$0xff] %v4293_v56 }
 0x27f   :  { %v4295_v50 = vpop.permute.xlu1 %780  ;;  %v621_v55 = vpop.permute.xlu0 %620 }
 0x283   :  { %v4297_v22 = vpop.permute.xlu1 %814  ;;  %v633_v36 = vpop.permute.xlu0 %632 }
 0x284   :  { %5247 = vst [vmem:[#allocation19_spill] sm:$0xff] %v4297_v22  ;;  %v653_v22 = vsel %vm636_vm13, 0, %v4235_v48 }
 0x285   :  { %v975_v48 = vrot.slane %v653_v22, 4 }
 0x287   :  { %v623_v12 = vpop.permute.xlu1 %622  ;;  %v556_v52 = vpop.permute.xlu0 %555 }
 0x288   :  { %v591_v53 = vsel %vm571_vm11, 0, %v556_v52  ;;  %v639_v56 = vsel %vm636_vm13, %v621_v55, %v623_v12  ;;  %v977_v12 = vrot.slane %v641_v20, 4  ;;  %v655_v20 = vsel %vm636_vm13, 0, %v633_v36 }
 0x289   :  { %v1095_v1 = vsel %vm962_vm14, %v591_v53, %v963_v37  ;;  %v979_v22 = vrot.slane %v655_v20, 4 }
 0x28b   :  { %v635_v49 = vpop.permute.xlu1 %634  ;;  %v568_v32 = vpop.permute.xlu0 %567 }
 0x28c   :  { %v642_v26 = vsel %vm636_vm13, %v633_v36, %v635_v49  ;;  %v978_v49 = vsel %vm962_vm14, %v974_v3, %v977_v12 }
 0x28f   :  { %v558_v57 = vpop.permute.xlu1 %557  ;;  %v4314_v38 = vpop.permute.xlu0 %824 }
 0x290   :  { %v574_v21 = vsel %vm571_vm11, %v556_v52, %v558_v57  ;;  %5248 = vst [vmem:[#allocation20_spill] sm:$0xff] %v4314_v38  ;;  %v649_v52 = vsel %vm636_vm13, 0, %v621_v55  ;;  %v971_v57 = vrot.slane %v639_v56, 4  ;;  %v599_v38 = vsel %vm571_vm11, 0, %v568_v32 }
 0x291   :  { %v1099_v28 = vsel %vm962_vm14, %v574_v21, %v964_v27  ;;  %v969_v27 = vrot.slane %v649_v52, 4  ;;  %v966_v55 = vsel %vm962_vm14, %v963_v37, %v965_v41  ;;  %v1102_v56 = vsel %vm962_vm14, %v599_v38, %v973_v0 }
 0x292   :  { %1221 = vmatprep.subr.bf16.mxu0 %v1099_v28  ;;  %v981_v28 = vrot.slane %v642_v26, 4  ;;  %v976_v38 = vsel %vm962_vm14, %v973_v0, %v975_v48  ;;  %v745_v52 = vsel %vm744_vm1, %v4178_v58, %v4192_v4  ;;  %v746_v0 = vsel %vm744_vm1, %v4269_v5, %v4281_v24 }
 0x293   :  { %v570_v17 = vpop.permute.xlu1 %569  ;;  %1222 = vmatpush1.bf16.msra.mxu0 %v1095_v1  ;;  %v4327_v21 = vpop.permute.xlu0 %862  ;;  %v970_v37 = vsel %vm962_vm14, %v965_v41, %v969_v27  ;;  %v980_v41 = vsel %vm962_vm14, %v975_v48, %v979_v22  ;;  %v753_v26 = vsel %vm744_vm1, 0, %v4178_v58  ;;  %v697_v58 = vsel %vm692_vm15, %v4258_v19, %v4275_v54 }
 0x294   :  { %v577_v61 = vsel %vm571_vm11, %v568_v32, %v570_v17  ;;  %1223 = vmatprep.subr.bf16.mxu0 %v968_v34  ;;  %v972_v17 = vsel %vm962_vm14, %v967_v59, %v971_v57  ;;  %v693_v59 = vsel %vm692_vm15, %v4156_v44, %v4176_v7  ;;  %v694_v7 = vsel %vm692_vm15, %v4249_v35, %v4267_v33 }
 0x295   :  { %v1106_v53 = vsel %vm962_vm14, %v577_v61, %v974_v3  ;;  %v982_v3 = vsel %vm962_vm14, %v977_v12, %v981_v28  ;;  %v696_v12 = vsel %vm692_vm15, %v4167_v51, %v4184_v63  ;;  %v748_v61 = vsel %vm744_vm1, %v4186_v2, %v4200_v15 }
 0x296   :  { %1348 = vmatprep.subr.bf16.mxu1 %v1106_v53  ;;  %v755_v33 = vsel %vm744_vm1, 0, %v4269_v5  ;;  %v1001_v53 = vrot.slane %v746_v0, 4  ;;  %v997_v15 = vrot.slane %v753_v26, 4  ;;  %v749_v5 = vsel %vm744_vm1, %v4277_v13, %v4287_v42 }
 0x297   :  { %v4333_v25 = vpop.permute.xlu1 %826  ;;  %1224 = vmatpush1.bf16.msra.mxu0 %v966_v55  ;;  %1349 = vmatpush1.bf16.msra.mxu1 %v1102_v56  ;;  %v4337_v32 = vpop.permute.xlu0 %860  ;;  %v1008_v56 = vrot.slane %v748_v61, 4  ;;  %v761_v54 = vsel %vm744_vm1, 0, %v4277_v13  ;;  %v1011_v28 = vrot.slane %v749_v5, 4 }
 0x298   :  { %1225 = vmatprep.subr.bf16.mxu0 %v972_v17  ;;  %1350 = vmatprep.subr.bf16.mxu1 %v978_v49 }
 0x29b   :  { %v4341_v36 = vpop.permute.xlu1 %874  ;;  %1226 = vmatpush1.bf16.msra.mxu0 %v970_v37  ;;  %1351 = vmatpush1.bf16.msra.mxu1 %v976_v38  ;;  %v677_v1 = vpop.permute.xlu0 %676 }
 0x29c   :  { %1227 = vmatprep.subr.bf16.mxu0 %v693_v59  ;;  %1352 = vmatprep.subr.bf16.mxu1 %v982_v3  ;;  %v711_v63 = vsel %vm692_vm15, 0, %v677_v1  ;;  %v1009_v59 = vrot.slane %v761_v54, 4 }
 0x29d   :  { %v1109_v20 = vsel %vm962_vm14, %v711_v63, %v997_v15 }
 0x29f   :  { %v4356_v57 = vpop.permute.xlu1 %872  ;;  %3117 = vmatpush1.bf16.msk.msra.mxu0 %vm4348_vm0, %v4156_v44  ;;  %1353 = vmatpush1.bf16.msra.mxu1 %v980_v41  ;;  %v689_v4 = vpop.permute.xlu0 %688  ;;  %v998_v44 = vrot.slane %v745_v52, 4 }
 0x2a0   :  { %1229 = vmatprep.subr.bf16.mxu0 %v694_v7  ;;  %1354 = vmatprep.subr.bf16.mxu1 %v696_v12  ;;  %v719_v42 = vsel %vm692_vm15, 0, %v689_v4 }
 0x2a3   :  { %v679_v48 = vpop.permute.xlu1 %678  ;;  %3119 = vmatpush1.bf16.msk.msra.mxu0 %vm4348_vm0, %v4249_v35  ;;  %3133 = vmatpush1.bf16.msk.msra.mxu1 %vm4348_vm0, %v4167_v51  ;;  %v729_v27 = vpop.permute.xlu0 %728  ;;  %v759_v35 = vsel %vm744_vm1, 0, %v4186_v2  ;;  %v999_v51 = vrot.slane %v755_v33, 4  ;;  %v1002_v2 = vsel %vm962_vm14, %v998_v44, %v1001_v53 }
 0x2a4   :  { %v695_v24 = vsel %vm692_vm15, %v677_v1, %v679_v48  ;;  %1356 = vmatprep.subr.bf16.mxu1 %v697_v58  ;;  %v1007_v49 = vrot.slane %v759_v35, 4  ;;  %v757_v38 = vsel %vm744_vm1, 0, %v729_v27 }
 0x2a5   :  { %v1113_v55 = vsel %vm962_vm14, %v695_v24, %v998_v44  ;;  %v1000_v3 = vsel %vm962_vm14, %v997_v15, %v999_v51  ;;  %v1003_v34 = vrot.slane %v757_v38, 4  ;;  %v797_v15 = vsel %vm788_vm2, %v4194_v8, 0 }
 0x2a6   :  { %1231 = vmatprep.subr.bf16.mxu0 %v1113_v55  ;;  %v1116_v1 = vsel %vm962_vm14, %v719_v42, %v1007_v49  ;;  %v1032_v35 = vrot.slane %v797_v15, 4  ;;  %v789_v55 = vsel %vm788_vm2, %v4202_v9, %v4194_v8  ;;  %v792_v8 = vsel %vm788_vm2, %v4219_v23, %v4208_v18  ;;  %v5252_v15 = vld [vmem:[#allocation19_spill] sm:$0xff] }
 0x2a7   :  { %v691_v17 = vpop.permute.xlu1 %690  ;;  %1232 = vmatpush1.bf16.msra.mxu0 %v1109_v20  ;;  %3135 = vmatpush1.bf16.msk.msra.mxu1 %vm4348_vm0, %v4258_v19  ;;  %v741_v37 = vpop.permute.xlu0 %740  ;;  %v1012_v19 = vsel %vm962_vm14, %v1008_v56, %v1011_v28  ;;  %v1004_v48 = vsel %vm962_vm14, %v999_v51, %v1003_v34  ;;  %v1031_v20 = vrot.slane %v789_v55, 4  ;;  %v790_v42 = vsel %vm788_vm2, %v4289_v14, %v4283_v40  ;;  %v3303_v55 = vld [vmem:[%s5208_s2 + $0x1c] ss:$12 sps:$4 sm:$0xff]  }
 0x2a8   :  { %v698_v22 = vsel %vm692_vm15, %v689_v4, %v691_v17  ;;  %1233 = vmatprep.subr.bf16.mxu0 %v1002_v2  ;;  %v763_v12 = vsel %vm744_vm1, 0, %v741_v37  ;;  %v1010_v4 = vsel %vm962_vm14, %v1007_v49, %v1009_v59  ;;  %v1033_v17 = vrot.slane %v790_v42, 4 }
 0x2a9   :  { %v1120_v13 = vsel %vm962_vm14, %v698_v22, %v1008_v56  ;;  %v1013_v61 = vrot.slane %v763_v12, 4  ;;  %v803_v56 = vsel %vm788_vm2, %v4208_v18, 0  ;;  %v1041_v18 = vrot.slane %v792_v8, 4  ;;  %v5255_v8 = vld [vmem:[#allocation16_spill] sm:$0xff] }
 0x2aa   :  { %1358 = vmatprep.subr.bf16.mxu1 %v1120_v13  ;;  %v1042_v54 = vrot.slane %v803_v56, 4  ;;  %v793_v2 = vsel %vm788_vm2, %v4295_v50, %v4291_v43  ;;  %v899_v56 = vsel %vm884_vm3, %v4341_v36, 0  ;;  %vm2259_vm0 = vcmask 261120  }
 0x2ab   :  { %v731_v41 = vpop.permute.xlu1 %730  ;;  %1234 = vmatpush1.bf16.msra.mxu0 %v1000_v3  ;;  %1359 = vmatpush1.bf16.msra.mxu1 %v1116_v1 }
 0x2ac   :  { %v747_v52 = vsel %vm744_vm1, %v729_v27, %v731_v41  ;;  %v4409_v7 = vpop.permute.xlu0 %866  ;;  %1360 = vmatprep.subr.bf16.mxu1 %v1012_v19  ;;  %v1014_v27 = vsel %vm962_vm14, %v1009_v59, %v1013_v61 }
 0x2ad   :  { %v1005_v0 = vrot.slane %v747_v52, 4 }
 0x2af   :  { %v743_v26 = vpop.permute.xlu1 %742  ;;  %1361 = vmatpush1.bf16.msra.mxu1 %v1010_v4  ;;  %v1006_v44 = vsel %vm962_vm14, %v1001_v53, %v1005_v0  ;;  %v893_v4 = vsel %vm884_vm3, %v4327_v21, 0 }
 0x2b0   :  { %v750_v33 = vsel %vm744_vm1, %v741_v37, %v743_v26  ;;  %v4415_v63 = vpop.permute.xlu0 %864  ;;  %1235 = vmatprep.subr.bf16.mxu0 %v1006_v44  ;;  %v1043_v37 = vrot.slane %v793_v2, 4  ;;  %v5251_v44 = vld [vmem:[#allocation15_spill] sm:$0xff] }
 0x2b1   :  { %v1015_v58 = vrot.slane %v750_v33, 4  ;;  %1236 = vmatpush1.bf16.msra.mxu0 %v1004_v48  ;;  %v833_v61 = vsel %vm832_vm4, %v5251_v44, %v4227_v10  ;;  %v3300_v33 = vld [vmem:[%s5208_s2] ss:$12 sps:$4 sm:$0xff]   ;;  %v895_v48 = vsel %vm884_vm3, %v4409_v7, 0 }
 0x2b2   :  { %1237 = vmatprep.subr.bf16.mxu0 %v3881_v46  ;;  %v799_v46 = vsel %vm788_vm2, %v4283_v40, 0  ;;  %v1044_v19 = vsel %vm962_vm14, %v1041_v18, %v1043_v37 }
 0x2b3   :  { %v4421_v5 = vpop.permute.xlu1 %878  ;;  %v1016_v24 = vsel %vm962_vm14, %v1011_v28, %v1015_v58  ;;  %v1035_v9 = vrot.slane %v799_v46, 4 }
 0x2b4   :  { %v4424_v53 = vpop.permute.xlu0 %870  ;;  %1362 = vmatprep.subr.bf16.mxu1 %v1016_v24  ;;  %v5253_v24 = vld [vmem:[#allocation17_spill] sm:$0xff] }
 0x2b5   :  { %1238 = vmatpush1.bf16.msra.mxu0 %v3883_v47  ;;  %1363 = vmatpush1.bf16.msra.mxu1 %v1014_v27  ;;  %v1128_v47 = vsel %vm962_vm14, %v4071_v11, %v1032_v35  ;;  %v1136_v11 = vsel %vm962_vm14, %v4082_v16, %v1042_v54  ;;  %v1066_v27 = vrot.slane %v893_v4, 4 }
 0x2b6   :  { %1239 = vmatprep.subr.bf16.mxu0 %v3947_v30  ;;  %1364 = vmatprep.subr.bf16.mxu1 %v3893_v6  ;;  %v805_v6 = vsel %vm788_vm2, %v4291_v43, 0  ;;  %v1034_v43 = vsel %vm962_vm14, %v1031_v20, %v1033_v17 }
 0x2b7   :  { %v4437_v51 = vpop.permute.xlu1 %876  ;;  %v1045_v14 = vrot.slane %v805_v6, 4 }
 0x2b8   :  { %v775_v28 = vpop.permute.xlu0 %774 }
 0x2b9   :  { %1240 = vmatpush1.bf16.msra.mxu0 %v3943_v62  ;;  %1365 = vmatpush1.bf16.msra.mxu1 %v3897_v60  ;;  %v801_v30 = vsel %vm788_vm2, %v775_v28, 0  ;;  %v1124_v62 = vsel %vm962_vm14, %v4059_v45, %v1031_v20  ;;  %v1036_v60 = vsel %vm962_vm14, %v1032_v35, %v1035_v9  ;;  %v1132_v45 = vsel %vm962_vm14, %v4066_v39, %v1041_v18  ;;  %v5254_v20 = vld [vmem:[#allocation18_spill] sm:$0xff] }
 0x2ba   :  { %1241 = vmatprep.subr.bf16.mxu0 %v1128_v47  ;;  %1366 = vmatprep.subr.bf16.mxu1 %v3949_v31  ;;  %v1039_v49 = vrot.slane %v801_v30, 4  ;;  %v897_v30 = vsel %vm884_vm3, %v4424_v53, 0  ;;  %v1076_v18 = vrot.slane %v899_v56, 4  ;;  %v3308_v56 = vld [vmem:[%s5208_s2 + $0x8] ss:$12 sps:$4 sm:$0xff]  }
 0x2bb   :  { %v4453_v23 = vpop.permute.xlu1 %882 }
 0x2bc   :  { %v773_v40 = vpop.permute.xlu0 %772  ;;  %v1040_v59 = vsel %vm962_vm14, %v1035_v9, %v1039_v49  ;;  %v836_v9 = vsel %vm832_vm4, %v5255_v8, %v5253_v24 }
 0x2bd   :  { %v791_v31 = vsel %vm788_vm2, %v773_v40, %v775_v28  ;;  %1242 = vmatpush1.bf16.msra.mxu0 %v1124_v62  ;;  %1367 = vmatpush1.bf16.msra.mxu1 %v3945_v29  ;;  %v1046_v29 = vsel %vm962_vm14, %v1042_v54, %v1045_v14  ;;  %v834_v54 = vsel %vm832_vm4, %v5254_v20, %v5252_v15 }
 0x2be   :  { %1243 = vmatprep.subr.bf16.mxu0 %v1036_v60  ;;  %1368 = vmatprep.subr.bf16.mxu1 %v1136_v11  ;;  %v1037_v38 = vrot.slane %v791_v31, 4  ;;  %v886_v28 = vsel %vm884_vm3, %v4415_v63, %v4409_v7  ;;  %v5256_v7 = vld [vmem:[#allocation20_spill] sm:$0xff]  ;;  %v888_v60 = vsel %vm884_vm3, %v4356_v57, %v4341_v36  ;;  %v3305_v31 = vld [vmem:[%s5208_s2 + $0x18] ss:$12 sps:$4 sm:$0xff]  }
 0x2bf   :  { %v787_v22 = vpop.permute.xlu1 %786  ;;  %v837_v63 = vsel %vm832_vm4, %v5256_v7, %v4333_v25  ;;  %v1067_v11 = vrot.slane %v886_v28, 4 }
 0x2c0   :  { %v807_v16 = vsel %vm788_vm2, %v787_v22, 0  ;;  %v4468_v13 = vpop.permute.xlu0 %868  ;;  %v1038_v41 = vsel %vm962_vm14, %v1033_v17, %v1037_v38  ;;  %v901_v17 = vsel %vm884_vm3, %v4421_v5, 0  ;;  %v1075_v38 = vrot.slane %v888_v60, 4 }
 0x2c1   :  { %v1049_v50 = vrot.slane %v807_v16, 4  ;;  %1244 = vmatpush1.bf16.msra.mxu0 %v1034_v43  ;;  %1369 = vmatpush1.bf16.msra.mxu1 %v1132_v45  ;;  %v1079_v45 = vrot.slane %v901_v17, 4  ;;  %v903_v16 = vsel %vm884_vm3, %v4453_v23, 0 }
 0x2c2   :  { %1245 = vmatprep.subr.bf16.mxu0 %v1040_v59  ;;  %1370 = vmatprep.subr.bf16.mxu1 %v1046_v29 }
 0x2c3   :  { %v785_v3 = vpop.permute.xlu1 %784  ;;  %v1050_v52 = vsel %vm962_vm14, %v1045_v14, %v1049_v50 }
 0x2c4   :  { %v794_v39 = vsel %vm788_vm2, %v785_v3, %v787_v22  ;;  %v4474_v1 = vpop.permute.xlu0 %904  ;;  %v1073_v22 = vrot.slane %v897_v30, 4 }
 0x2c5   :  { %v1047_v34 = vrot.slane %v794_v39, 4  ;;  %1246 = vmatpush1.bf16.msra.mxu0 %v1038_v41  ;;  %1371 = vmatpush1.bf16.msra.mxu1 %v1044_v19  ;;  %v1080_v41 = vsel %vm962_vm14, %v1076_v18, %v1079_v45 }
 0x2c6   :  { %3120 = vmatprep.subr.msk.bf16.mxu0 %vm832_vm4, %v4227_v10  ;;  %1372 = vmatprep.subr.bf16.mxu1 %v1050_v52  ;;  %v885_v10 = vsel %vm884_vm3, %v4337_v32, %v4327_v21  ;;  %v1160_v21 = vld [vmem:[%s5208_s2 + $0x30] sm:$0xff]  ;;  %v1069_v32 = vrot.slane %v895_v48, 4 }
 0x2c7   :  { %v4481_v12 = vpop.permute.xlu1 %880  ;;  %v1048_v0 = vsel %vm962_vm14, %v1043_v37, %v1047_v34  ;;  %v1065_v6 = vrot.slane %v885_v10, 4  ;;  %v3110_v62 = vcombine.high %v1160_v21, %v1160_v21  ;;  %v889_v37 = vsel %vm884_vm3, %v4437_v51, %v4421_v5 }
 0x2c8   :  { %v819_v26 = vpop.permute.xlu0 %818  ;;  %v1070_v36 = vsel %vm962_vm14, %v1066_v27, %v1069_v32  ;;  %v1077_v59 = vrot.slane %v889_v37, 4  ;;  %v1074_v3 = vsel %vm962_vm14, %v1069_v32, %v1073_v22  ;;  %v1083_v51 = vrot.slane %v903_v16, 4  ;;  %v3310_v32 = vld [vmem:[%s5208_s2 + $0x38] ss:$0 sps:$4 sm:$0xff]  }
 0x2c9   :  { %1248 = vmatpush1.bf16.msra.mxu0 %v833_v61  ;;  %1373 = vmatpush1.bf16.msra.mxu1 %v1048_v0  ;;  %v851_v58 = vsel %vm832_vm4, %v819_v26, 0  ;;  %v1068_v50 = vsel %vm962_vm14, %v1065_v6, %v1067_v11  ;;  %v890_v39 = vsel %vm884_vm3, %v4481_v12, %v4453_v23  ;;  %v3109_v52 = vcombine.low %v1160_v21, %v1160_v21  ;;  %v3309_v21 = vld [vmem:[%s5208_s2 + $0x20] ss:$12 sps:$4 sm:$0xff]  }
 0x2ca   :  { %3121 = vmatprep.subr.msk.bf16.mxu0 %vm832_vm4, %v5252_v15  ;;  %3136 = vmatprep.subr.msk.bf16.mxu1 %vm832_vm4, %v5253_v24  ;;  %v1143_v47 = vsel %vm962_vm14, %v851_v58, %v1066_v27  ;;  %v1081_v0 = vrot.slane %v890_v39, 4  ;;  %v1078_v4 = vsel %vm962_vm14, %v1075_v38, %v1077_v59  ;;  %v1084_v23 = vsel %vm962_vm14, %v1079_v45, %v1083_v51 }
 0x2cb   :  { %v4502_v35 = vpop.permute.xlu1 %906 }
 0x2cc   :  { %v817_v46 = vpop.permute.xlu0 %816  ;;  %1250 = vmatmul.mubr.bf16.vlgmr.msra.gmra.mrb[12].mxu0 %v3300_v33  ;;  %v929_v44 = vsel %vm928_vm5, %v4474_v1, %v4502_v35  ;;  %v1082_v61 = vsel %vm962_vm14, %v1077_v59, %v1081_v0 }
 0x2cd   :  { %v835_v42 = vsel %vm832_vm4, %v817_v46, %v819_v26  ;;  %1279 = vmatpush1.bf16.msra.mxu0 %v834_v54  ;;  %1375 = vmatpush1.bf16.msra.mxu1 %v836_v9 }
 0x2ce   :  { %1280 = vmatprep.subr.bf16.mxu0 %v1143_v47  ;;  %3137 = vmatprep.subr.msk.bf16.mxu1 %vm832_vm4, %v4333_v25  ;;  %v1140_v49 = vsel %vm962_vm14, %v835_v42, %v1065_v6  ;;  %v887_v25 = vsel %vm884_vm3, %v4468_v13, %v4424_v53 }
 0x2cf   :  { %v831_v40 = vpop.permute.xlu1 %830  ;;  %1259 = vmatprep.mubr.bf16.mxu0 %v3303_v55  ;;  %v1071_v53 = vrot.slane %v887_v25, 4 }
 0x2d0   :  { %v859_v14 = vsel %vm832_vm4, %v831_v40, 0  ;;  %v917_v2 = vpop.permute.xlu0 %916  ;;  %1377 = vmatmul.mubr.bf16.vlgmr.msra.gmra.mrb[12].mxu1 %v3300_v33  ;;  %v5257_v33 = vmov 0  }
 0x2d1   :  { %1281 = vmatpush1.bf16.msra.mxu0 %v1140_v49  ;;  %1406 = vmatpush1.bf16.msra.mxu1 %v837_v63  ;;  %v1150_v57 = vsel %vm962_vm14, %v859_v14, %v1076_v18  ;;  %v1072_v34 = vsel %vm962_vm14, %v1067_v11, %v1071_v53 }
 0x2d2   :  { %1282 = vmatprep.subr.bf16.mxu0 %v1070_v36  ;;  %1407 = vmatprep.subr.bf16.mxu1 %v1150_v57 }
 0x2d3   :  { %v829_v43 = vpop.permute.xlu1 %828  ;;  %1386 = vmatprep.mubr.bf16.mxu1 %v3303_v55 }
 0x2d4   :  { %v838_v13 = vsel %vm832_vm4, %v829_v43, %v831_v40  ;;  %1260 = vmatmul.mubr.bf16.gmra.mrb[16].mxu0 %v3305_v31  ;;  %v909_v29 = vpop.permute.xlu0 %908 }
 0x2d5   :  { %1283 = vmatpush1.bf16.msra.mxu0 %v1068_v50  ;;  %v1147_v5 = vsel %vm962_vm14, %v838_v13, %v1075_v38  ;;  %1269 = vmatprep.mubr.bf16.mxu0 %v3110_v62 }
 0x2d6   :  { %1284 = vmatprep.subr.bf16.mxu0 %v1074_v3  ;;  %1408 = vmatpush1.bf16.msra.mxu1 %v1147_v5 }
 0x2d7   :  { %v919_v19 = vpop.permute.xlu1 %918  ;;  %1409 = vmatprep.subr.bf16.mxu1 %v1080_v41 }
 0x2d8   :  { %1387 = vmatmul.mubr.bf16.gmra.mrb[16].mxu1 %v3305_v31  ;;  %v921_v12 = vpop.permute.xlu0 %920  ;;  %v932_v15 = vsel %vm928_vm5, %v917_v2, %v919_v19 }
 0x2d9   :  { %1285 = vmatpush1.bf16.msra.mxu0 %v1072_v34  ;;  %1396 = vmatprep.mubr.bf16.mxu1 %v3110_v62 }
 0x2da   :  { %3122 = vmatprep.subr.msk.bf16.mxu0 %vm928_vm5, %v4502_v35  ;;  %1410 = vmatpush1.bf16.msra.mxu1 %v1078_v4 }
 0x2db   :  { %v911_v26 = vpop.permute.xlu1 %910  ;;  %1411 = vmatprep.subr.bf16.mxu1 %v1084_v23 }
 0x2dc   :  { %1270 = vmatmul.mubr.bf16.gmra.mrb[20].mxu0 %v3109_v52  ;;  %v930_v58 = vsel %vm928_vm5, %v909_v29, %v911_v26  ;;  %v913_v24 = vpop.permute.xlu0 %912 }
 0x2dd   :  { %1287 = vmatpush1.bf16.msra.mxu0 %v929_v44  ;;  %1310 = vmatprep.mubr.bf16.mxu0 %v5257_v33 }
 0x2de   :  { %3123 = vmatprep.subr.msk.bf16.mxu0 %vm928_vm5, %v911_v26  ;;  %1412 = vmatpush1.bf16.msra.mxu1 %v1082_v61 }
 0x2df   :  { %v923_v48 = vpop.permute.xlu1 %922  ;;  %3138 = vmatprep.subr.msk.bf16.mxu1 %vm928_vm5, %v919_v19 }
 0x2e0   :  { %1397 = vmatmul.mubr.bf16.gmra.mrb[20].mxu1 %v3109_v52  ;;  %v933_v35 = vsel %vm928_vm5, %v921_v12, %v923_v48  ;;  %v925_v46 = vpop.permute.xlu0 %924 }
 0x2e1   :  { %1289 = vmatpush1.bf16.msra.mxu0 %v930_v58  ;;  %1437 = vmatprep.mubr.bf16.mxu1 %v5257_v33 }
 0x2e2   :  { %1414 = vmatpush1.bf16.msra.mxu1 %v932_v15 }
 0x2e3   :  { %v915_v1 = vpop.permute.xlu1 %914  ;;  %3139 = vmatprep.subr.msk.bf16.mxu1 %vm928_vm5, %v923_v48 }
 0x2e4   :  { %v931_v27 = vsel %vm928_vm5, %v913_v24, %v915_v1  ;;  %v947_v10 = vsel %vm928_vm5, %v915_v1, 0 }
 0x2e5   :  { %v1213_v55 = vsel %vm962_vm14, %v931_v27, 0  ;;  %3124 = vmatprep.subr.msk.bf16.mxu0 %vm962_vm14, %v947_v10 }
 0x2e6   :  { %1291 = vmatpush1.bf16.msra.mxu0 %v1213_v55  ;;  %1416 = vmatpush1.bf16.msra.mxu1 %v933_v35 }
 0x2e7   :  { %v927_v20 = vpop.permute.xlu1 %926 }
 0x2e8   :  { %v934_v54 = vsel %vm928_vm5, %v925_v46, %v927_v20  ;;  %v955_v8 = vsel %vm928_vm5, %v927_v20, 0 }
 0x2e9   :  { %v1340_v9 = vsel %vm962_vm14, %v934_v54, 0  ;;  %3125 = vmatmul.mubr.msk.bf16.vlgmr.msra.gmra.mrb[12].mxu0 %vm1202_vm6, %v3308_v56  ;;  %3140 = vmatprep.subr.msk.bf16.mxu1 %vm962_vm14, %v955_v8 }
 0x2ea   :  { %1418 = vmatpush1.bf16.msra.mxu1 %v1340_v9  ;;  %1320 = vmatprep.mubr.bf16.mxu0 %v5257_v33 }
 0x2ed   :  { %3141 = vmatmul.mubr.msk.bf16.vlgmr.msra.gmra.mrb[12].mxu1 %vm1202_vm6, %v3308_v56 }
 0x2ee   :  { %1447 = vmatprep.mubr.bf16.mxu1 %v5257_v33 }
 0x2f1   :  { %3126 = vmatmul.mubr.msk.bf16.gmra.mrb[16].mxu0 %vm1202_vm6, %v3309_v21 }
 0x2f2   :  { %1330 = vmatprep.mubr.bf16.mxu0 %v5257_v33 }
 0x2f5   :  { %3142 = vmatmul.mubr.msk.bf16.gmra.mrb[16].mxu1 %vm1202_vm6, %v3309_v21 }
 0x2f6   :  { %1457 = vmatprep.mubr.bf16.mxu1 %v5257_v33 }
 0x2f9   :  { %3127 = vmatmul.mubr.msk.bf16.gmra.mrb[20].mxu0 %vm1202_vm6, %v3310_v32 }
 0x2fa   :  { %1762 = vmatprep.mubr.bf16.mxu0 %v5257_v33 }
 0x2fd   :  { %3143 = vmatmul.mubr.msk.bf16.gmra.mrb[20].mxu1 %vm1202_vm6, %v3310_v32 }
 0x2fe   :  { %1861 = vmatprep.mubr.bf16.mxu1 %v5257_v33 }
 0x3bc   :  { %v4604_v28 = vpop.f32.mrb[12].mxu0 }
 0x3bd   :  { %v1501_v42 = vmul.f32 %v4604_v28, %v4604_v28  ;;  %v4608_v47 = vpop.f32.mrb[13].mxu0 }
 0x3be   :  { %v1466_v6 = vadd.f32 %v4608_v47, %v4604_v28  ;;  %v1502_v30 = vmul.f32 %v4608_v47, %v4608_v47  ;;  %v4614_v18 = vpop.f32.mrb[14].mxu0 }
 0x3bf   :  { %v1503_v17 = vmul.f32 %v4614_v18, %v4614_v18  ;;  %v4618_v40 = vpop.f32.mrb[15].mxu0 }
 0x3c0   :  { %v1469_v7 = vadd.f32 %v4618_v40, %v4614_v18  ;;  %v1504_v63 = vmul.f32 %v4618_v40, %v4618_v40  ;;  %v4624_v62 = vpop.f32.mrb[12].mxu1  ;;  %1467 = vadd.xlane.f32.xlu0 %v1466_v6  ;;  %v1521_v60 = vadd.f32 %v1502_v30, %v1501_v42  ;;  %v1927_v6 = vld [vmem:[%s5210_s4 + $0x28] sm:$0xff]  ;;  %v1926_v30 = vld [vmem:[%s5210_s4 + $0x20] sm:$0xff] }
 0x3c1   :  { %v1511_v11 = vmul.f32 %v4624_v62, %v4624_v62  ;;  %v4628_v14 = vpop.f32.mrb[13].mxu1 }
 0x3c2   :  { %v1481_v2 = vadd.f32 %v4628_v14, %v4624_v62  ;;  %v1512_v49 = vmul.f32 %v4628_v14, %v4628_v14  ;;  %v4634_v31 = vpop.f32.mrb[14].mxu1  ;;  %1470 = vadd.xlane.f32.xlu1 %v1469_v7  ;;  %v1524_v22 = vadd.f32 %v1504_v63, %v1503_v17  ;;  %v1928_v17 = vld [vmem:[%s5210_s4 + $0x30] sm:$0xff]  ;;  %v1929_v7 = vld [vmem:[%s5210_s4 + $0x38] sm:$0xff] }
 0x3c3   :  { %v1513_v25 = vmul.f32 %v4634_v31, %v4634_v31  ;;  %v4638_v36 = vpop.f32.mrb[15].mxu1 }
 0x3c4   :  { %v1484_v57 = vadd.f32 %v4638_v36, %v4634_v31  ;;  %v1514_v45 = vmul.f32 %v4638_v36, %v4638_v36  ;;  %1482 = vadd.xlane.f32.xlu0 %v1481_v2  ;;  %v4644_v37 = vpop.f32.mrb[16].mxu0  ;;  %v1536_v38 = vadd.f32 %v1512_v49, %v1511_v11 }
 0x3c5   :  { %v1505_v16 = vmul.f32 %v4644_v37, %v4644_v37  ;;  %v4648_v43 = vpop.f32.mrb[17].mxu0 }
 0x3c6   :  { %v1472_v53 = vadd.f32 %v4648_v43, %v4644_v37  ;;  %v1506_v13 = vmul.f32 %v4648_v43, %v4648_v43  ;;  %1525 = vadd.xlane.f32.xlu1 %v1524_v22  ;;  %v4654_v50 = vpop.f32.mrb[18].mxu0  ;;  %v1539_v59 = vadd.f32 %v1514_v45, %v1513_v25 }
 0x3c7   :  { %v1507_v29 = vmul.f32 %v4654_v50, %v4654_v50  ;;  %v4658_v3 = vpop.f32.mrb[19].mxu0 }
 0x3c8   :  { %v1475_v5 = vadd.f32 %v4658_v3, %v4654_v50  ;;  %v1508_v51 = vmul.f32 %v4658_v3, %v4658_v3  ;;  %v4664_v39 = vpop.f32.mrb[16].mxu1  ;;  %1485 = vadd.xlane.f32.xlu0 %v1484_v57  ;;  %v1527_v41 = vadd.f32 %v1506_v13, %v1505_v16 }
 0x3c9   :  { %v1515_v19 = vmul.f32 %v4664_v39, %v4664_v39  ;;  %v4668_v34 = vpop.f32.mrb[17].mxu1 }
 0x3ca   :  { %v1487_v52 = vadd.f32 %v4668_v34, %v4664_v39  ;;  %v1516_v0 = vmul.f32 %v4668_v34, %v4668_v34  ;;  %v4674_v4 = vpop.f32.mrb[18].mxu1  ;;  %1540 = vadd.xlane.f32.xlu1 %v1539_v59  ;;  %v1530_v23 = vadd.f32 %v1508_v51, %v1507_v29 }
 0x3cb   :  { %v1517_v12 = vmul.f32 %v4674_v4, %v4674_v4  ;;  %v4678_v26 = vpop.f32.mrb[19].mxu1 }
 0x3cc   :  { %v1490_v44 = vadd.f32 %v4678_v26, %v4674_v4  ;;  %v1518_v61 = vmul.f32 %v4678_v26, %v4678_v26  ;;  %1522 = vadd.xlane.f32.xlu0 %v1521_v60  ;;  %v4684_v48 = vpop.f32.mrb[20].mxu0  ;;  %v1542_v58 = vadd.f32 %v1516_v0, %v1515_v19 }
 0x3cd   :  { %v1509_v15 = vmul.f32 %v4684_v48, %v4684_v48  ;;  %v4688_v24 = vpop.f32.mrb[21].mxu0 }
 0x3ce   :  { %v1478_v1 = vadd.f32 %v4688_v24, %v4684_v48  ;;  %v1510_v27 = vmul.f32 %v4688_v24, %v4688_v24  ;;  %1476 = vadd.xlane.f32.xlu1 %v1475_v5  ;;  %v1336_v10 = vpop.f32.mrb[22].mxu0  ;;  %v1545_v35 = vadd.f32 %v1518_v61, %v1517_v12 }
 0x3cf   :  { %v1337_v55 = vpop.f32.mrb[23].mxu0 }
 0x3d0   :  { %v4694_v56 = vpop.f32.mrb[20].mxu1  ;;  %1537 = vadd.xlane.f32.xlu0 %v1536_v38  ;;  %v1533_v46 = vadd.f32 %v1510_v27, %v1509_v15 }
 0x3d1   :  { %v1519_v20 = vmul.f32 %v4694_v56, %v4694_v56  ;;  %v4698_v54 = vpop.f32.mrb[21].mxu1 }
 0x3d2   :  { %v1493_v8 = vadd.f32 %v4698_v54, %v4694_v56  ;;  %v1520_v9 = vmul.f32 %v4698_v54, %v4698_v54  ;;  %v1463_v21 = vpop.f32.mrb[22].mxu1  ;;  %1491 = vadd.xlane.f32.xlu1 %v1490_v44 }
 0x3d3   :  { %v1464_v32 = vpop.f32.mrb[23].mxu1 }
 0x3d4   :  { %1473 = vadd.xlane.f32.xlu0 %v1472_v53  ;;  %v1548_v42 = vadd.f32 %v1520_v9, %v1519_v20 }
 0x3d6   :  { %1531 = vadd.xlane.f32.xlu1 %v1530_v23 }
 0x3d8   :  { %1488 = vadd.xlane.f32.xlu0 %v1487_v52 }
 0x3da   :  { %1546 = vadd.xlane.f32.xlu1 %v1545_v35 }
 0x3dc   :  { %1528 = vadd.xlane.f32.xlu0 %v1527_v41 }
 0x3de   :  { %1494 = vadd.xlane.f32.xlu1 %v1493_v8 }
 0x3e0   :  { %1543 = vadd.xlane.f32.xlu0 %v1542_v58 }
 0x3e2   :  { %1549 = vadd.xlane.f32.xlu1 %v1548_v42 }
 0x3e4   :  { %1479 = vadd.xlane.f32.xlu0 %v1478_v1 }
 0x3e8   :  { %1534 = vadd.xlane.f32.xlu0 %v1533_v46 }
 0x3f3   :  { %1961 = vperm.xlu1 %3296, %v1927_v6  }
 0x3f7   :  { %1966 = vperm.xlu1 %3296, %v1928_v17  }
 0x3fb   :  { %1971 = vperm.xlu1 %3296, %v1929_v7  }
 0x3fe   :  { %1956 = vperm.xlu0 %3295, %v1926_v30  }
 0x44d   :  { %v1468_v63 = vpop.xlane.xlu0 %1467 }
 0x44f   :  { %v1471_v60 = vpop.xlane.xlu1 %1470 }
 0x451   :  { %v1483_v11 = vpop.xlane.xlu0 %1482 }
 0x452   :  { %v1496_v57 = vadd.f32 %v1483_v11, %v1468_v63 }
 0x453   :  { %v1526_v2 = vpop.xlane.xlu1 %1525 }
 0x454   :  { %v1556_v29 = vmul.f32 0.001953125, %v1496_v57 }
 0x455   :  { %v1486_v49 = vpop.xlane.xlu0 %1485 }
 0x456   :  { %v1497_v22 = vadd.f32 %v1486_v49, %v1471_v60  ;;  %v1566_v23 = vmul.f32 %v1556_v29, %v1556_v29 }
 0x457   :  { %v1541_v25 = vpop.xlane.xlu1 %1540 }
 0x458   :  { %v1557_v45 = vmul.f32 0.001953125, %v1497_v22  ;;  %v1552_v38 = vadd.f32 %v1541_v25, %v1526_v2 }
 0x459   :  { %v1523_v16 = vpop.xlane.xlu0 %1522 }
 0x45a   :  { %v1567_v53 = vmul.f32 %v1557_v45, %v1557_v45  ;;  %v1562_v13 = vmul.f32 0.001953125, %v1552_v38  ;;  %v1594_v42 = vsub.f32 %v4618_v40, %v1557_v45  ;;  %v1604_v17 = vsub.f32 %v4638_v36, %v1557_v45 }
 0x45b   :  { %v1477_v59 = vpop.xlane.xlu1 %1476  ;;  %v1593_v60 = vsub.f32 %v4614_v18, %v1557_v45  ;;  %v1603_v22 = vsub.f32 %v4634_v31, %v1557_v45  ;;  %v1592_v38 = vsub.f32 %v4608_v47, %v1556_v29  ;;  %v1591_v18 = vsub.f32 %v4604_v28, %v1556_v29 }
 0x45c   :  { %v1572_v5 = vsub.f32 %v1562_v13, %v1567_v53 }
 0x45d   :  { %v1538_v51 = vpop.xlane.xlu0 %1537 }
 0x45e   :  { %v1577_v41 = vmax.f32 %v1572_v5, 0.0  ;;  %v1551_v19 = vadd.f32 %v1538_v51, %v1523_v16  ;;  %v1602_v5 = vsub.f32 %v4628_v14, %v1556_v29  ;;  %v1601_v51 = vsub.f32 %v4624_v62, %v1556_v29 }
 0x45f   :  { %v1492_v52 = vpop.xlane.xlu1 %1491 }
 0x460   :  { %v1582_v0 = vadd.f32 1e-05, %v1577_v41  ;;  %v1561_v12 = vmul.f32 0.001953125, %v1551_v19  ;;  %v1499_v58 = vadd.f32 %v1492_v52, %v1477_v59 }
 0x461   :  { %v1474_v44 = vpop.xlane.xlu0 %1473 }
 0x462   :  { %3329 = vrsqrt.f32 %v1582_v0  ;;  %v1571_v61 = vsub.f32 %v1561_v12, %v1566_v23  ;;  %v4716_v35 = vmul.f32 0.001953125, %v1499_v58 }
 0x463   :  { %v1532_v15 = vpop.xlane.xlu1 %1531 }
 0x464   :  { %v1576_v1 = vmax.f32 %v1571_v61, 0.0  ;;  %v1569_v9 = vmul.f32 %v4716_v35, %v4716_v35 }
 0x465   :  { %v1489_v27 = vpop.xlane.xlu0 %1488 }
 0x466   :  { %v1581_v10 = vadd.f32 1e-05, %v1576_v1  ;;  %v1498_v55 = vadd.f32 %v1489_v27, %v1474_v44 }
 0x467   :  { %v1547_v46 = vpop.xlane.xlu1 %1546 }
 0x468   :  { %3331 = vrsqrt.f32 %v1581_v10  ;;  %v1554_v20 = vadd.f32 %v1547_v46, %v1532_v15  ;;  %v4720_v32 = vmul.f32 0.001953125, %v1498_v55 }
 0x469   :  { %v1529_v8 = vpop.xlane.xlu0 %1528 }
 0x46a   :  { %v1564_v21 = vmul.f32 0.001953125, %v1554_v20  ;;  %v1568_v57 = vmul.f32 %v4720_v32, %v4720_v32 }
 0x46b   :  { %v1495_v25 = vpop.xlane.xlu1 %1494 }
 0x46c   :  { %v3330_v6 = vpop.eup %3329  ;;  %v1574_v30 = vsub.f32 %v1564_v21, %v1569_v9 }
 0x46d   :  { %v1544_v7 = vpop.xlane.xlu0 %1543  ;;  %v1614_v63 = vmul.f32 %v3330_v6, %v1594_v42  ;;  %v1624_v49 = vmul.f32 %v3330_v6, %v1604_v17  ;;  %v1613_v53 = vmul.f32 %v3330_v6, %v1593_v60  ;;  %v1623_v13 = vmul.f32 %v3330_v6, %v1603_v22 }
 0x46e   :  { %v1579_v11 = vmax.f32 %v1574_v30, 0.0  ;;  %v1553_v2 = vadd.f32 %v1544_v7, %v1529_v8  ;;  %v1598_v17 = vsub.f32 %v4658_v3, %v4716_v35  ;;  %v1597_v60 = vsub.f32 %v4654_v50, %v4716_v35 }
 0x46f   :  { %v1634_v59 = vmax.f32 %v1614_v63, 0.0  ;;  %v1644_v19 = vmax.f32 %v1624_v49, 0.0  ;;  %v1633_v61 = vmax.f32 %v1613_v53, 0.0  ;;  %v1643_v58 = vmax.f32 %v1623_v13, 0.0  ;;  %v1550_v15 = vpop.xlane.xlu1 %1549 }
 0x470   :  { %v1584_v40 = vadd.f32 1e-05, %v1579_v11  ;;  %v1563_v16 = vmul.f32 0.001953125, %v1553_v2  ;;  %v1608_v63 = vsub.f32 %v4678_v26, %v4716_v35  ;;  %v1607_v11 = vsub.f32 %v4674_v4, %v4716_v35 }
 0x471   :  { %v1480_v36 = vpop.xlane.xlu0 %1479  ;;  %v1606_v3 = vsub.f32 %v4668_v34, %v4720_v32  ;;  %v1595_v26 = vsub.f32 %v4644_v37, %v4720_v32  ;;  %v1605_v50 = vsub.f32 %v4664_v39, %v4720_v32 }
 0x472   :  { %v3332_v41 = vpop.eup %3331  ;;  %3333 = vrsqrt.f32 %v1584_v40  ;;  %v1573_v31 = vsub.f32 %v1563_v16, %v1568_v57  ;;  %v1500_v45 = vadd.f32 %v1495_v25, %v1480_v36  ;;  %v1596_v57 = vsub.f32 %v4648_v43, %v4720_v32 }
 0x473   :  { %v1612_v52 = vmul.f32 %v3332_v41, %v1592_v38  ;;  %v1622_v0 = vmul.f32 %v3332_v41, %v1602_v5  ;;  %v1611_v47 = vmul.f32 %v3332_v41, %v1591_v18  ;;  %v1621_v23 = vmul.f32 %v3332_v41, %v1601_v51 }
 0x474   :  { %v1578_v12 = vmax.f32 %v1573_v31, 0.0  ;;  %v4732_v44 = vmul.f32 0.001953125, %v1500_v45 }
 0x475   :  { %v1535_v14 = vpop.xlane.xlu0 %1534  ;;  %v1632_v1 = vmax.f32 %v1612_v52, 0.0  ;;  %v1642_v28 = vmax.f32 %v1622_v0, 0.0  ;;  %v1631_v27 = vmax.f32 %v1611_v47, 0.0  ;;  %v1641_v62 = vmax.f32 %v1621_v23, 0.0 }
 0x476   :  { %v1583_v29 = vadd.f32 1e-05, %v1578_v12  ;;  %v1555_v10 = vadd.f32 %v1550_v15, %v1535_v14  ;;  %v1570_v9 = vmul.f32 %v4732_v44, %v4732_v44  ;;  %v1600_v39 = vsub.f32 %v4688_v24, %v4732_v44 }
 0x477   :  { %v1652_v55 = vpack.c.bf16 %v1634_v59, %v1632_v1  ;;  %v1658_v46 = vpack.c.bf16 %v1644_v19, %v1642_v28  ;;  %v1651_v20 = vpack.c.bf16 %v1633_v61, %v1631_v27  ;;  %v1657_v8 = vpack.c.bf16 %v1643_v58, %v1641_v62  ;;  %v3312_v27 = vld [vmem:[%s5209_s3 + $0x8] sm:$0xff]   ;;  %v3313_v62 = vld [vmem:[%s5209_s3 + $0x10] sm:$0xff]  }
 0x478   :  { %3335 = vrsqrt.f32 %v1583_v29  ;;  %v1565_v21 = vmul.f32 0.001953125, %v1555_v10  ;;  %v1610_v32 = vsub.f32 %v4698_v54, %v4732_v44  ;;  %v1599_v45 = vsub.f32 %v4684_v48, %v4732_v44  ;;  %v3314_v29 = vld [vmem:[%s5209_s3 + $0x18] sm:$0xff]   ;;  %v3315_v10 = vld [vmem:[%s5209_s3 + $0x20] sm:$0xff]  }
 0x479   :  { %1730 = vmatprep.subr.bf16.mxu0 %v1652_v55  ;;  %1829 = vmatprep.subr.bf16.mxu1 %v1658_v46  ;;  %v1609_v19 = vsub.f32 %v4694_v56, %v4732_v44  ;;  %v3311_v44 = vld [vmem:[%s5209_s3] sm:$0xff]   ;;  %v3316_v55 = vld [vmem:[%s5209_s3 + $0x28] sm:$0xff]  }
 0x47a   :  { %v1575_v42 = vsub.f32 %v1565_v21, %v1570_v9  ;;  %1731 = vmatpush1.bf16.msra.mxu0 %v1651_v20  ;;  %1830 = vmatpush1.bf16.msra.mxu1 %v1657_v8 }
 0x47c   :  { %v3334_v6 = vpop.eup %3333  ;;  %v1580_v30 = vmax.f32 %v1575_v42, 0.0 }
 0x47d   :  { %v1618_v2 = vmul.f32 %v3334_v6, %v1598_v17  ;;  %v1628_v49 = vmul.f32 %v3334_v6, %v1608_v63  ;;  %v1617_v22 = vmul.f32 %v3334_v6, %v1597_v60  ;;  %v1627_v25 = vmul.f32 %v3334_v6, %v1607_v11  ;;  %v1962_v17 = vpop.permute.xlu1 %1961 }
 0x47e   :  { %v1585_v7 = vadd.f32 1e-05, %v1580_v30 }
 0x47f   :  { %v1638_v53 = vmax.f32 %v1618_v2, 0.0  ;;  %v1648_v13 = vmax.f32 %v1628_v49, 0.0  ;;  %v1637_v36 = vmax.f32 %v1617_v22, 0.0  ;;  %v1647_v59 = vmax.f32 %v1627_v25, 0.0 }
 0x480   :  { %3337 = vrsqrt.f32 %v1585_v7 }
 0x482   :  { %v3336_v38 = vpop.eup %3335 }
 0x483   :  { %v1616_v40 = vmul.f32 %v3336_v38, %v1596_v57  ;;  %v1626_v4 = vmul.f32 %v3336_v38, %v1606_v3  ;;  %v1615_v35 = vmul.f32 %v3336_v38, %v1595_v26  ;;  %v1625_v16 = vmul.f32 %v3336_v38, %v1605_v50  ;;  %v1957_v57 = vpop.permute.xlu0 %1956  ;;  %v1967_v3 = vpop.permute.xlu1 %1966 }
 0x485   :  { %v1636_v5 = vmax.f32 %v1616_v40, 0.0  ;;  %v1646_v43 = vmax.f32 %v1626_v4, 0.0  ;;  %v1635_v18 = vmax.f32 %v1615_v35, 0.0  ;;  %v1645_v51 = vmax.f32 %v1625_v16, 0.0 }
 0x487   :  { %v1654_v34 = vpack.c.bf16 %v1638_v53, %v1636_v5  ;;  %v1660_v41 = vpack.c.bf16 %v1648_v13, %v1646_v43  ;;  %v1653_v31 = vpack.c.bf16 %v1637_v36, %v1635_v18  ;;  %v1659_v37 = vpack.c.bf16 %v1647_v59, %v1645_v51 }
 0x489   :  { %1732 = vmatprep.subr.bf16.mxu0 %v1654_v34  ;;  %1831 = vmatprep.subr.bf16.mxu1 %v1660_v41 }
 0x48a   :  { %v3338_v52 = vpop.eup %3337  ;;  %1733 = vmatpush1.bf16.msra.mxu0 %v1653_v31  ;;  %1832 = vmatpush1.bf16.msra.mxu1 %v1659_v37 }
 0x48b   :  { %v1620_v0 = vmul.f32 %v3338_v52, %v1600_v39  ;;  %v1630_v47 = vmul.f32 %v3338_v52, %v1610_v32  ;;  %v1619_v23 = vmul.f32 %v3338_v52, %v1599_v45  ;;  %v1629_v12 = vmul.f32 %v3338_v52, %v1609_v19  ;;  %v1972_v19 = vpop.permute.xlu1 %1971 }
 0x48d   :  { %v1640_v61 = vmax.f32 %v1620_v0, 0.0  ;;  %v1650_v24 = vmax.f32 %v1630_v47, 0.0  ;;  %v1639_v58 = vmax.f32 %v1619_v23, 0.0  ;;  %v1649_v15 = vmax.f32 %v1629_v12, 0.0 }
 0x48f   :  { %v1656_v14 = vpack.c.bf16 %v1640_v61, %v1640_v61  ;;  %v1662_v1 = vpack.c.bf16 %v1650_v24, %v1650_v24  ;;  %v1655_v54 = vpack.c.bf16 %v1639_v58, %v1639_v58  ;;  %v1661_v28 = vpack.c.bf16 %v1649_v15, %v1649_v15 }
 0x491   :  { %3150 = vmatprep.subr.msk.bf16.mxu0 %vm962_vm14, %v1656_v14  ;;  %3157 = vmatprep.subr.msk.bf16.mxu1 %vm962_vm14, %v1662_v1  ;;  %v1725_v48 = vsel %vm962_vm14, %v1655_v54, 0  ;;  %v1824_v56 = vsel %vm962_vm14, %v1661_v28, 0 }
 0x492   :  { %1735 = vmatpush1.bf16.msra.mxu0 %v1725_v48  ;;  %1834 = vmatpush1.bf16.msra.mxu1 %v1824_v56 }
 0x495   :  { %3151 = vmatmul.mubr.msk.bf16.vlgmr.msra.gmra.mrb[24].mxu0 %vm1705_vm12, %v3311_v44  ;;  %3158 = vmatmul.mubr.msk.bf16.vlgmr.msra.gmra.mrb[24].mxu1 %vm1705_vm12, %v3311_v44 }
 0x496   :  { %1772 = vmatprep.mubr.bf16.mxu0 %v5257_v33  ;;  %1871 = vmatprep.mubr.bf16.mxu1 %v5257_v33 }
 0x49d   :  { %3152 = vmatmul.mubr.msk.bf16.gmra.mrb[28].mxu0 %vm1705_vm12, %v3312_v27  ;;  %3159 = vmatmul.mubr.msk.bf16.gmra.mrb[28].mxu1 %vm1705_vm12, %v3312_v27 }
 0x49e   :  { %1782 = vmatprep.mubr.bf16.mxu0 %v5257_v33  ;;  %1881 = vmatprep.mubr.bf16.mxu1 %v5257_v33 }
 0x4a5   :  { %3153 = vmatmul.mubr.msk.bf16.gmra.mrb[32].mxu0 %vm1705_vm12, %v3313_v62  ;;  %3160 = vmatmul.mubr.msk.bf16.gmra.mrb[32].mxu1 %vm1705_vm12, %v3313_v62 }
 0x4a6   :  { %1792 = vmatprep.mubr.bf16.mxu0 %v5257_v33  ;;  %1891 = vmatprep.mubr.bf16.mxu1 %v5257_v33 }
 0x4ad   :  { %3154 = vmatmul.mubr.msk.bf16.gmra.mrb[36].mxu0 %vm1705_vm12, %v3314_v29  ;;  %3161 = vmatmul.mubr.msk.bf16.gmra.mrb[36].mxu1 %vm1705_vm12, %v3314_v29 }
 0x4ae   :  { %1802 = vmatprep.mubr.bf16.mxu0 %v5257_v33  ;;  %1901 = vmatprep.mubr.bf16.mxu1 %v5257_v33 }
 0x4b5   :  { %3155 = vmatmul.mubr.msk.bf16.gmra.mrb[40].mxu0 %vm1705_vm12, %v3315_v10  ;;  %3162 = vmatmul.mubr.msk.bf16.gmra.mrb[40].mxu1 %vm1705_vm12, %v3315_v10 }
 0x4b6   :  { %1812 = vmatprep.mubr.bf16.mxu0 %v5257_v33  ;;  %1911 = vmatprep.mubr.bf16.mxu1 %v5257_v33 }
 0x4bd   :  { %3156 = vmatmul.mubr.msk.bf16.gmra.mrb[44].mxu0 %vm1705_vm12, %v3316_v55  ;;  %3163 = vmatmul.mubr.msk.bf16.gmra.mrb[44].mxu1 %vm1705_vm12, %v3316_v55 }
 0x4be   :  { %2295 = vmatprep.mubr.bf16.mxu0 %v5257_v33  ;;  %2336 = vmatprep.mubr.bf16.mxu1 %v5257_v33 }
 0x568   :  { %v4806_v46 = vpop.f32.mrb[24].mxu0  ;;  %v4808_v20 = vpop.f32.mrb[24].mxu1 }
 0x569   :  { %v4810_v8 = vpop.f32.mrb[25].mxu0  ;;  %v4812_v9 = vpop.f32.mrb[25].mxu1 }
 0x56a   :  { %v4814_v21 = vpop.f32.mrb[26].mxu0  ;;  %v4816_v42 = vpop.f32.mrb[26].mxu1 }
 0x56b   :  { %v4818_v6 = vpop.f32.mrb[27].mxu0  ;;  %v4820_v30 = vpop.f32.mrb[27].mxu1 }
 0x570   :  { %v4822_v7 = vpop.f32.mrb[28].mxu0  ;;  %v4824_v63 = vpop.f32.mrb[28].mxu1 }
 0x571   :  { %v4826_v60 = vpop.f32.mrb[29].mxu0  ;;  %v4828_v11 = vpop.f32.mrb[29].mxu1 }
 0x572   :  { %v4830_v2 = vpop.f32.mrb[30].mxu0  ;;  %v4832_v49 = vpop.f32.mrb[30].mxu1 }
 0x573   :  { %v4834_v22 = vpop.f32.mrb[31].mxu0  ;;  %v4836_v25 = vpop.f32.mrb[31].mxu1 }
 0x578   :  { %v1883_v26 = vpop.f32.mrb[32].mxu1  ;;  %v1784_v50 = vpop.f32.mrb[32].mxu0 }
 0x579   :  { %v2026_v38 = vadd.f32 %v1957_v57, %v1883_v26  ;;  %v2002_v40 = vadd.f32 %v1957_v57, %v1784_v50  ;;  %v1786_v4 = vpop.f32.mrb[33].mxu0  ;;  %v1885_v35 = vpop.f32.mrb[33].mxu1 }
 0x57a   :  { %v2003_v16 = vadd.f32 %v1957_v57, %v1786_v4  ;;  %v2027_v53 = vadd.f32 %v1957_v57, %v1885_v35  ;;  %v1788_v13 = vpop.f32.mrb[34].mxu0  ;;  %v1887_v36 = vpop.f32.mrb[34].mxu1 }
 0x57b   :  { %v3188_v59 = vmul.f32 -1.442695, %v2026_v38  ;;  %v3180_v5 = vmul.f32 -1.442695, %v2002_v40  ;;  %v2004_v43 = vadd.f32 %v1962_v17, %v1788_v13  ;;  %v2028_v18 = vadd.f32 %v1962_v17, %v1887_v36  ;;  %v1790_v51 = vpop.f32.mrb[35].mxu0  ;;  %v1889_v34 = vpop.f32.mrb[35].mxu1 }
 0x57c   :  { %v3181_v41 = vmul.f32 -1.442695, %v2003_v16  ;;  %v3189_v31 = vmul.f32 -1.442695, %v2027_v53  ;;  %v2005_v37 = vadd.f32 %v1962_v17, %v1790_v51  ;;  %v2029_v39 = vadd.f32 %v1962_v17, %v1889_v34 }
 0x57d   :  { %3339 = vpow2.f32 %v3188_v59  ;;  %v3182_v32 = vmul.f32 -1.442695, %v2004_v43  ;;  %v3190_v45 = vmul.f32 -1.442695, %v2028_v18 }
 0x57e   :  { %3341 = vpow2.f32 %v3180_v5  ;;  %v3183_v52 = vmul.f32 -1.442695, %v2005_v37  ;;  %v3191_v0 = vmul.f32 -1.442695, %v2029_v39 }
 0x57f   :  { %3343 = vpow2.f32 %v3181_v41 }
 0x580   :  { %3345 = vpow2.f32 %v3189_v31  ;;  %v1794_v47 = vpop.f32.mrb[36].mxu0  ;;  %v1893_v23 = vpop.f32.mrb[36].mxu1 }
 0x581   :  { %3347 = vpow2.f32 %v3182_v32  ;;  %v2006_v12 = vadd.f32 %v1967_v3, %v1794_v47  ;;  %v2030_v61 = vadd.f32 %v1967_v3, %v1893_v23  ;;  %v1796_v24 = vpop.f32.mrb[37].mxu0  ;;  %v1895_v58 = vpop.f32.mrb[37].mxu1 }
 0x582   :  { %3349 = vpow2.f32 %v3190_v45  ;;  %v2007_v15 = vadd.f32 %v1967_v3, %v1796_v24  ;;  %v1798_v14 = vpop.f32.mrb[38].mxu0  ;;  %v1897_v1 = vpop.f32.mrb[38].mxu1  ;;  %v2031_v38 = vadd.f32 %v1967_v3, %v1895_v58  ;;  %v3503_v58 = vld [vmem:[#allocation2 + $0xc0] sm:$0xff] }
 0x583   :  { %3351 = vpow2.f32 %v3183_v52  ;;  %v3184_v54 = vmul.f32 -1.442695, %v2006_v12  ;;  %v3192_v28 = vmul.f32 -1.442695, %v2030_v61  ;;  %v2008_v48 = vadd.f32 %v1972_v19, %v1798_v14  ;;  %v1800_v56 = vpop.f32.mrb[39].mxu0  ;;  %v1899_v44 = vpop.f32.mrb[39].mxu1 }
 0x584   :  { %3353 = vpow2.f32 %v3191_v0  ;;  %v3185_v27 = vmul.f32 -1.442695, %v2007_v15  ;;  %v3193_v5 = vmul.f32 -1.442695, %v2031_v38  ;;  %v2032_v51 = vadd.f32 %v1972_v19, %v1897_v1  ;;  %v4847_v38 = vld [vmem:[#allocation2 + $0xd8] sm:$0xff] }
 0x585   :  { %3355 = vpow2.f32 %v3184_v54  ;;  %v3186_v62 = vmul.f32 -1.442695, %v2008_v48  ;;  %v2009_v3 = vadd.f32 %v1972_v19, %v1800_v56  ;;  %v2033_v31 = vadd.f32 %v1972_v19, %v1899_v44  ;;  %v3504_v19 = vld [vmem:[#allocation2 + $0x40] sm:$0xff]  ;;  %v4838_v54 = vld [vmem:[#allocation2 + $0x50] sm:$0xff]  ;;  %v3506_v56 = vld [vmem:[#allocation2 + $0xc8] sm:$0xff] }
 0x586   :  { %3357 = vpow2.f32 %v3192_v28  ;;  %v3194_v32 = vmul.f32 -1.442695, %v2032_v51 }
 0x587   :  { %v3340_v29 = vpop.eup %3339  ;;  %3359 = vpow2.f32 %v3185_v27  ;;  %v3187_v0 = vmul.f32 -1.442695, %v2009_v3  ;;  %v3195_v23 = vmul.f32 -1.442695, %v2033_v31  ;;  %v4841_v27 = vld [vmem:[#allocation2 + $0xd0] sm:$0xff] }
 0x588   :  { %v3342_v10 = vpop.eup %3341  ;;  %v2194_v55 = vadd.f32 1.0, %v3340_v29  ;;  %3361 = vpow2.f32 %v3186_v62 }
 0x589   :  { %v3344_v17 = vpop.eup %3343  ;;  %v2186_v57 = vadd.f32 1.0, %v3342_v10  ;;  %v3508_v10 = vld [vmem:[#allocation2 + $0x48] sm:$0xff] }
 0x58a   :  { %v3346_v26 = vpop.eup %3345  ;;  %3363 = vrcp.f32 %v2194_v55  ;;  %v2187_v50 = vadd.f32 1.0, %v3344_v17  ;;  %v4844_v17 = vld [vmem:[#allocation2 + $0x58] sm:$0xff] }
 0x58b   :  { %v3348_v40 = vpop.eup %3347  ;;  %3365 = vrcp.f32 %v2186_v57  ;;  %v2195_v4 = vadd.f32 1.0, %v3346_v26 }
 0x58c   :  { %v3350_v35 = vpop.eup %3349  ;;  %3367 = vrcp.f32 %v2187_v50  ;;  %v2188_v16 = vadd.f32 1.0, %v3348_v40 }
 0x58d   :  { %v3352_v53 = vpop.eup %3351  ;;  %3369 = vrcp.f32 %v2195_v4  ;;  %v2196_v13 = vadd.f32 1.0, %v3350_v35 }
 0x58e   :  { %v3354_v36 = vpop.eup %3353  ;;  %3371 = vrcp.f32 %v2188_v16  ;;  %v2189_v59 = vadd.f32 1.0, %v3352_v53 }
 0x58f   :  { %v3356_v43 = vpop.eup %3355  ;;  %3373 = vrcp.f32 %v2196_v13  ;;  %v2197_v18 = vadd.f32 1.0, %v3354_v36 }
 0x590   :  { %3375 = vrcp.f32 %v2189_v59  ;;  %v2190_v34 = vadd.f32 1.0, %v3356_v43  ;;  %v3358_v41 = vpop.eup %3357 }
 0x591   :  { %3377 = vrcp.f32 %v2197_v18  ;;  %v3360_v37 = vpop.eup %3359  ;;  %v2198_v35 = vadd.f32 1.0, %v3358_v41  ;;  %v3511_v18 = vld [vmem:[#allocation2 + $0x60] sm:$0xff] }
 0x592   :  { %3379 = vpow2.f32 %v3193_v5  ;;  %v3362_v39 = vpop.eup %3361  ;;  %v2191_v13 = vadd.f32 1.0, %v3360_v37 }
 0x593   :  { %3381 = vrcp.f32 %v2190_v34  ;;  %v2192_v52 = vadd.f32 1.0, %v3362_v39  ;;  %v3512_v34 = vld [vmem:[#allocation2 + $0x70] sm:$0xff] }
 0x594   :  { %v3364_v45 = vpop.eup %3363 }
 0x595   :  { %v3366_v47 = vpop.eup %3365  ;;  %3383 = vrcp.f32 %v2192_v52  ;;  %v2242_v15 = vmul.f32 %v3503_v58, %v3364_v45  ;;  %v3514_v58 = vld [vmem:[#allocation2 + $0xf0] sm:$0xff] }
 0x596   :  { %v3368_v12 = vpop.eup %3367  ;;  %3385 = vpow2.f32 %v3194_v32  ;;  %v2234_v1 = vmul.f32 %v3504_v19, %v3366_v47  ;;  %v3515_v19 = vld [vmem:[#allocation2 + $0x68] sm:$0xff] }
 0x597   :  { %v3370_v61 = vpop.eup %3369  ;;  %3387 = vpow2.f32 %v3187_v0  ;;  %v2235_v55 = vmul.f32 %v3508_v10, %v3368_v12 }
 0x598   :  { %v3372_v24 = vpop.eup %3371  ;;  %3389 = vpow2.f32 %v3195_v23  ;;  %v2243_v44 = vmul.f32 %v3506_v56, %v3370_v61  ;;  %v3513_v61 = vld [vmem:[#allocation2 + $0xe0] sm:$0xff]  ;;  %v3517_v56 = vld [vmem:[#allocation2 + $0xe8] sm:$0xff] }
 0x599   :  { %v3374_v14 = vpop.eup %3373  ;;  %v2236_v28 = vmul.f32 %v4838_v54, %v3372_v24  ;;  %3391 = vrcp.f32 %v2198_v35 }
 0x59a   :  { %v3376_v48 = vpop.eup %3375  ;;  %v2244_v62 = vmul.f32 %v4841_v27, %v3374_v14  ;;  %3393 = vrcp.f32 %v2191_v13 }
 0x59b   :  { %v3378_v29 = vpop.eup %3377  ;;  %v2237_v57 = vmul.f32 %v4844_v17, %v3376_v48  ;;  %v2250_v26 = vpack.c.bf16 %v2236_v28, %v2234_v1  ;;  %v3516_v28 = vld [vmem:[#allocation2 + $0x78] sm:$0xff] }
 0x59c   :  { %v3380_v50 = vpop.eup %3379  ;;  %v2245_v40 = vmul.f32 %v4847_v38, %v3378_v29  ;;  %v2254_v4 = vpack.c.bf16 %v2244_v62, %v2242_v15  ;;  %v3518_v62 = vld [vmem:[#allocation2 + $0xf8] sm:$0xff] }
 0x59d   :  { %v2251_v16 = vpack.c.bf16 %v2237_v57, %v2235_v55  ;;  %v3382_v53 = vpop.eup %3381  ;;  %v2199_v59 = vadd.f32 1.0, %v3380_v50 }
 0x59e   :  { %v2255_v36 = vpack.c.bf16 %v2245_v40, %v2243_v44  ;;  %v2238_v51 = vmul.f32 %v3511_v18, %v3382_v53 }
 0x59f   :  { %2263 = vmatprep.subr.bf16.mxu0 %v2251_v16  ;;  %v3384_v5 = vpop.eup %3383  ;;  %3395 = vrcp.f32 %v2199_v59 }
 0x5a0   :  { %2304 = vmatprep.subr.bf16.mxu1 %v2255_v36  ;;  %2264 = vmatpush1.bf16.msra.mxu0 %v2250_v26  ;;  %v3386_v43 = vpop.eup %3385  ;;  %v2240_v3 = vmul.f32 %v3512_v34, %v3384_v5  ;;  %v2258_v26 = vld [vmem:[%s5211_s5] sm:$0xf] }
 0x5a1   :  { %2305 = vmatpush1.bf16.msra.mxu1 %v2254_v4  ;;  %v3388_v31 = vpop.eup %3387  ;;  %v2200_v39 = vadd.f32 1.0, %v3386_v43 }
 0x5a2   :  { %v3390_v41 = vpop.eup %3389  ;;  %v2193_v32 = vadd.f32 1.0, %v3388_v31  ;;  %v2252_v37 = vpack.c.bf16 %v2240_v3, %v2238_v51 }
 0x5a3   :  { %3397 = vrcp.f32 %v2200_v39  ;;  %v2201_v45 = vadd.f32 1.0, %v3390_v41  ;;  %v3392_v52 = vpop.eup %3391 }
 0x5a4   :  { %3399 = vrcp.f32 %v2193_v32  ;;  %v3394_v0 = vpop.eup %3393  ;;  %v2246_v24 = vmul.f32 %v3513_v61, %v3392_v52 }
 0x5a5   :  { %3401 = vrcp.f32 %v2201_v45  ;;  %v2239_v1 = vmul.f32 %v3515_v19, %v3394_v0 }
 0x5a9   :  { %v3396_v47 = vpop.eup %3395 }
 0x5aa   :  { %v2247_v44 = vmul.f32 %v3517_v56, %v3396_v47 }
 0x5ad   :  { %v3398_v23 = vpop.eup %3397 }
 0x5ae   :  { %v3400_v12 = vpop.eup %3399  ;;  %v2248_v15 = vmul.f32 %v3514_v58, %v3398_v23 }
 0x5af   :  { %v3402_v14 = vpop.eup %3401  ;;  %v2241_v48 = vmul.f32 %v3516_v28, %v3400_v12 }
 0x5b0   :  { %v2249_v29 = vmul.f32 %v3518_v62, %v3402_v14  ;;  %v2256_v10 = vpack.c.bf16 %v2248_v15, %v2246_v24 }
 0x5b1   :  { %v2253_v55 = vpack.c.bf16 %v2241_v48, %v2239_v1 }
 0x5b2   :  { %v2257_v57 = vpack.c.bf16 %v2249_v29, %v2247_v44 }
 0x5b3   :  { %2265 = vmatprep.subr.bf16.mxu0 %v2253_v55 }
 0x5b4   :  { %2306 = vmatprep.subr.bf16.mxu1 %v2257_v57  ;;  %2266 = vmatpush1.bf16.msra.mxu0 %v2252_v37 }
 0x5b5   :  { %2307 = vmatpush1.bf16.msra.mxu1 %v2256_v10 }
 0x5b7   :  { %3196 = vmatmul.mubr.msk.bf16.vlgmr.msra.gmra.mrb[48].mxu0 %vm2259_vm0, %v2258_v26 }
 0x5b8   :  { %3197 = vmatmul.mubr.msk.bf16.vlgmr.msra.gmra.mrb[48].mxu1 %vm2259_vm0, %v2258_v26  ;;  %2642 = vmatprep.mubr.bf16.mxu0 %v5257_v33 }
 0x5b9   :  { %2688 = vmatprep.mubr.bf16.mxu1 %v5257_v33 }
 0x68a   :  { %v2297_v50 = vpop.f32.mrb[48].mxu0 }
 0x68b   :  { %v2352_v40 = vmul.f32 %v2297_v50, %v2297_v50  ;;  %v2338_v4 = vpop.f32.mrb[48].mxu1  ;;  %v2299_v35 = vpop.f32.mrb[49].mxu0 }
 0x68c   :  { %v2354_v16 = vmul.f32 %v2338_v4, %v2338_v4  ;;  %v2345_v53 = vadd.f32 %v2299_v35, %v2297_v50  ;;  %v2353_v13 = vmul.f32 %v2299_v35, %v2299_v35  ;;  %v2340_v36 = vpop.f32.mrb[49].mxu1  ;;  %v2301_v59 = vpop.f32.mrb[50].mxu0 }
 0x68d   :  { %v2348_v5 = vadd.f32 %v2340_v36, %v2338_v4  ;;  %v2355_v43 = vmul.f32 %v2340_v36, %v2340_v36  ;;  %v2302_v18 = vpop.f32.mrb[51].mxu0  ;;  %v2342_v51 = vpop.f32.mrb[50].mxu1 }
 0x68e   :  { %2346 = vadd.xlane.f32.xlu1 %v2345_v53  ;;  %v2356_v34 = vadd.f32 %v2353_v13, %v2352_v40  ;;  %v2343_v3 = vpop.f32.mrb[51].mxu1 }
 0x68f   :  { %2349 = vadd.xlane.f32.xlu0 %v2348_v5  ;;  %v2359_v31 = vadd.f32 %v2355_v43, %v2354_v16 }
 0x692   :  { %2357 = vadd.xlane.f32.xlu1 %v2356_v34 }
 0x696   :  { %2360 = vadd.xlane.f32.xlu1 %v2359_v31 }
 0x71b   :  { %v2347_v39 = vpop.xlane.xlu1 %2346 }
 0x71c   :  { %v2350_v41 = vpop.xlane.xlu0 %2349 }
 0x71d   :  { %v2351_v32 = vadd.f32 %v2350_v41, %v2347_v39 }
 0x71f   :  { %v2358_v37 = vpop.xlane.xlu1 %2357  ;;  %v2363_v45 = vmul.f32 0.001953125, %v2351_v32 }
 0x721   :  { %v2365_v47 = vmul.f32 %v2363_v45, %v2363_v45  ;;  %v2370_v58 = vsub.f32 %v2297_v50, %v2363_v45  ;;  %v2371_v15 = vsub.f32 %v2299_v35, %v2363_v45  ;;  %v2372_v14 = vsub.f32 %v2338_v4, %v2363_v45 }
 0x722   :  { %v2373_v19 = vsub.f32 %v2340_v36, %v2363_v45 }
 0x723   :  { %v2361_v52 = vpop.xlane.xlu1 %2360 }
 0x724   :  { %v2362_v0 = vadd.f32 %v2361_v52, %v2358_v37 }
 0x726   :  { %v2364_v23 = vmul.f32 0.001953125, %v2362_v0 }
 0x728   :  { %v2366_v12 = vsub.f32 %v2364_v23, %v2365_v47 }
 0x72a   :  { %v2367_v61 = vmax.f32 %v2366_v12, 0.0 }
 0x72c   :  { %v2368_v24 = vadd.f32 1e-05, %v2367_v61 }
 0x72e   :  { %3403 = vrsqrt.f32 %v2368_v24 }
 0x738   :  { %v3404_v1 = vpop.eup %3403 }
 0x739   :  { %v2375_v28 = vmul.f32 %v3404_v1, %v2371_v15  ;;  %v2374_v48 = vmul.f32 %v3404_v1, %v2370_v58  ;;  %v2377_v56 = vmul.f32 %v3404_v1, %v2373_v19  ;;  %v2376_v44 = vmul.f32 %v3404_v1, %v2372_v14 }
 0x73b   :  { %v2379_v62 = vmax.f32 %v2375_v28, 0.0  ;;  %v2378_v29 = vmax.f32 %v2374_v48, 0.0  ;;  %v2381_v57 = vmax.f32 %v2377_v56, 0.0  ;;  %v2380_v26 = vmax.f32 %v2376_v44, 0.0 }
 0x73d   :  { %v4855_v10 = vpack.c.bf16 %v2379_v62, %v2379_v62  ;;  %v4857_v55 = vpack.c.bf16 %v2378_v29, %v2378_v29  ;;  %v4863_v50 = vpack.c.bf16 %v2381_v57, %v2381_v57  ;;  %v4865_v40 = vpack.c.bf16 %v2380_v26, %v2380_v26 }
 0x73f   :  { %2418 = vrot.lane.b32.xlu0 %v4855_v10, %s3621_s24  ;;  %2416 = vrot.lane.b32.xlu1 %v4857_v55, %s3621_s24  ;;  %v2387_v35 = vsel %vm492_vm7, %v4855_v10, 0  ;;  %v2389_v16 = vsel %vm492_vm7, %v4863_v50, 0  ;;  %v2386_v13 = vsel %vm491_vm8, %v4857_v55, 0  ;;  %v2388_v36 = vsel %vm491_vm8, %v4865_v40, 0 }
 0x740   :  { %v2391_v5 = vsel %vm522_vm10, %v4855_v10, 0  ;;  %v2393_v43 = vsel %vm522_vm10, %v4863_v50, 0  ;;  %v2390_v51 = vsel %vm521_vm9, %v4857_v55, 0  ;;  %v2392_v34 = vsel %vm521_vm9, %v4865_v40, 0 }
 0x741   :  { %vm2601_vm7 = vcmask 588800   ;;  %vm2752_vm8 = vcmask 64512  }
 0x743   :  { %2496 = vrot.lane.b32.xlu0 %v4863_v50, %s3628_s16  ;;  %2420 = vrot.lane.b32.xlu1 %v4865_v40, %s3621_s24 }
 0x747   :  { %2494 = vrot.lane.b32.xlu0 %v4865_v40, %s3628_s16  ;;  %2422 = vrot.lane.b32.xlu1 %v4863_v50, %s3621_s24 }
 0x74b   :  { %2400 = vrot.lane.b32.xlu0 %v2387_v35, %s3623_s1  ;;  %2492 = vrot.lane.b32.xlu1 %v4855_v10, %s3628_s16 }
 0x74f   :  { %2404 = vrot.lane.b32.xlu0 %v2389_v16, %s3623_s1  ;;  %2490 = vrot.lane.b32.xlu1 %v4857_v55, %s3628_s16 }
 0x753   :  { %2450 = vrot.lane.b32.xlu0 %v2387_v35, %s3625_s13  ;;  %2398 = vrot.lane.b32.xlu1 %v2386_v13, %s3623_s1 }
 0x757   :  { %2454 = vrot.lane.b32.xlu0 %v2389_v16, %s3625_s13  ;;  %2402 = vrot.lane.b32.xlu1 %v2388_v36, %s3623_s1 }
 0x75b   :  { %2436 = vrot.lane.b32.xlu0 %v2391_v5, %s3624_s12  ;;  %2448 = vrot.lane.b32.xlu1 %v2386_v13, %s3625_s13 }
 0x75f   :  { %2440 = vrot.lane.b32.xlu0 %v2393_v43, %s3624_s12  ;;  %2452 = vrot.lane.b32.xlu1 %v2388_v36, %s3625_s13 }
 0x763   :  { %2468 = vrot.lane.b32.xlu0 %v2393_v43, %s3626_s14  ;;  %2434 = vrot.lane.b32.xlu1 %v2390_v51, %s3624_s12 }
 0x767   :  { %2466 = vrot.lane.b32.xlu0 %v2392_v34, %s3626_s14  ;;  %2438 = vrot.lane.b32.xlu1 %v2392_v34, %s3624_s12 }
 0x76b   :  { %2482 = vrot.lane.b32.xlu0 %v2389_v16, %s3627_s15  ;;  %2464 = vrot.lane.b32.xlu1 %v2391_v5, %s3626_s14 }
 0x76f   :  { %2480 = vrot.lane.b32.xlu0 %v2388_v36, %s3627_s15  ;;  %2462 = vrot.lane.b32.xlu1 %v2390_v51, %s3626_s14  ;;  %s3631_s14 = smov [#allocation5]  }
 0x773   :  { %2506 = vrot.lane.b32.xlu0 %v2391_v5, %s3629_s19  ;;  %2478 = vrot.lane.b32.xlu1 %v2387_v35, %s3627_s15 }
 0x777   :  { %2510 = vrot.lane.b32.xlu0 %v2393_v43, %s3629_s19  ;;  %2476 = vrot.lane.b32.xlu1 %v2386_v13, %s3627_s15  ;;  %s3066_s15 = sshll.u32 %s3631_s14, 4  ;;  %s5169_s15 = int_to_ptr.vmem [resolvable:$true] %s3066_s15 }
 0x77b   :  { %2504 = vrot.lane.b32.xlu1 %v2390_v51, %s3629_s19 }
 0x77f   :  { %2508 = vrot.lane.b32.xlu1 %v2392_v34, %s3629_s19 }
 0x7b1   :  { %v2419_v3 = vpop.permute.xlu0 %2418  ;;  %v2417_v31 = vpop.permute.xlu1 %2416 }
 0x7b2   :  { %v2424_v23 = vsel %vm636_vm13, %v2417_v31, %v2419_v3  ;;  %v2427_v12 = vsel %vm636_vm13, 0, %v2417_v31 }
 0x7b3   :  { %v2520_v61 = vrot.slane %v2427_v12, 4  ;;  %v2521_v24 = vrot.slane %v2424_v23, 4 }
 0x7b5   :  { %v4927_v39 = vpop.permute.xlu0 %2496  ;;  %v2421_v41 = vpop.permute.xlu1 %2420 }
 0x7b6   :  { %v2429_v14 = vsel %vm636_vm13, 0, %v2421_v41 }
 0x7b7   :  { %v2522_v44 = vrot.slane %v2429_v14, 4 }
 0x7b9   :  { %v4929_v32 = vpop.permute.xlu0 %2494  ;;  %v2423_v37 = vpop.permute.xlu1 %2422 }
 0x7ba   :  { %v2425_v19 = vsel %vm636_vm13, %v2421_v41, %v2423_v37 }
 0x7bb   :  { %v2523_v62 = vrot.slane %v2425_v19, 4 }
 0x7bd   :  { %v2401_v45 = vpop.permute.xlu0 %2400  ;;  %v4931_v52 = vpop.permute.xlu1 %2492 }
 0x7c1   :  { %v2405_v0 = vpop.permute.xlu0 %2404  ;;  %v4933_v47 = vpop.permute.xlu1 %2490 }
 0x7c5   :  { %v2451_v58 = vpop.permute.xlu0 %2450  ;;  %v2399_v15 = vpop.permute.xlu1 %2398 }
 0x7c6   :  { %v2406_v1 = vsel %vm571_vm11, %v2399_v15, %v2401_v45  ;;  %v2409_v28 = vsel %vm571_vm11, 0, %v2399_v15 }
 0x7c7   :  { %v2547_v48 = vsel %vm962_vm14, %v2406_v1, %v2521_v24  ;;  %v2543_v56 = vsel %vm962_vm14, %v2409_v28, %v2520_v61 }
 0x7c8   :  { %2610 = vmatprep.subr.bf16.mxu0 %v2547_v48 }
 0x7c9   :  { %v2455_v29 = vpop.permute.xlu0 %2454  ;;  %2611 = vmatpush1.bf16.msra.mxu0 %v2543_v56  ;;  %v2403_v57 = vpop.permute.xlu1 %2402 }
 0x7ca   :  { %v2407_v26 = vsel %vm571_vm11, %v2403_v57, %v2405_v0  ;;  %v2411_v4 = vsel %vm571_vm11, 0, %v2403_v57 }
 0x7cb   :  { %v2554_v35 = vsel %vm962_vm14, %v2407_v26, %v2523_v62  ;;  %v2550_v16 = vsel %vm962_vm14, %v2411_v4, %v2522_v44  ;;  %v2503_v44 = vsel %vm884_vm3, %v4927_v39, 0  ;;  %v2499_v4 = vsel %vm884_vm3, %v4929_v32, %v4927_v39 }
 0x7cc   :  { %2656 = vmatprep.subr.bf16.mxu1 %v2554_v35  ;;  %v2501_v39 = vsel %vm884_vm3, %v4931_v52, 0 }
 0x7cd   :  { %v2437_v53 = vpop.permute.xlu0 %2436  ;;  %2657 = vmatpush1.bf16.msra.mxu1 %v2550_v16  ;;  %v2449_v13 = vpop.permute.xlu1 %2448 }
 0x7ce   :  { %v2456_v5 = vsel %vm744_vm1, %v2449_v13, %v2451_v58  ;;  %v2459_v43 = vsel %vm744_vm1, 0, %v2449_v13 }
 0x7cf   :  { %v2526_v18 = vrot.slane %v2459_v43, 4  ;;  %v2527_v51 = vrot.slane %v2456_v5, 4 }
 0x7d1   :  { %v2441_v36 = vpop.permute.xlu0 %2440  ;;  %v2453_v59 = vpop.permute.xlu1 %2452 }
 0x7d2   :  { %v2457_v34 = vsel %vm744_vm1, %v2453_v59, %v2455_v29  ;;  %v2461_v41 = vsel %vm744_vm1, 0, %v2453_v59  ;;  %v2540_v59 = vrot.slane %v2499_v4, 4 }
 0x7d3   :  { %v2528_v61 = vrot.slane %v2461_v41, 4  ;;  %v2529_v24 = vrot.slane %v2457_v34, 4 }
 0x7d5   :  { %v2469_v3 = vpop.permute.xlu0 %2468  ;;  %v2435_v31 = vpop.permute.xlu1 %2434 }
 0x7d6   :  { %v2475_v37 = vsel %vm788_vm2, %v2469_v3, 0  ;;  %v2442_v45 = vsel %vm692_vm15, %v2435_v31, %v2437_v53  ;;  %v2445_v0 = vsel %vm692_vm15, 0, %v2435_v31  ;;  %v2541_v53 = vrot.slane %v2503_v44, 4 }
 0x7d7   :  { %v2561_v23 = vsel %vm962_vm14, %v2442_v45, %v2527_v51  ;;  %v2557_v12 = vsel %vm962_vm14, %v2445_v0, %v2526_v18  ;;  %v2535_v58 = vrot.slane %v2475_v37, 4  ;;  %v2498_v37 = vsel %vm884_vm3, %v4933_v47, %v4931_v52 }
 0x7d8   :  { %2612 = vmatprep.subr.bf16.mxu0 %v2561_v23  ;;  %v2538_v23 = vrot.slane %v2498_v37, 4  ;;  %v2878_v37 = vld [vmem:[%s5214_s8 + $0x8] sm:$0xff] }
 0x7d9   :  { %v2467_v15 = vpop.permute.xlu0 %2466  ;;  %2613 = vmatpush1.bf16.msra.mxu0 %v2557_v12  ;;  %v2439_v14 = vpop.permute.xlu1 %2438  ;;  %v2584_v26 = vsel %vm962_vm14, %v4863_v50, %v2535_v58 }
 0x7da   :  { %v2471_v19 = vsel %vm788_vm2, %v2467_v15, %v2469_v3  ;;  %v2443_v1 = vsel %vm692_vm15, %v2439_v14, %v2441_v36  ;;  %v2447_v28 = vsel %vm692_vm15, 0, %v2439_v14  ;;  %v2539_v3 = vrot.slane %v2501_v39, 4  ;;  %v1924_v39 = vld [vmem:[%s5210_s4 + $0x10] sm:$0xff] }
 0x7db   :  { %v2568_v48 = vsel %vm962_vm14, %v2443_v1, %v2529_v24  ;;  %v2564_v56 = vsel %vm962_vm14, %v2447_v28, %v2528_v61  ;;  %v2534_v62 = vrot.slane %v2471_v19, 4  ;;  %v2600_v19 = vld [vmem:[%s5212_s6] sm:$0xf] }
 0x7dc   :  { %2658 = vmatprep.subr.bf16.mxu1 %v2568_v48 }
 0x7dd   :  { %v2483_v29 = vpop.permute.xlu0 %2482  ;;  %2659 = vmatpush1.bf16.msra.mxu1 %v2564_v56  ;;  %v2465_v57 = vpop.permute.xlu1 %2464  ;;  %v2580_v36 = vsel %vm962_vm14, %v4865_v40, %v2534_v62 }
 0x7de   :  { %v2489_v35 = vsel %vm832_vm4, %v2483_v29, 0  ;;  %v2473_v16 = vsel %vm788_vm2, %v2465_v57, 0  ;;  %2660 = vmatprep.subr.bf16.mxu1 %v2584_v26 }
 0x7df   :  { %v2533_v13 = vrot.slane %v2473_v16, 4  ;;  %v2598_v18 = vsel %vm962_vm14, %v2489_v35, %v2541_v53 }
 0x7e1   :  { %v2481_v5 = vpop.permute.xlu0 %2480  ;;  %2661 = vmatpush1.bf16.msra.mxu1 %v2580_v36  ;;  %v2463_v43 = vpop.permute.xlu1 %2462  ;;  %v2576_v50 = vsel %vm962_vm14, %v4855_v10, %v2533_v13 }
 0x7e2   :  { %v2485_v32 = vsel %vm832_vm4, %v2481_v5, %v2483_v29  ;;  %v2470_v51 = vsel %vm788_vm2, %v2463_v43, %v2465_v57  ;;  %2614 = vmatprep.subr.bf16.mxu0 %v2576_v50  ;;  %2662 = vmatprep.subr.bf16.mxu1 %v2598_v18  ;;  %v1923_v18 = vld [vmem:[%s5210_s4 + $0x8] sm:$0xff] }
 0x7e3   :  { %v2532_v34 = vrot.slane %v2470_v51, 4  ;;  %v2595_v40 = vsel %vm962_vm14, %v2485_v32, %v2540_v59  ;;  %v1922_v32 = vld [vmem:[%s5210_s4] sm:$0xff] }
 0x7e4   :  { %v1930_v51 = vld [vmem:[%s5210_s4 + $0x40] sm:$0xff] }
 0x7e5   :  { %v2507_v31 = vpop.permute.xlu0 %2506  ;;  %2663 = vmatpush1.bf16.msra.mxu1 %v2595_v40  ;;  %v2479_v41 = vpop.permute.xlu1 %2478  ;;  %v2572_v10 = vsel %vm962_vm14, %v4857_v55, %v2532_v34  ;;  %v1925_v34 = vld [vmem:[%s5210_s4 + $0x18] sm:$0xff]  ;;  %v1932_v40 = vld [vmem:[%s5210_s4 + $0x50] sm:$0xff] }
 0x7e6   :  { %v2487_v45 = vsel %vm832_vm4, %v2479_v41, 0  ;;  %2615 = vmatpush1.bf16.msra.mxu0 %v2572_v10  ;;  %v2515_v15 = vsel %vm928_vm5, %v2507_v31, 0  ;;  %v2879_v10 = vld [vmem:[%s5214_s8 + $0x10] sm:$0xff] }
 0x7e7   :  { %v2591_v0 = vsel %vm962_vm14, %v2487_v45, %v2539_v3  ;;  %v1931_v3 = vld [vmem:[%s5210_s4 + $0x48] sm:$0xff]  ;;  %v2880_v45 = vld [vmem:[%s5214_s8 + $0x18] sm:$0xff] }
 0x7e8   :  { %2616 = vmatprep.subr.bf16.mxu0 %v2591_v0 }
 0x7e9   :  { %v2511_v12 = vpop.permute.xlu0 %2510  ;;  %v2477_v61 = vpop.permute.xlu1 %2476 }
 0x7ea   :  { %v2517_v24 = vsel %vm928_vm5, %v2511_v12, 0  ;;  %v2484_v58 = vsel %vm832_vm4, %v2477_v61, %v2479_v41  ;;  %v1933_v41 = vld [vmem:[%s5210_s4 + $0x58] sm:$0xff] }
 0x7eb   :  { %3200 = vmatprep.subr.msk.bf16.mxu1 %vm962_vm14, %v2517_v24  ;;  %v2588_v55 = vsel %vm962_vm14, %v2484_v58, %v2538_v23 }
 0x7ec   :  { %2617 = vmatpush1.bf16.msra.mxu0 %v2588_v55 }
 0x7ed   :  { %3198 = vmatprep.subr.msk.bf16.mxu0 %vm962_vm14, %v2515_v15  ;;  %v2505_v52 = vpop.permute.xlu1 %2504 }
 0x7ee   :  { %v2512_v47 = vsel %vm928_vm5, %v2505_v52, %v2507_v31  ;;  %v2877_v31 = vld [vmem:[%s5214_s8] sm:$0xff] }
 0x7ef   :  { %v2606_v14 = vsel %vm962_vm14, %v2512_v47, 0 }
 0x7f0   :  { %2619 = vmatpush1.bf16.msra.mxu0 %v2606_v14 }
 0x7f1   :  { %v2509_v1 = vpop.permute.xlu1 %2508 }
 0x7f2   :  { %v2513_v28 = vsel %vm928_vm5, %v2509_v1, %v2511_v12 }
 0x7f3   :  { %v2652_v48 = vsel %vm962_vm14, %v2513_v28, 0  ;;  %3199 = vmatmul.mubr.msk.bf16.vlgmr.msra.gmra.mrb[52].mxu0 %vm2601_vm7, %v2600_v19 }
 0x7f4   :  { %2665 = vmatpush1.bf16.msra.mxu1 %v2652_v48  ;;  %2797 = vmatprep.mubr.bf16.mxu0 %v5257_v33 }
 0x7f7   :  { %3201 = vmatmul.mubr.msk.bf16.vlgmr.msra.gmra.mrb[52].mxu1 %vm2601_vm7, %v2600_v19 }
 0x7f8   :  { %2856 = vmatprep.mubr.bf16.mxu1 %v5257_v33 }
 0x8c6   :  { %v5002_v56 = vpop.f32.mrb[52].mxu0 }
 0x8c7   :  { %v2704_v44 = vmul.f32 %v5002_v56, %v5002_v56  ;;  %v2646_v62 = vpop.f32.mrb[53].mxu0 }
 0x8c8   :  { %v2697_v29 = vadd.f32 %v2646_v62, %v5002_v56  ;;  %v2705_v57 = vmul.f32 %v2646_v62, %v2646_v62  ;;  %v2648_v26 = vpop.f32.mrb[54].mxu0 }
 0x8c9   :  { %v2649_v4 = vpop.f32.mrb[55].mxu0 }
 0x8ca   :  { %v2690_v35 = vpop.f32.mrb[52].mxu1  ;;  %2698 = vadd.xlane.f32.xlu1 %v2697_v29  ;;  %v2708_v16 = vadd.f32 %v2705_v57, %v2704_v44 }
 0x8cb   :  { %v2706_v53 = vmul.f32 %v2690_v35, %v2690_v35  ;;  %v2692_v13 = vpop.f32.mrb[53].mxu1 }
 0x8cc   :  { %v2700_v36 = vadd.f32 %v2692_v13, %v2690_v35  ;;  %v2707_v59 = vmul.f32 %v2692_v13, %v2692_v13  ;;  %v2694_v5 = vpop.f32.mrb[54].mxu1 }
 0x8cd   :  { %v2695_v43 = vpop.f32.mrb[55].mxu1 }
 0x8ce   :  { %2701 = vadd.xlane.f32.xlu0 %v2700_v36  ;;  %v2711_v50 = vadd.f32 %v2707_v59, %v2706_v53 }
 0x8d0   :  { %2712 = vadd.xlane.f32.xlu1 %v2711_v50 }
 0x8d2   :  { %2709 = vadd.xlane.f32.xlu0 %v2708_v16 }
 0x8e1   :  { %1941 = vperm.xlu1 %3296, %v1923_v18  }
 0x8e5   :  { %1946 = vperm.xlu1 %3296, %v1924_v39  }
 0x8e8   :  { %1936 = vperm.xlu0 %3295, %v1922_v32  }
 0x8e9   :  { %1976 = vperm.xlu1 %3296, %v1930_v51  }
 0x8ec   :  { %1951 = vperm.xlu0 %3295, %v1925_v34  }
 0x8ed   :  { %1986 = vperm.xlu1 %3296, %v1932_v40  }
 0x8f0   :  { %1981 = vperm.xlu0 %3295, %v1931_v3  }
 0x8f1   :  { %2883 = vperm.xlu1 %3296, %v2877_v31  }
 0x8f4   :  { %1991 = vperm.xlu0 %3295, %v1933_v41  }
 0x8f5   :  { %2893 = vperm.xlu1 %3296, %v2879_v10  }
 0x8f8   :  { %2888 = vperm.xlu0 %3295, %v2878_v37  }
 0x8fc   :  { %2898 = vperm.xlu0 %3295, %v2880_v45  }
 0x957   :  { %v2699_v0 = vpop.xlane.xlu1 %2698 }
 0x95b   :  { %v2702_v23 = vpop.xlane.xlu0 %2701 }
 0x95c   :  { %v2703_v12 = vadd.f32 %v2702_v23, %v2699_v0 }
 0x95d   :  { %v2713_v24 = vpop.xlane.xlu1 %2712 }
 0x95e   :  { %v2715_v61 = vmul.f32 0.001953125, %v2703_v12 }
 0x95f   :  { %v2710_v58 = vpop.xlane.xlu0 %2709 }
 0x960   :  { %v2714_v55 = vadd.f32 %v2713_v24, %v2710_v58  ;;  %v2717_v52 = vmul.f32 %v2715_v61, %v2715_v61  ;;  %v2723_v1 = vsub.f32 %v2646_v62, %v2715_v61  ;;  %v2725_v28 = vsub.f32 %v2692_v13, %v2715_v61  ;;  %v3318_v13 = vld [vmem:[%s5213_s7 + $0x8] sm:$0xff]  }
 0x961   :  { %v2722_v48 = vsub.f32 %v5002_v56, %v2715_v61  ;;  %v2724_v29 = vsub.f32 %v2690_v35, %v2715_v61  ;;  %v3317_v35 = vld [vmem:[%s5213_s7] sm:$0xff]   ;;  %v1942_v32 = vpop.permute.xlu1 %1941  ;;  %s3630_s7 = smov [#allocation6]  }
 0x962   :  { %v2716_v15 = vmul.f32 0.001953125, %v2714_v55  ;;  %v1996_v51 = vadd.f32 %v1942_v32, %v4814_v21  ;;  %v1997_v34 = vadd.f32 %v1942_v32, %v4818_v6  ;;  %v2020_v40 = vadd.f32 %v1942_v32, %v4816_v42  ;;  %s3078_s13 = sshll.u32 %s3630_s7, 4  ;;  %s3079_s13 = int_to_ptr.vmem [resolvable:$true] %s3078_s13 }
 0x963   :  { %v2021_v31 = vadd.f32 %v1942_v32, %v4820_v30  ;;  %s3569_s16 = scalar_lea.vmem %s3079_s13, 2048  ;;  %p3574_p9 = scmp.lt.s32.totalorder %s3079_s13, %s3079_s13 }
 0x964   :  { %v2718_v47 = vsub.f32 %v2716_v15, %v2717_v52  ;;  %v3166_v41 = vmul.f32 -1.442695, %v1996_v51  ;;  %v3167_v37 = vmul.f32 -1.442695, %v1997_v34  ;;  %v3174_v45 = vmul.f32 -1.442695, %v2020_v40  ;;  %p3570_p8 = scmp.ne.s32.totalorder %s3079_s13, %s3569_s16  ;;  %p3575_p10 = scmp.lt.s32.totalorder %s3569_s16, %s3569_s16 }
 0x965   :  { %v1947_v3 = vpop.permute.xlu1 %1946  ;;  %v3175_v23 = vmul.f32 -1.442695, %v2021_v31 }
 0x966   :  { %v2719_v14 = vmax.f32 %v2718_v47, 0.0  ;;  %v1999_v0 = vadd.f32 %v1947_v3, %v4826_v60  ;;  %v2022_v12 = vadd.f32 %v1947_v3, %v4824_v63  ;;  %v2023_v21 = vadd.f32 %v1947_v3, %v4828_v11  ;;  %p3576_p11 = por %p3575_p10, %p3574_p9 }
 0x967   :  { %v1937_v10 = vpop.permute.xlu0 %1936 }
 0x968   :  { %v2720_v19 = vadd.f32 1e-05, %v2719_v14  ;;  %v1994_v42 = vadd.f32 %v1937_v10, %v4806_v46  ;;  %v3169_v30 = vmul.f32 -1.442695, %v1999_v0  ;;  %v1995_v61 = vadd.f32 %v1937_v10, %v4810_v8  ;;  %p3577_p12 = pnand %p3576_p11, %p3570_p8 }
 0x969   :  { %v2018_v58 = vadd.f32 %v1937_v10, %v4808_v20  ;;  %v3177_v60 = vmul.f32 -1.442695, %v2023_v21  ;;  %v2019_v55 = vadd.f32 %v1937_v10, %v4812_v9 }
 0x96a   :  { %3405 = vrsqrt.f32 %v2720_v19  ;;  %v3164_v63 = vmul.f32 -1.442695, %v1994_v42  ;;  %v3165_v15 = vmul.f32 -1.442695, %v1995_v61 }
 0x96b   :  { %3407 = vpow2.f32 %v3166_v41  ;;  %v1952_v24 = vpop.permute.xlu0 %1951  ;;  %v3172_v52 = vmul.f32 -1.442695, %v2018_v58  ;;  %v3173_v47 = vmul.f32 -1.442695, %v2019_v55 }
 0x96c   :  { %3409 = vpow2.f32 %v3167_v37  ;;  %v2000_v11 = vadd.f32 %v1952_v24, %v4830_v2  ;;  %v2001_v46 = vadd.f32 %v1952_v24, %v4834_v22  ;;  %v2024_v8 = vadd.f32 %v1952_v24, %v4832_v49 }
 0x96d   :  { %3411 = vpow2.f32 %v3174_v45  ;;  %v2025_v14 = vadd.f32 %v1952_v24, %v4836_v25 }
 0x96e   :  { %3413 = vpow2.f32 %v3175_v23  ;;  %v3170_v20 = vmul.f32 -1.442695, %v2000_v11  ;;  %v3171_v9 = vmul.f32 -1.442695, %v2001_v46  ;;  %v3178_v2 = vmul.f32 -1.442695, %v2024_v8 }
 0x96f   :  { %v1982_v32 = vpop.permute.xlu0 %1981 }
 0x973   :  { %v5080_v21 = vpop.permute.xlu0 %1991 }
 0x974   :  { %v3406_v44 = vpop.eup %3405 }
 0x975   :  { %v2727_v57 = vmul.f32 %v3406_v44, %v2723_v1  ;;  %v2729_v26 = vmul.f32 %v3406_v44, %v2725_v28  ;;  %v2726_v4 = vmul.f32 %v3406_v44, %v2722_v48  ;;  %v2728_v16 = vmul.f32 %v3406_v44, %v2724_v29  ;;  %v3408_v19 = vpop.eup %3407 }
 0x976   :  { %v3410_v1 = vpop.eup %3409  ;;  %v3179_v48 = vmul.f32 -1.442695, %v2025_v14  ;;  %v2092_v44 = vadd.f32 1.0, %v3408_v19 }
 0x977   :  { %v2731_v53 = vmax.f32 %v2727_v57, 0.0  ;;  %v2733_v36 = vmax.f32 %v2729_v26, 0.0  ;;  %v2730_v59 = vmax.f32 %v2726_v4, 0.0  ;;  %v2732_v5 = vmax.f32 %v2728_v16, 0.0  ;;  %v3412_v28 = vpop.eup %3411 }
 0x978   :  { %v3414_v22 = vpop.eup %3413  ;;  %v2093_v29 = vadd.f32 1.0, %v3410_v1  ;;  %v2100_v57 = vadd.f32 1.0, %v3412_v28 }
 0x979   :  { %v2735_v43 = vpack.c.bf16 %v2731_v53, %v2731_v53  ;;  %v2737_v50 = vpack.c.bf16 %v2733_v36, %v2733_v36  ;;  %v2734_v18 = vpack.c.bf16 %v2730_v59, %v2730_v59  ;;  %v2736_v39 = vpack.c.bf16 %v2732_v5, %v2732_v5  ;;  %v1977_v36 = vpop.permute.xlu1 %1976 }
 0x97a   :  { %v2101_v26 = vadd.f32 1.0, %v3414_v22 }
 0x97b   :  { %3204 = vmatprep.subr.msk.bf16.mxu0 %vm962_vm14, %v2735_v43  ;;  %3207 = vmatprep.subr.msk.bf16.mxu1 %vm962_vm14, %v2737_v50  ;;  %v2760_v56 = vsel %vm962_vm14, %v2734_v18, 0  ;;  %v2819_v62 = vsel %vm962_vm14, %v2736_v39, 0 }
 0x97c   :  { %2766 = vmatpush1.bf16.msra.mxu0 %v2760_v56  ;;  %2825 = vmatpush1.bf16.msra.mxu1 %v2819_v62 }
 0x97d   :  { %v5072_v40 = vpop.permute.xlu1 %1986 }
 0x97f   :  { %3205 = vmatmul.mubr.msk.bf16.vlgmr.msra.gmra.mrb[40].mxu0 %vm2752_vm8, %v3317_v35  ;;  %3208 = vmatmul.mubr.msk.bf16.vlgmr.msra.gmra.mrb[40].mxu1 %vm2752_vm8, %v3317_v35 }
 0x980   :  { %2807 = vmatprep.mubr.bf16.mxu0 %v5257_v33  ;;  %2866 = vmatprep.mubr.bf16.mxu1 %v5257_v33  ;;  %v1998_v33 = vadd.f32 %v1947_v3, %v4822_v7  ;;  %v3176_v7 = vmul.f32 -1.442695, %v2022_v12 }
 0x981   :  { %v2884_v42 = vpop.permute.xlu1 %2883 }
 0x982   :  { %v3168_v6 = vmul.f32 -1.442695, %v1998_v33 }
 0x984   :  { %3415 = vpow2.f32 %v3168_v6 }
 0x985   :  { %3417 = vpow2.f32 %v3169_v30 }
 0x986   :  { %3419 = vpow2.f32 %v3176_v7 }
 0x987   :  { %3206 = vmatmul.mubr.msk.bf16.gmra.mrb[44].mxu0 %vm2752_vm8, %v3318_v13  ;;  %3209 = vmatmul.mubr.msk.bf16.gmra.mrb[44].mxu1 %vm2752_vm8, %v3318_v13  ;;  %3421 = vpow2.f32 %v3177_v60 }
 0x988   :  { %3423 = vpow2.f32 %v3164_v63 }
 0x989   :  { %3425 = vpow2.f32 %v3165_v15 }
 0x98a   :  { %3427 = vpow2.f32 %v3172_v52 }
 0x98b   :  { %3429 = vpow2.f32 %v3173_v47 }
 0x98c   :  { %3431 = vpow2.f32 %v3170_v20 }
 0x98d   :  { %3433 = vpow2.f32 %v3171_v9 }
 0x98e   :  { %v3416_v49 = vpop.eup %3415  ;;  %3435 = vpow2.f32 %v3178_v2 }
 0x98f   :  { %v3418_v25 = vpop.eup %3417  ;;  %3437 = vpow2.f32 %v3179_v48  ;;  %v2094_v53 = vadd.f32 1.0, %v3416_v49 }
 0x990   :  { %v3420_v4 = vpop.eup %3419  ;;  %3439 = vrcp.f32 %v2092_v44  ;;  %v2095_v5 = vadd.f32 1.0, %v3418_v25 }
 0x991   :  { %v3422_v16 = vpop.eup %3421  ;;  %3441 = vrcp.f32 %v2093_v29  ;;  %v2102_v50 = vadd.f32 1.0, %v3420_v4  ;;  %v2889_v29 = vpop.permute.xlu0 %2888 }
 0x992   :  { %v3424_v59 = vpop.eup %3423  ;;  %3443 = vrcp.f32 %v2100_v57  ;;  %v2103_v39 = vadd.f32 1.0, %v3422_v16 }
 0x993   :  { %v3426_v43 = vpop.eup %3425  ;;  %3445 = vrcp.f32 %v2101_v26  ;;  %v2090_v62 = vadd.f32 1.0, %v3424_v59 }
 0x994   :  { %v3428_v18 = vpop.eup %3427  ;;  %3447 = vrcp.f32 %v2094_v53  ;;  %v2091_v13 = vadd.f32 1.0, %v3426_v43 }
 0x995   :  { %v3430_v56 = vpop.eup %3429  ;;  %3449 = vrcp.f32 %v2095_v5  ;;  %v2098_v34 = vadd.f32 1.0, %v3428_v18 }
 0x996   :  { %v3432_v35 = vpop.eup %3431  ;;  %3451 = vrcp.f32 %v2102_v50  ;;  %v2099_v31 = vadd.f32 1.0, %v3430_v56  ;;  %v2894_v50 = vpop.permute.xlu1 %2893 }
 0x997   :  { %v3434_v51 = vpop.eup %3433  ;;  %3453 = vrcp.f32 %v2103_v39  ;;  %v2096_v10 = vadd.f32 1.0, %v3432_v35 }
 0x998   :  { %v3436_v3 = vpop.eup %3435  ;;  %3455 = vrcp.f32 %v2090_v62  ;;  %v2097_v33 = vadd.f32 1.0, %v3434_v51 }
 0x999   :  { %v3438_v41 = vpop.eup %3437  ;;  %3457 = vrcp.f32 %v2091_v13  ;;  %v2104_v0 = vadd.f32 1.0, %v3436_v3 }
 0x99a   :  { %v5074_v37 = vpop.eup %3439  ;;  %3459 = vrcp.f32 %v2098_v34  ;;  %v2105_v12 = vadd.f32 1.0, %v3438_v41 }
 0x99b   :  { %v5076_v45 = vpop.eup %3441  ;;  %3461 = vrcp.f32 %v2099_v31  ;;  %v2951_v24 = vsub.f32 1.0, %v5074_v37 }
 0x99c   :  { %v5078_v23 = vpop.eup %3443  ;;  %3463 = vrcp.f32 %v2096_v10  ;;  %v2952_v7 = vsub.f32 1.0, %v5076_v45 }
 0x99d   :  { %v5082_v6 = vpop.eup %3445  ;;  %3465 = vrcp.f32 %v2097_v33  ;;  %v2959_v15 = vsub.f32 1.0, %v5078_v23 }
 0x99e   :  { %v5086_v58 = vpop.eup %3447  ;;  %3467 = vrcp.f32 %v2104_v0  ;;  %v2960_v20 = vsub.f32 1.0, %v5082_v6  ;;  %v5104_v5 = vmul.f32 %v4844_v17, %v2952_v7 }
 0x99f   :  { %v5089_v46 = vpop.eup %3449  ;;  %3469 = vrcp.f32 %v2105_v12  ;;  %v5109_v18 = vmul.f32 %v4841_v27, %v2959_v15  ;;  %v2953_v13 = vsub.f32 1.0, %v5086_v58 }
 0x9a0   :  { %v5092_v19 = vpop.eup %3451  ;;  %v5112_v56 = vmul.f32 %v4847_v38, %v2960_v20 }
 0x9a1   :  { %v5094_v44 = vpop.eup %3453 }
 0x9a2   :  { %v5096_v4 = vpop.eup %3455 }
 0x9a3   :  { %v5098_v53 = vpop.eup %3457  ;;  %v2949_v34 = vsub.f32 1.0, %v5096_v4 }
 0x9a4   :  { %v5106_v43 = vpop.eup %3459  ;;  %v2950_v20 = vsub.f32 1.0, %v5098_v53 }
 0x9a5   :  { %v5114_v62 = vpop.eup %3461  ;;  %v2957_v10 = vsub.f32 1.0, %v5106_v43 }
 0x9a6   :  { %v5118_v51 = vpop.eup %3463 }
 0x9a7   :  { %v5123_v41 = vpop.eup %3465 }
 0xa52   :  { %v2799_v30 = vpop.f32.mrb[40].mxu0  ;;  %v2858_v61 = vpop.f32.mrb[40].mxu1 }
 0xa53   :  { %v3210_v60 = vadd.f32 %v2799_v30, %v1977_v36  ;;  %v3226_v55 = vadd.f32 %v2858_v61, %v1977_v36  ;;  %v2801_v63 = vpop.f32.mrb[41].mxu0  ;;  %v2860_v11 = vpop.f32.mrb[41].mxu1 }
 0xa54   :  { %v3212_v52 = vadd.f32 %v2801_v63, %v1977_v36  ;;  %v3228_v8 = vadd.f32 %v2860_v11, %v1977_v36  ;;  %v2803_v47 = vpop.f32.mrb[42].mxu0  ;;  %v2862_v14 = vpop.f32.mrb[42].mxu1  ;;  %v5101_v36 = vmul.f32 %v4838_v54, %v2951_v24 }
 0xa55   :  { %v3211_v9 = vadd.f32 %v3210_v60, %v2884_v42  ;;  %v3227_v1 = vadd.f32 %v3226_v55, %v2884_v42  ;;  %v3214_v2 = vadd.f32 %v2803_v47, %v1982_v32  ;;  %v3230_v28 = vadd.f32 %v2862_v14, %v1982_v32  ;;  %v2805_v48 = vpop.f32.mrb[43].mxu0  ;;  %v2864_v22 = vpop.f32.mrb[43].mxu1 }
 0xa56   :  { %v3213_v49 = vadd.f32 %v3212_v52, %v2884_v42  ;;  %v3229_v57 = vadd.f32 %v3228_v8, %v2884_v42  ;;  %v3216_v25 = vadd.f32 %v2805_v48, %v1982_v32  ;;  %v3232_v26 = vadd.f32 %v2864_v22, %v1982_v32  ;;  %v5128_v30 = vpop.eup %3467  ;;  %v2899_v11 = vpop.permute.xlu0 %2898 }
 0xa57   :  { %3471 = vtanh.f32 %v3211_v9  ;;  %v3215_v16 = vadd.f32 %v3214_v2, %v2889_v29  ;;  %v3231_v59 = vadd.f32 %v3230_v28, %v2889_v29  ;;  %v2954_v32 = vsub.f32 1.0, %v5089_v46  ;;  %v5131_v63 = vpop.eup %3469  ;;  %v3519_v9 = vld [vmem:[#allocation2 + $0x60] sm:$0xff] }
 0xa58   :  { %3473 = vtanh.f32 %v3227_v1  ;;  %v3217_v39 = vadd.f32 %v3216_v25, %v2889_v29  ;;  %v3233_v54 = vadd.f32 %v3232_v26, %v2889_v29  ;;  %v5137_v1 = vmul.f32 %v3519_v9, %v2953_v13 }
 0xa59   :  { %3475 = vtanh.f32 %v3213_v49  ;;  %v2958_v48 = vsub.f32 1.0, %v5114_v62  ;;  %v2961_v22 = vsub.f32 1.0, %v5092_v19 }
 0xa5a   :  { %3477 = vtanh.f32 %v3229_v57  ;;  %v2809_v35 = vpop.f32.mrb[44].mxu0  ;;  %v2868_v17 = vpop.f32.mrb[44].mxu1  ;;  %v3520_v57 = vld [vmem:[#allocation2 + $0x40] sm:$0xff] }
 0xa5b   :  { %3479 = vtanh.f32 %v3215_v16  ;;  %v3218_v27 = vadd.f32 %v2809_v35, %v5072_v40  ;;  %v3234_v38 = vadd.f32 %v2868_v17, %v5072_v40  ;;  %v2811_v3 = vpop.f32.mrb[45].mxu0  ;;  %v2870_v31 = vpop.f32.mrb[45].mxu1  ;;  %v2965_v25 = vmul.f32 %v3520_v57, %v2949_v34  ;;  %v3522_v17 = vld [vmem:[#allocation2 + $0x48] sm:$0xff] }
 0xa5c   :  { %3481 = vtanh.f32 %v3231_v59  ;;  %v3220_v33 = vadd.f32 %v2811_v3, %v5072_v40  ;;  %v3236_v0 = vadd.f32 %v2870_v31, %v5072_v40  ;;  %v2813_v12 = vpop.f32.mrb[46].mxu0  ;;  %v2872_v42 = vpop.f32.mrb[46].mxu1  ;;  %v3521_v59 = vld [vmem:[#allocation2 + $0xc0] sm:$0xff] }
 0xa5d   :  { %3483 = vtanh.f32 %v3217_v39  ;;  %v3219_v61 = vadd.f32 %v3218_v27, %v2894_v50  ;;  %v3235_v24 = vadd.f32 %v3234_v38, %v2894_v50  ;;  %v3222_v7 = vadd.f32 %v2813_v12, %v5080_v21  ;;  %v2815_v60 = vpop.f32.mrb[47].mxu0  ;;  %v2874_v55 = vpop.f32.mrb[47].mxu1 }
 0xa5e   :  { %3485 = vtanh.f32 %v3233_v54  ;;  %v3221_v15 = vadd.f32 %v3220_v33, %v2894_v50  ;;  %v3237_v52 = vadd.f32 %v3236_v0, %v2894_v50  ;;  %v3238_v8 = vadd.f32 %v2872_v42, %v5080_v21  ;;  %v3524_v0 = vld [vmem:[#allocation2] sm:$0xff] }
 0xa5f   :  { %3487 = vtanh.f32 %v3219_v61  ;;  %v3223_v40 = vadd.f32 %v3222_v7, %v2899_v11  ;;  %v3224_v47 = vadd.f32 %v2815_v60, %v5080_v21  ;;  %v3240_v14 = vadd.f32 %v2874_v55, %v5080_v21  ;;  %v3526_v55 = vld [vmem:[#allocation2 + $0x68] sm:$0xff] }
 0xa60   :  { %3489 = vtanh.f32 %v3235_v24  ;;  %v3239_v2 = vadd.f32 %v3238_v8, %v2899_v11  ;;  %v2973_v50 = vmul.f32 %v3521_v59, %v2957_v10  ;;  %v2962_v54 = vsub.f32 1.0, %v5094_v44  ;;  %v3525_v24 = vld [vmem:[#allocation2 + $0x80] sm:$0xff]  ;;  %v3533_v59 = vld [vmem:[#allocation2 + $0x18] sm:$0xff] }
 0xa61   :  { %v3472_v28 = vpop.eup %3471  ;;  %3491 = vtanh.f32 %v3221_v15  ;;  %v3225_v29 = vadd.f32 %v3224_v47, %v2899_v11  ;;  %v3241_v21 = vadd.f32 %v3240_v14, %v2899_v11  ;;  %v2966_v27 = vmul.f32 %v3522_v17, %v2950_v20  ;;  %v3527_v15 = vld [vmem:[#allocation2 + $0x8] sm:$0xff] }
 0xa62   :  { %v3474_v49 = vpop.eup %3473  ;;  %v2981_v26 = vmul.f32 %v3472_v28, %v5096_v4  ;;  %3493 = vtanh.f32 %v3237_v52  ;;  %v3523_v4 = vld [vmem:[#allocation2 + $0xc8] sm:$0xff]  ;;  %v2964_v17 = vsub.f32 1.0, %v5131_v63 }
 0xa63   :  { %v3476_v16 = vpop.eup %3475  ;;  %v2989_v39 = vmul.f32 %v3474_v49, %v5106_v43  ;;  %3495 = vtanh.f32 %v3223_v40  ;;  %v2974_v31 = vmul.f32 %v3523_v4, %v2958_v48  ;;  %v3528_v40 = vld [vmem:[#allocation2 + $0xe0] sm:$0xff]  ;;  %v3529_v20 = vld [vmem:[#allocation2 + $0x88] sm:$0xff] }
 0xa64   :  { %v3478_v35 = vpop.eup %3477  ;;  %v2997_v13 = vadd.f32 %v2981_v26, %v2965_v25  ;;  %v2982_v38 = vmul.f32 %v3476_v16, %v5098_v53  ;;  %3497 = vtanh.f32 %v3239_v2  ;;  %v2977_v47 = vmul.f32 %v3528_v40, %v2961_v22  ;;  %v3530_v2 = vld [vmem:[#allocation2 + $0xe8] sm:$0xff]  ;;  %v3532_v25 = vld [vmem:[#allocation2 + $0x90] sm:$0xff] }
 0xa65   :  { %v3480_v34 = vpop.eup %3479  ;;  %v3005_v3 = vadd.f32 %v2989_v39, %v2973_v50  ;;  %v2990_v33 = vmul.f32 %v3478_v35, %v5114_v62  ;;  %3499 = vtanh.f32 %v3225_v29  ;;  %v2970_v62 = vmul.f32 %v3526_v55, %v2954_v32  ;;  %v3531_v29 = vld [vmem:[#allocation2 + $0x10] sm:$0xff]  ;;  %v3534_v35 = vld [vmem:[#allocation2 + $0x98] sm:$0xff]  ;;  %v3541_v55 = vld [vmem:[#allocation2 + $0xa8] sm:$0xff] }
 0xa66   :  { %v3482_v10 = vpop.eup %3481  ;;  %v3013_v43 = vadd.f32 %v3524_v0, %v2997_v13  ;;  %3045 = vst [vmem:[#allocation6] sm:$0xff] %v2997_v13  ;;  %v2998_v12 = vadd.f32 %v2982_v38, %v2966_v27  ;;  %v2983_v42 = vmul.f32 %v3480_v34, %v5074_v37  ;;  %3501 = vtanh.f32 %v3241_v21  ;;  %v3535_v38 = vld [vmem:[#allocation2 + $0x20] sm:$0xff] }
 0xa67   :  { %v3484_v61 = vpop.eup %3483  ;;  %v3021_v7 = vadd.f32 %v3525_v24, %v3005_v3  ;;  %3053 = vst [vmem:[#allocation6 + $0x40] sm:$0xff] %v3005_v3  ;;  %v3006_v53 = vadd.f32 %v2990_v33, %v2974_v31  ;;  %v2991_v60 = vmul.f32 %v3482_v10, %v5078_v23  ;;  %v2978_v28 = vmul.f32 %v3530_v2, %v2962_v54  ;;  %v3536_v3 = vld [vmem:[#allocation2 + $0x70] sm:$0xff]  ;;  %v3537_v33 = vld [vmem:[#allocation2 + $0xa0] sm:$0xff] }
 0xa68   :  { %v3486_v11 = vpop.eup %3485  ;;  %3029 = vst [vmem:[#allocation5] sm:$0xff] %v3013_v43  ;;  %v3014_v52 = vadd.f32 %v3527_v15, %v2998_v12  ;;  %3046 = vst [vmem:[#allocation6 + $0x8] sm:$0xff] %v2998_v12  ;;  %v2999_v8 = vadd.f32 %v2983_v42, %v5101_v36  ;;  %v2984_v37 = vmul.f32 %v3484_v61, %v5076_v45  ;;  %v2955_v22 = vsub.f32 1.0, %v5118_v51  ;;  %v3538_v43 = vld [vmem:[#allocation2 + $0xf0] sm:$0xff]  ;;  %v3539_v61 = vld [vmem:[#allocation2 + $0x28] sm:$0xff] }
 0xa69   :  { %v3488_v14 = vpop.eup %3487  ;;  %3037 = vst [vmem:[#allocation5 + $0x40] sm:$0xff] %v3021_v7  ;;  %v3022_v9 = vadd.f32 %v3529_v20, %v3006_v53  ;;  %3054 = vst [vmem:[#allocation6 + $0x48] sm:$0xff] %v3006_v53  ;;  %v3007_v23 = vadd.f32 %v2991_v60, %v5109_v18  ;;  %v2992_v32 = vmul.f32 %v3486_v11, %v5082_v6  ;;  %v2963_v21 = vsub.f32 1.0, %v5128_v30  ;;  %v3540_v53 = vld [vmem:[#allocation2 + $0x78] sm:$0xff] }
 0xa6a   :  { %v3490_v48 = vpop.eup %3489  ;;  %3030 = vst [vmem:[#allocation5 + $0x8] sm:$0xff] %v3014_v52  ;;  %v3015_v49 = vadd.f32 %v3531_v29, %v2999_v8  ;;  %3047 = vst [vmem:[#allocation6 + $0x10] sm:$0xff] %v2999_v8  ;;  %v3000_v45 = vadd.f32 %v2984_v37, %v5104_v5  ;;  %v2985_v36 = vmul.f32 %v3488_v14, %v5086_v58  ;;  %v2956_v39 = vsub.f32 1.0, %v5123_v41  ;;  %v3542_v15 = vld [vmem:[#allocation2 + $0xf8] sm:$0xff]  ;;  %v3543_v8 = vld [vmem:[#allocation2 + $0x30] sm:$0xff] }
 0xa6b   :  { %v3492_v57 = vpop.eup %3491  ;;  %3038 = vst [vmem:[#allocation5 + $0x48] sm:$0xff] %v3022_v9  ;;  %v3023_v26 = vadd.f32 %v3532_v25, %v3007_v23  ;;  %3055 = vst [vmem:[#allocation6 + $0x50] sm:$0xff] %v3007_v23  ;;  %v3008_v6 = vadd.f32 %v2992_v32, %v5112_v56  ;;  %v2993_v18 = vmul.f32 %v3490_v48, %v5092_v19  ;;  %v3545_v20 = vld [vmem:[#allocation2 + $0x38] sm:$0xff] }
 0xa6c   :  { %v3494_v16 = vpop.eup %3493  ;;  %3031 = vst [vmem:[#allocation5 + $0x10] sm:$0xff] %v3015_v49  ;;  %v3016_v50 = vadd.f32 %v3533_v59, %v3000_v45  ;;  %3048 = vst [vmem:[#allocation6 + $0x18] sm:$0xff] %v3000_v45  ;;  %v3001_v58 = vadd.f32 %v2985_v36, %v5137_v1  ;;  %v2986_v5 = vmul.f32 %v3492_v57, %v5089_v46  ;;  %v3546_v23 = vld [vmem:[#allocation2 + $0xb8] sm:$0xff] }
 0xa6d   :  { %v3496_v54 = vpop.eup %3495  ;;  %3039 = vst [vmem:[#allocation5 + $0x50] sm:$0xff] %v3023_v26  ;;  %v3024_v13 = vadd.f32 %v3534_v35, %v3008_v6  ;;  %3056 = vst [vmem:[#allocation6 + $0x58] sm:$0xff] %v3008_v6  ;;  %v3009_v56 = vadd.f32 %v2993_v18, %v2977_v47  ;;  %v2994_v19 = vmul.f32 %v3494_v16, %v5094_v44 }
 0xa6e   :  { %v3498_v27 = vpop.eup %3497  ;;  %3032 = vst [vmem:[#allocation5 + $0x18] sm:$0xff] %v3016_v50  ;;  %v3017_v34 = vadd.f32 %v3535_v38, %v3001_v58  ;;  %3049 = vst [vmem:[#allocation6 + $0x20] sm:$0xff] %v3001_v58  ;;  %v3002_v1 = vadd.f32 %v2986_v5, %v2970_v62  ;;  %v2971_v46 = vmul.f32 %v3536_v3, %v2955_v22 }
 0xa6f   :  { %v2987_v4 = vmul.f32 %v3496_v54, %v5118_v51  ;;  %v3500_v31 = vpop.eup %3499  ;;  %3040 = vst [vmem:[#allocation5 + $0x58] sm:$0xff] %v3024_v13  ;;  %v3025_v10 = vadd.f32 %v3537_v33, %v3009_v56  ;;  %3057 = vst [vmem:[#allocation6 + $0x60] sm:$0xff] %v3009_v56  ;;  %v3010_v0 = vadd.f32 %v2994_v19, %v2978_v28 }
 0xa70   :  { %v2979_v44 = vmul.f32 %v3538_v43, %v2963_v21  ;;  %v2995_v12 = vmul.f32 %v3498_v27, %v5128_v30  ;;  %v3502_v42 = vpop.eup %3501  ;;  %3033 = vst [vmem:[#allocation5 + $0x20] sm:$0xff] %v3017_v34  ;;  %v3018_v24 = vadd.f32 %v3539_v61, %v3002_v1  ;;  %3050 = vst [vmem:[#allocation6 + $0x28] sm:$0xff] %v3002_v1 }
 0xa71   :  { %v3003_v7 = vadd.f32 %v2987_v4, %v2971_v46  ;;  %v2972_v60 = vmul.f32 %v3540_v53, %v2956_v39  ;;  %v2988_v51 = vmul.f32 %v3500_v31, %v5123_v41  ;;  %3041 = vst [vmem:[#allocation5 + $0x60] sm:$0xff] %v3025_v10  ;;  %v3026_v62 = vadd.f32 %v3541_v55, %v3010_v0  ;;  %v3544_v41 = vld [vmem:[#allocation2 + $0xb0] sm:$0xff] }
 0xa72   :  { %3058 = vst [vmem:[#allocation6 + $0x68] sm:$0xff] %v3010_v0  ;;  %v3011_v11 = vadd.f32 %v2995_v12, %v2979_v44  ;;  %v2980_v52 = vmul.f32 %v3542_v15, %v2964_v17  ;;  %v2996_v30 = vmul.f32 %v3502_v42, %v5131_v63  ;;  %3034 = vst [vmem:[#allocation5 + $0x28] sm:$0xff] %v3018_v24 }
 0xa73   :  { %v3019_v37 = vadd.f32 %v3543_v8, %v3003_v7  ;;  %3051 = vst [vmem:[#allocation6 + $0x30] sm:$0xff] %v3003_v7  ;;  %v3004_v40 = vadd.f32 %v2988_v51, %v2972_v60  ;;  %3042 = vst [vmem:[#allocation5 + $0x68] sm:$0xff] %v3026_v62 }
 0xa74   :  { %v3027_v47 = vadd.f32 %v3544_v41, %v3011_v11  ;;  %3059 = vst [vmem:[#allocation6 + $0x70] sm:$0xff] %v3011_v11  ;;  %v3012_v14 = vadd.f32 %v2996_v30, %v2980_v52 }
 0xa75   :  { %3035 = vst [vmem:[#allocation5 + $0x30] sm:$0xff] %v3019_v37  ;;  %v3020_v9 = vadd.f32 %v3545_v20, %v3004_v40  ;;  %3052 = vst [vmem:[#allocation6 + $0x38] sm:$0xff] %v3004_v40 }
 0xa76   :  { %3043 = vst [vmem:[#allocation5 + $0x70] sm:$0xff] %v3027_v47  ;;  %v3028_v63 = vadd.f32 %v3546_v23, %v3012_v14  ;;  %3060 = vst [vmem:[#allocation6 + $0x78] sm:$0xff] %v3012_v14 }
 0xa77   :  { %3036 = vst [vmem:[#allocation5 + $0x38] sm:$0xff] %v3020_v9 }
 0xa78   :  { %3580 = shalt.err (!%p3577_p12)
}
 0xa79   :  { %s3581_s29 = scalar_lea.hbm %s5216_s10, 2048 }
 0xa7a   :  { %p3582_p13 = scmp.ne.s32.totalorder %s5216_s10, %s3581_s29  ;;  %p3585_p0 = scmp.lt.u32.totalorder %s3581_s29, %s5216_s10 }
 0xa7c   :  { %p3587_p1 = pnand %p3585_p0, %p3582_p13 }
 0xa7e   :  { %3590 = shalt.err (!%p3587_p1)
}
 0xa7f   :  { %3084 = dma.vmem_to_hbm [thread:$0]  %s3079_s13, 2048, %s5216_s10, [#allocation7], %s3620_s23, %s3620_s23, %s3621_s24   ;;  %3044 = vst [vmem:[#allocation5 + $0x78] sm:$0xff] %v3028_v63 }
 0xa80   :  { %s3591_s21 = scalar_lea.vmem %s5169_s15, 2048  ;;  %p3596_p3 = scmp.lt.s32.totalorder %s5169_s15, %s5169_s15 }
 0xa81   :  { %p3592_p2 = scmp.ne.s32.totalorder %s5169_s15, %s3591_s21  ;;  %p3597_p4 = scmp.lt.s32.totalorder %s3591_s21, %s3591_s21 }
 0xa83   :  { %p3598_p5 = por %p3597_p4, %p3596_p3 }
 0xa85   :  { %p3599_p6 = pnand %p3598_p5, %p3592_p2 }
 0xa87   :  { %3602 = shalt.err (!%p3599_p6)
}
 0xa88   :  { %s3603_s26 = scalar_lea.hbm %s5215_s9, 2048 }
 0xa89   :  { %p3604_p7 = scmp.ne.s32.totalorder %s5215_s9, %s3603_s26  ;;  %p3607_p8 = scmp.lt.u32.totalorder %s3603_s26, %s5215_s9 }
 0xa8b   :  { %p3609_p9 = pnand %p3607_p8, %p3604_p7 }
 0xa8d   :  { %3612 = shalt.err (!%p3609_p9)
}
 0xa8e   :  { %3072 = dma.vmem_to_hbm [thread:$0]  %s5169_s15, 2048, %s5215_s9, [#allocation4], %s3620_s23, %s3620_s23, %s3621_s24  }
 0xa8f   :  { %3615 = dma.done.wait [#allocation4], 2048  }
 0xa90   :  { %3616 = vsyncadd [#allocation4], 4294965248 }
 0xa91   :  { %3617 = dma.done.wait [#allocation7], 2048  }
 0xa92   :  { %3618 = vsyncadd [#allocation7], 4294965248 }
 0xa93   :  { %3091 = vsyncpa [#allocation3], 1 }
 0xa94   :  { %3092 = vsyncpa [#allocation4], 1 }
 0xa95   :  { %3093 = vsyncpa [#allocation7], 1 }

</bundles_post_ra>
